<compile_context>
chip_gen: v7x
topology: tpu7x:2x2x1
jax: 0.10.0
libtpu: 0.0.40
codegen_flags: <defaults>
</compile_context>

<pallas_src>
import functools

import jax
import jax.numpy as jnp
from jax import lax
from jax.experimental import pallas as pl
from jax.experimental.pallas import tpu as pltpu

EPS = 1e-5  # BatchNorm2d default eps


def _silu(x):
    return x * (1.0 / (1.0 + jnp.exp(-x)))


# ------------------------------ Pallas kernel -------------------------------

def _dw_conv_flat(xflat, w_ref, b_ref, mask_ref, fbuf_ref, *, k, W, pmax):
    """Depthwise k x k conv (stride 1, pad k//2) + folded-BN bias.

    Operates entirely in the lane-dense (C, H*W) layout:
      * the image is dropped into a zero-padded flat VMEM scratch,
      * each tap is a static shifted lane-slice of that buffer,
      * per-channel weights broadcast from a (C, 1) column (lane broadcast),
      * row-edge wraparound is removed by a precomputed (1, HW) 0/1 mask.
    No reshapes / transposes / concats are materialized.
    """
    C, HW = xflat.shape
    p = k // 2
    padlen = p * (W + 1)                     # zeros in front of the image
    # zero halo + stale contents, then place the image at offset `padlen`
    fbuf_ref[...] = jnp.zeros_like(fbuf_ref)
    fbuf_ref[:C, padlen:padlen + HW] = xflat
    acc = jnp.zeros((C, HW), jnp.float32)
    for ky in range(k):
        for kx in range(k):
            off = ky * W + kx                              # static lane offset
            vals = fbuf_ref[:C, off:off + HW]              # (C, HW) shifted window
            t = ky * k + kx
            w_tap = w_ref[:, t:t + 1]                      # (C, 1) per-channel weight
            row = kx - p + pmax
            m = mask_ref[row:row + 1, :]                   # (1, HW) edge mask
            acc = acc + (vals * w_tap) * m
    return acc + b_ref[...]                                # bias: (C,1) lane-broadcast


def _ghost_bottleneck_kernel(x_ref, mask_ref, w1_ref, b1_ref, wdw1_ref, bdw1_ref,
                             w2_ref, b2_ref, wdw2_ref, bdw2_ref, wsc_ref, bsc_ref,
                             o_ref, fbuf_ref, *, W, k_dw, k_sc, pmax):
    x = x_ref[0]                                           # (C1, HW), HW on lanes
    ch1 = w1_ref.shape[0]
    ch2 = w2_ref.shape[0]

    # ---- GhostConv #1 / cv1 : 1x1 conv + BN + SiLU (MXU, lane-dense) ----
    y1a = jnp.dot(w1_ref[...], x, preferred_element_type=jnp.float32)
    y1a = _silu(y1a + b1_ref[...])                         # (ch1, HW)

    # ---- GhostConv #1 / cv2 : depthwise 5x5 + BN + SiLU ----
    y1b = _silu(_dw_conv_flat(y1a, wdw1_ref, bdw1_ref, mask_ref, fbuf_ref,
                              k=k_dw, W=W, pmax=pmax))     # (ch1, HW)

    # ---- GhostConv #2 / cv1 : 1x1 conv + BN (no act) ----
    # cat([y1a, y1b], C) @ W2^T computed as two partial dots (no concat).
    w2 = w2_ref[...]
    y2a = (jnp.dot(w2[:, :ch1], y1a, preferred_element_type=jnp.float32)
           + jnp.dot(w2[:, ch1:], y1b, preferred_element_type=jnp.float32)
           + b2_ref[...])                                  # (ch2, HW)

    # ---- GhostConv #2 / cv2 : depthwise 5x5 + BN (no act) ----
    y2b = _dw_conv_flat(y2a, wdw2_ref, bdw2_ref, mask_ref, fbuf_ref,
                        k=k_dw, W=W, pmax=pmax)            # (ch2, HW)

    # ---- shortcut : depthwise 3x3 + BN (no act) ----
    sc = _dw_conv_flat(x, wsc_ref, bsc_ref, mask_ref, fbuf_ref,
                       k=k_sc, W=W, pmax=pmax)             # (C1, HW)

    # ---- residual add; conv-path channels are [y2a ; y2b]; lane-dense stores ----
    o_ref[0, :ch2, :] = (y2a + sc[:ch2]).astype(o_ref.dtype)
    o_ref[0, ch2:, :] = (y2b + sc[ch2:]).astype(o_ref.dtype)


# --------------------------------- wrapper ----------------------------------

def ghost_bottleneck_forward(x_nchw, params):
    """GhostBottleneck.forward (k=3, s=1 path).  Input/output are NCHW."""
    kp = fold_params_for_kernel(params)
    N, C1, H, W = x_nchw.shape
    HW = H * W
    ch1 = kp["w1"].shape[0]
    ch2 = kp["w2"].shape[0]
    C2 = 2 * ch2
    assert C1 == C2, "s=1 GhostBottleneck residual add requires c1 == c2"
    k_dw = int(round(kp["wdw1"].shape[1] ** 0.5))          # 5
    k_sc = int(round(kp["wsc"].shape[1] ** 0.5))           # 3
    pmax = max(k_dw, k_sc) // 2

    # column-edge masks for the flat depthwise taps:
    # mask[s + pmax, y*W + x] == 1  iff column x+s stays inside the same row.
    col = jnp.arange(HW, dtype=jnp.int32) % W
    shifts = jnp.arange(-pmax, pmax + 1, dtype=jnp.int32)
    shifted = col[None, :] + shifts[:, None]
    mask = jnp.logical_and(shifted >= 0, shifted < W).astype(jnp.float32)

    xf = x_nchw.reshape(N, C1, HW).astype(jnp.float32)     # free reshape (contiguous)

    kern = functools.partial(_ghost_bottleneck_kernel, W=W, k_dw=k_dw,
                             k_sc=k_sc, pmax=pmax)
    cmax = max(C1, ch1, ch2)
    fbuf_len = HW + 2 * pmax * (W + 1)

    out = pl.pallas_call(
        kern,
        out_shape=jax.ShapeDtypeStruct((N, C2, HW), jnp.float32),
        grid=(N,),
        in_specs=[
            pl.BlockSpec((1, C1, HW), lambda n: (n, 0, 0)),       # x (per image)
            pl.BlockSpec(mask.shape, lambda n: (0, 0)),           # edge masks
            pl.BlockSpec(kp["w1"].shape, lambda n: (0, 0)),
            pl.BlockSpec(kp["b1"].shape, lambda n: (0, 0)),
            pl.BlockSpec(kp["wdw1"].shape, lambda n: (0, 0)),
            pl.BlockSpec(kp["bdw1"].shape, lambda n: (0, 0)),
            pl.BlockSpec(kp["w2"].shape, lambda n: (0, 0)),
            pl.BlockSpec(kp["b2"].shape, lambda n: (0, 0)),
            pl.BlockSpec(kp["wdw2"].shape, lambda n: (0, 0)),
            pl.BlockSpec(kp["bdw2"].shape, lambda n: (0, 0)),
            pl.BlockSpec(kp["wsc"].shape, lambda n: (0, 0)),
            pl.BlockSpec(kp["bsc"].shape, lambda n: (0, 0)),
        ],
        out_specs=pl.BlockSpec((1, C2, HW), lambda n: (n, 0, 0)),
        scratch_shapes=[pltpu.VMEM((cmax, fbuf_len), jnp.float32)],
        compiler_params=pltpu.CompilerParams(
            dimension_semantics=("parallel",)),  # one image per TC on v7x
    )(xf, mask, kp["w1"], kp["b1"], kp["wdw1"], kp["bdw1"],
      kp["w2"], kp["b2"], kp["wdw2"], kp["bdw2"], kp["wsc"], kp["bsc"])
    return out.reshape(N, C2, H, W)


# ------------------------- parameter construction ---------------------------

def make_conv_bn_params(key, c_out, c_in_per_group, k):
    """Synthetic Conv2d(bias=False) weight + BatchNorm2d (inference) params."""
    kw, kg, kb, km, kv = jax.random.split(key, 5)
    fan_in = c_in_per_group * k * k
    w = jax.random.normal(kw, (c_out, c_in_per_group, k, k), jnp.float32) \
        / jnp.sqrt(float(fan_in))
    return {
        "w": w,
        "gamma": 1.0 + 0.1 * jax.random.normal(kg, (c_out,), jnp.float32),
        "beta": 0.1 * jax.random.normal(kb, (c_out,), jnp.float32),
        "mean": 0.1 * jax.random.normal(km, (c_out,), jnp.float32),
        "var": 1.0 + 0.1 * jax.random.uniform(kv, (c_out,), jnp.float32),
    }


def init_ghost_bottleneck_params(key, c1, c2, k=3):
    """Parameters for GhostBottleneck(c1, c2, k, s=1)."""
    c_ = c2 // 2          # GhostConv #1 output channels
    ch1 = c_ // 2         # GhostConv #1 cv1 output channels
    ch2 = c2 // 2         # GhostConv #2 cv1 output channels
    keys = jax.random.split(key, 5)
    return {
        "g1_cv1": make_conv_bn_params(keys[0], ch1, c1, 1),   # 1x1,  SiLU
        "g1_cv2": make_conv_bn_params(keys[1], ch1, 1, 5),    # dw5x5, SiLU
        "g2_cv1": make_conv_bn_params(keys[2], ch2, c_, 1),   # 1x1,  no act
        "g2_cv2": make_conv_bn_params(keys[3], ch2, 1, 5),    # dw5x5, no act
        "sc_dw":  make_conv_bn_params(keys[4], c1, 1, k),     # dw3x3 shortcut, no act
    }


def _fold_bn(layer):
    scale = layer["gamma"] / jnp.sqrt(layer["var"] + EPS)
    w_eff = layer["w"] * scale[:, None, None, None]
    b_eff = layer["beta"] - layer["mean"] * scale
    return w_eff, b_eff


def fold_params_for_kernel(params):
    """Fold BN into conv weights and reshape to the kernel's (Cout, ...) forms."""
    kp = {}
    w, b = _fold_bn(params["g1_cv1"])
    kp["w1"], kp["b1"] = w[:, :, 0, 0], b.reshape(-1, 1)
    w, b = _fold_bn(params["g1_cv2"])
    kp["wdw1"], kp["bdw1"] = w.reshape(w.shape[0], -1), b.reshape(-1, 1)
    w, b = _fold_bn(params["g2_cv1"])
    kp["w2"], kp["b2"] = w[:, :, 0, 0], b.reshape(-1, 1)
    w, b = _fold_bn(params["g2_cv2"])
    kp["wdw2"], kp["bdw2"] = w.reshape(w.shape[0], -1), b.reshape(-1, 1)
    w, b = _fold_bn(params["sc_dw"])
    kp["wsc"], kp["bsc"] = w.reshape(w.shape[0], -1), b.reshape(-1, 1)
    return kp


# ------------------------------- pure-JAX ref --------------------------------

def _ref_conv_bn_act(x, layer, *, pad=0, groups=1, act=True):
    y = lax.conv_general_dilated(
        x, layer["w"], window_strides=(1, 1),
        padding=[(pad, pad), (pad, pad)],
        feature_group_count=groups,
        dimension_numbers=("NCHW", "OIHW", "NCHW"))
    scale = layer["gamma"] / jnp.sqrt(layer["var"] + EPS)
    shift = layer["beta"] - layer["mean"] * scale
    y = y * scale.reshape(1, -1, 1, 1) + shift.reshape(1, -1, 1, 1)
    return y * jax.nn.sigmoid(y) if act else y


def ghost_bottleneck_reference(x, params):
    l = params["g1_cv1"]
    y1a = _ref_conv_bn_act(x, l, act=True)
    l = params["g1_cv2"]
    y1b = _ref_conv_bn_act(y1a, l, pad=2, groups=l["w"].shape[0], act=True)
    g1 = jnp.concatenate([y1a, y1b], axis=1)
    l = params["g2_cv1"]
    y2a = _ref_conv_bn_act(g1, l, act=False)
    l = params["g2_cv2"]
    y2b = _ref_conv_bn_act(y2a, l, pad=2, groups=l["w"].shape[0], act=False)
    conv_out = jnp.concatenate([y2a, y2b], axis=1)
    l = params["sc_dw"]
    sc = _ref_conv_bn_act(x, l, pad=l["w"].shape[-1] // 2,
                          groups=l["w"].shape[0], act=False)
    return conv_out + sc


# ----------------------------------- main ------------------------------------

if __name__ == "__main__":
    c1 = c2 = 8                       # s=1 GhostBottleneck requires c1 == c2
    N, H, W = 2, 16, 16

    key = jax.random.PRNGKey(0)
    k_x, k_p = jax.random.split(key)
    x = jax.random.normal(k_x, (N, c1, H, W), jnp.float32)    # NCHW input
    params = init_ghost_bottleneck_params(k_p, c1, c2, k=3)

    out = jax.block_until_ready(ghost_bottleneck_forward(x, params))
    assert out.shape == (N, c2, H, W), out.shape

    ref = jax.block_until_ready(ghost_bottleneck_reference(x, params))
    err = float(jnp.max(jnp.abs(out - ref)))
    assert jnp.allclose(out, ref, atol=2e-4, rtol=2e-4), err

    print("KERNEL_OK")
</pallas_src>

<mosaic_0001>
module attributes {stable_mosaic.version = 11 : i64} {
  func.func @_ghost_bottleneck_kernel(%arg0: i32, %arg1: memref<1x8x256xf32, #tpu.memory_space<vmem>>, %arg2: memref<5x256xf32, #tpu.memory_space<vmem>>, %arg3: memref<2x8xf32, #tpu.memory_space<vmem>>, %arg4: memref<2x1xf32, #tpu.memory_space<vmem>>, %arg5: memref<2x25xf32, #tpu.memory_space<vmem>>, %arg6: memref<2x1xf32, #tpu.memory_space<vmem>>, %arg7: memref<4x4xf32, #tpu.memory_space<vmem>>, %arg8: memref<4x1xf32, #tpu.memory_space<vmem>>, %arg9: memref<4x25xf32, #tpu.memory_space<vmem>>, %arg10: memref<4x1xf32, #tpu.memory_space<vmem>>, %arg11: memref<8x9xf32, #tpu.memory_space<vmem>>, %arg12: memref<8x1xf32, #tpu.memory_space<vmem>>, %arg13: memref<1x8x256xf32, #tpu.memory_space<vmem>>, %arg14: memref<8x324xf32, #tpu.memory_space<vmem>>) attributes {dimension_semantics = [#tpu.dimension_semantics<parallel>], iteration_bounds = array<i64: 2>, scalar_prefetch = 0 : i64, scratch_operands = 1 : i64, tpu.core_type = #tpu.core_type<tc>, window_params = [{transform_indices = @transform_0, window_bounds = array<i64: 1, 8, 256>}, {pipeline_mode = #tpu.pipeline_mode<synchronous>, transform_indices = @transform_1, window_bounds = array<i64: 5, 256>}, {pipeline_mode = #tpu.pipeline_mode<synchronous>, transform_indices = @transform_2, window_bounds = array<i64: 2, 8>}, {pipeline_mode = #tpu.pipeline_mode<synchronous>, transform_indices = @transform_3, window_bounds = array<i64: 2, 1>}, {pipeline_mode = #tpu.pipeline_mode<synchronous>, transform_indices = @transform_4, window_bounds = array<i64: 2, 25>}, {pipeline_mode = #tpu.pipeline_mode<synchronous>, transform_indices = @transform_5, window_bounds = array<i64: 2, 1>}, {pipeline_mode = #tpu.pipeline_mode<synchronous>, transform_indices = @transform_6, window_bounds = array<i64: 4, 4>}, {pipeline_mode = #tpu.pipeline_mode<synchronous>, transform_indices = @transform_7, window_bounds = array<i64: 4, 1>}, {pipeline_mode = #tpu.pipeline_mode<synchronous>, transform_indices = @transform_8, window_bounds = array<i64: 4, 25>}, {pipeline_mode = #tpu.pipeline_mode<synchronous>, transform_indices = @transform_9, window_bounds = array<i64: 4, 1>}, {pipeline_mode = #tpu.pipeline_mode<synchronous>, transform_indices = @transform_10, window_bounds = array<i64: 8, 9>}, {pipeline_mode = #tpu.pipeline_mode<synchronous>, transform_indices = @transform_11, window_bounds = array<i64: 8, 1>}, {transform_indices = @transform_12, window_bounds = array<i64: 1, 8, 256>}]} {
    %c0 = arith.constant 0 : index
    %c0_0 = arith.constant 0 : index
    %c0_1 = arith.constant 0 : index
    %0 = vector.load %arg1[%c0, %c0_0, %c0_1] : memref<1x8x256xf32, #tpu.memory_space<vmem>>, vector<1x8x256xf32>
    %1 = vector.shape_cast %0 : vector<1x8x256xf32> to vector<8x256xf32>
    %c0_2 = arith.constant 0 : index
    %c0_3 = arith.constant 0 : index
    %2 = vector.load %arg3[%c0_2, %c0_3] : memref<2x8xf32, #tpu.memory_space<vmem>>, vector<2x8xf32>
    %cst = arith.constant dense<0.000000e+00> : vector<2x256xf32>
    %3 = tpu.matmul %2, %1, %cst {dimension_numbers = #tpu.dot_dimension_numbers<[1], [0], [0], [1], [0, 0, 1, 1], [], []>} : vector<2x8xf32>, vector<8x256xf32>, vector<2x256xf32> -> vector<2x256xf32>
    %c0_4 = arith.constant 0 : index
    %c0_5 = arith.constant 0 : index
    %4 = vector.load %arg4[%c0_4, %c0_5] : memref<2x1xf32, #tpu.memory_space<vmem>>, vector<2x1xf32>
    %5 = vector.broadcast %4 : vector<2x1xf32> to vector<2x256xf32>
    %6 = arith.addf %3, %5 : vector<2x256xf32>
    %cst_6 = arith.constant 0.000000e+00 : f32
    %7 = vector.broadcast %cst_6 : f32 to vector<2x256xf32>
    %8 = arith.subf %7, %6 : vector<2x256xf32>
    %9 = math.exp %8 : vector<2x256xf32>
    %cst_7 = arith.constant 1.000000e+00 : f32
    %10 = vector.broadcast %cst_7 : f32 to vector<2x256xf32>
    %11 = arith.addf %10, %9 : vector<2x256xf32>
    %cst_8 = arith.constant 1.000000e+00 : f32
    %12 = vector.broadcast %cst_8 : f32 to vector<2x256xf32>
    %13 = arith.divf %12, %11 : vector<2x256xf32>
    %14 = arith.mulf %6, %13 : vector<2x256xf32>
    %cst_9 = arith.constant 0.000000e+00 : f32
    %15 = vector.broadcast %cst_9 : f32 to vector<8x324xf32>
    %c0_10 = arith.constant 0 : index
    %c0_11 = arith.constant 0 : index
    %16 = vector.load %arg14[%c0_10, %c0_11] : memref<8x324xf32, #tpu.memory_space<vmem>>, vector<8x324xf32>
    tpu.vector_store %arg14[%c0_10, %c0_11], %15 {strides = array<i32>} : memref<8x324xf32, #tpu.memory_space<vmem>>, vector<8x324xf32>,
    %c0_12 = arith.constant 0 : index
    %c34 = arith.constant 34 : index
    %17 = vector.load %arg14[%c0_12, %c34] : memref<8x324xf32, #tpu.memory_space<vmem>>, vector<2x256xf32>
    tpu.vector_store %arg14[%c0_12, %c34], %14 {strides = array<i32>} : memref<8x324xf32, #tpu.memory_space<vmem>>, vector<2x256xf32>,
    %cst_13 = arith.constant 0.000000e+00 : f32
    %18 = vector.broadcast %cst_13 : f32 to vector<2x256xf32>
    %c0_14 = arith.constant 0 : index
    %c0_15 = arith.constant 0 : index
    %19 = vector.load %arg14[%c0_14, %c0_15] : memref<8x324xf32, #tpu.memory_space<vmem>>, vector<2x256xf32>
    %c0_16 = arith.constant 0 : index
    %c0_17 = arith.constant 0 : index
    %20 = vector.load %arg5[%c0_16, %c0_17] : memref<2x25xf32, #tpu.memory_space<vmem>>, vector<2x1xf32>
    %c0_18 = arith.constant 0 : index
    %c0_19 = arith.constant 0 : index
    %21 = vector.load %arg2[%c0_18, %c0_19] : memref<5x256xf32, #tpu.memory_space<vmem>>, vector<1x256xf32>
    %22 = vector.broadcast %20 : vector<2x1xf32> to vector<2x256xf32>
    %23 = arith.mulf %19, %22 : vector<2x256xf32>
    %24 = vector.broadcast %21 : vector<1x256xf32> to vector<2x256xf32>
    %25 = arith.mulf %23, %24 : vector<2x256xf32>
    %26 = arith.addf %18, %25 : vector<2x256xf32>
    %c0_20 = arith.constant 0 : index
    %c1 = arith.constant 1 : index
    %27 = vector.load %arg14[%c0_20, %c1] : memref<8x324xf32, #tpu.memory_space<vmem>>, vector<2x256xf32>
    %c0_21 = arith.constant 0 : index
    %c1_22 = arith.constant 1 : index
    %28 = vector.load %arg5[%c0_21, %c1_22] : memref<2x25xf32, #tpu.memory_space<vmem>>, vector<2x1xf32>
    %c1_23 = arith.constant 1 : index
    %c0_24 = arith.constant 0 : index
    %29 = vector.load %arg2[%c1_23, %c0_24] : memref<5x256xf32, #tpu.memory_space<vmem>>, vector<1x256xf32>
    %30 = vector.broadcast %28 : vector<2x1xf32> to vector<2x256xf32>
    %31 = arith.mulf %27, %30 : vector<2x256xf32>
    %32 = vector.broadcast %29 : vector<1x256xf32> to vector<2x256xf32>
    %33 = arith.mulf %31, %32 : vector<2x256xf32>
    %34 = arith.addf %26, %33 : vector<2x256xf32>
    %c0_25 = arith.constant 0 : index
    %c2 = arith.constant 2 : index
    %35 = vector.load %arg14[%c0_25, %c2] : memref<8x324xf32, #tpu.memory_space<vmem>>, vector<2x256xf32>
    %c0_26 = arith.constant 0 : index
    %c2_27 = arith.constant 2 : index
    %36 = vector.load %arg5[%c0_26, %c2_27] : memref<2x25xf32, #tpu.memory_space<vmem>>, vector<2x1xf32>
    %c2_28 = arith.constant 2 : index
    %c0_29 = arith.constant 0 : index
    %37 = vector.load %arg2[%c2_28, %c0_29] : memref<5x256xf32, #tpu.memory_space<vmem>>, vector<1x256xf32>
    %38 = vector.broadcast %36 : vector<2x1xf32> to vector<2x256xf32>
    %39 = arith.mulf %35, %38 : vector<2x256xf32>
    %40 = vector.broadcast %37 : vector<1x256xf32> to vector<2x256xf32>
    %41 = arith.mulf %39, %40 : vector<2x256xf32>
    %42 = arith.addf %34, %41 : vector<2x256xf32>
    %c0_30 = arith.constant 0 : index
    %c3 = arith.constant 3 : index
    %43 = vector.load %arg14[%c0_30, %c3] : memref<8x324xf32, #tpu.memory_space<vmem>>, vector<2x256xf32>
    %c0_31 = arith.constant 0 : index
    %c3_32 = arith.constant 3 : index
    %44 = vector.load %arg5[%c0_31, %c3_32] : memref<2x25xf32, #tpu.memory_space<vmem>>, vector<2x1xf32>
    %c3_33 = arith.constant 3 : index
    %c0_34 = arith.constant 0 : index
    %45 = vector.load %arg2[%c3_33, %c0_34] : memref<5x256xf32, #tpu.memory_space<vmem>>, vector<1x256xf32>
    %46 = vector.broadcast %44 : vector<2x1xf32> to vector<2x256xf32>
    %47 = arith.mulf %43, %46 : vector<2x256xf32>
    %48 = vector.broadcast %45 : vector<1x256xf32> to vector<2x256xf32>
    %49 = arith.mulf %47, %48 : vector<2x256xf32>
    %50 = arith.addf %42, %49 : vector<2x256xf32>
    %c0_35 = arith.constant 0 : index
    %c4 = arith.constant 4 : index
    %51 = vector.load %arg14[%c0_35, %c4] : memref<8x324xf32, #tpu.memory_space<vmem>>, vector<2x256xf32>
    %c0_36 = arith.constant 0 : index
    %c4_37 = arith.constant 4 : index
    %52 = vector.load %arg5[%c0_36, %c4_37] : memref<2x25xf32, #tpu.memory_space<vmem>>, vector<2x1xf32>
    %c4_38 = arith.constant 4 : index
    %c0_39 = arith.constant 0 : index
    %53 = vector.load %arg2[%c4_38, %c0_39] : memref<5x256xf32, #tpu.memory_space<vmem>>, vector<1x256xf32>
    %54 = vector.broadcast %52 : vector<2x1xf32> to vector<2x256xf32>
    %55 = arith.mulf %51, %54 : vector<2x256xf32>
    %56 = vector.broadcast %53 : vector<1x256xf32> to vector<2x256xf32>
    %57 = arith.mulf %55, %56 : vector<2x256xf32>
    %58 = arith.addf %50, %57 : vector<2x256xf32>
    %c0_40 = arith.constant 0 : index
    %c16 = arith.constant 16 : index
    %59 = vector.load %arg14[%c0_40, %c16] : memref<8x324xf32, #tpu.memory_space<vmem>>, vector<2x256xf32>
    %c0_41 = arith.constant 0 : index
    %c5 = arith.constant 5 : index
    %60 = vector.load %arg5[%c0_41, %c5] : memref<2x25xf32, #tpu.memory_space<vmem>>, vector<2x1xf32>
    %c0_42 = arith.constant 0 : index
    %c0_43 = arith.constant 0 : index
    %61 = vector.load %arg2[%c0_42, %c0_43] : memref<5x256xf32, #tpu.memory_space<vmem>>, vector<1x256xf32>
    %62 = vector.broadcast %60 : vector<2x1xf32> to vector<2x256xf32>
    %63 = arith.mulf %59, %62 : vector<2x256xf32>
    %64 = vector.broadcast %61 : vector<1x256xf32> to vector<2x256xf32>
    %65 = arith.mulf %63, %64 : vector<2x256xf32>
    %66 = arith.addf %58, %65 : vector<2x256xf32>
    %c0_44 = arith.constant 0 : index
    %c17 = arith.constant 17 : index
    %67 = vector.load %arg14[%c0_44, %c17] : memref<8x324xf32, #tpu.memory_space<vmem>>, vector<2x256xf32>
    %c0_45 = arith.constant 0 : index
    %c6 = arith.constant 6 : index
    %68 = vector.load %arg5[%c0_45, %c6] : memref<2x25xf32, #tpu.memory_space<vmem>>, vector<2x1xf32>
    %c1_46 = arith.constant 1 : index
    %c0_47 = arith.constant 0 : index
    %69 = vector.load %arg2[%c1_46, %c0_47] : memref<5x256xf32, #tpu.memory_space<vmem>>, vector<1x256xf32>
    %70 = vector.broadcast %68 : vector<2x1xf32> to vector<2x256xf32>
    %71 = arith.mulf %67, %70 : vector<2x256xf32>
    %72 = vector.broadcast %69 : vector<1x256xf32> to vector<2x256xf32>
    %73 = arith.mulf %71, %72 : vector<2x256xf32>
    %74 = arith.addf %66, %73 : vector<2x256xf32>
    %c0_48 = arith.constant 0 : index
    %c18 = arith.constant 18 : index
    %75 = vector.load %arg14[%c0_48, %c18] : memref<8x324xf32, #tpu.memory_space<vmem>>, vector<2x256xf32>
    %c0_49 = arith.constant 0 : index
    %c7 = arith.constant 7 : index
    %76 = vector.load %arg5[%c0_49, %c7] : memref<2x25xf32, #tpu.memory_space<vmem>>, vector<2x1xf32>
    %c2_50 = arith.constant 2 : index
    %c0_51 = arith.constant 0 : index
    %77 = vector.load %arg2[%c2_50, %c0_51] : memref<5x256xf32, #tpu.memory_space<vmem>>, vector<1x256xf32>
    %78 = vector.broadcast %76 : vector<2x1xf32> to vector<2x256xf32>
    %79 = arith.mulf %75, %78 : vector<2x256xf32>
    %80 = vector.broadcast %77 : vector<1x256xf32> to vector<2x256xf32>
    %81 = arith.mulf %79, %80 : vector<2x256xf32>
    %82 = arith.addf %74, %81 : vector<2x256xf32>
    %c0_52 = arith.constant 0 : index
    %c19 = arith.constant 19 : index
    %83 = vector.load %arg14[%c0_52, %c19] : memref<8x324xf32, #tpu.memory_space<vmem>>, vector<2x256xf32>
    %c0_53 = arith.constant 0 : index
    %c8 = arith.constant 8 : index
    %84 = vector.load %arg5[%c0_53, %c8] : memref<2x25xf32, #tpu.memory_space<vmem>>, vector<2x1xf32>
    %c3_54 = arith.constant 3 : index
    %c0_55 = arith.constant 0 : index
    %85 = vector.load %arg2[%c3_54, %c0_55] : memref<5x256xf32, #tpu.memory_space<vmem>>, vector<1x256xf32>
    %86 = vector.broadcast %84 : vector<2x1xf32> to vector<2x256xf32>
    %87 = arith.mulf %83, %86 : vector<2x256xf32>
    %88 = vector.broadcast %85 : vector<1x256xf32> to vector<2x256xf32>
    %89 = arith.mulf %87, %88 : vector<2x256xf32>
    %90 = arith.addf %82, %89 : vector<2x256xf32>
    %c0_56 = arith.constant 0 : index
    %c20 = arith.constant 20 : index
    %91 = vector.load %arg14[%c0_56, %c20] : memref<8x324xf32, #tpu.memory_space<vmem>>, vector<2x256xf32>
    %c0_57 = arith.constant 0 : index
    %c9 = arith.constant 9 : index
    %92 = vector.load %arg5[%c0_57, %c9] : memref<2x25xf32, #tpu.memory_space<vmem>>, vector<2x1xf32>
    %c4_58 = arith.constant 4 : index
    %c0_59 = arith.constant 0 : index
    %93 = vector.load %arg2[%c4_58, %c0_59] : memref<5x256xf32, #tpu.memory_space<vmem>>, vector<1x256xf32>
    %94 = vector.broadcast %92 : vector<2x1xf32> to vector<2x256xf32>
    %95 = arith.mulf %91, %94 : vector<2x256xf32>
    %96 = vector.broadcast %93 : vector<1x256xf32> to vector<2x256xf32>
    %97 = arith.mulf %95, %96 : vector<2x256xf32>
    %98 = arith.addf %90, %97 : vector<2x256xf32>
    %c0_60 = arith.constant 0 : index
    %c32 = arith.constant 32 : index
    %99 = vector.load %arg14[%c0_60, %c32] : memref<8x324xf32, #tpu.memory_space<vmem>>, vector<2x256xf32>
    %c0_61 = arith.constant 0 : index
    %c10 = arith.constant 10 : index
    %100 = vector.load %arg5[%c0_61, %c10] : memref<2x25xf32, #tpu.memory_space<vmem>>, vector<2x1xf32>
    %c0_62 = arith.constant 0 : index
    %c0_63 = arith.constant 0 : index
    %101 = vector.load %arg2[%c0_62, %c0_63] : memref<5x256xf32, #tpu.memory_space<vmem>>, vector<1x256xf32>
    %102 = vector.broadcast %100 : vector<2x1xf32> to vector<2x256xf32>
    %103 = arith.mulf %99, %102 : vector<2x256xf32>
    %104 = vector.broadcast %101 : vector<1x256xf32> to vector<2x256xf32>
    %105 = arith.mulf %103, %104 : vector<2x256xf32>
    %106 = arith.addf %98, %105 : vector<2x256xf32>
    %c0_64 = arith.constant 0 : index
    %c33 = arith.constant 33 : index
    %107 = vector.load %arg14[%c0_64, %c33] : memref<8x324xf32, #tpu.memory_space<vmem>>, vector<2x256xf32>
    %c0_65 = arith.constant 0 : index
    %c11 = arith.constant 11 : index
    %108 = vector.load %arg5[%c0_65, %c11] : memref<2x25xf32, #tpu.memory_space<vmem>>, vector<2x1xf32>
    %c1_66 = arith.constant 1 : index
    %c0_67 = arith.constant 0 : index
    %109 = vector.load %arg2[%c1_66, %c0_67] : memref<5x256xf32, #tpu.memory_space<vmem>>, vector<1x256xf32>
    %110 = vector.broadcast %108 : vector<2x1xf32> to vector<2x256xf32>
    %111 = arith.mulf %107, %110 : vector<2x256xf32>
    %112 = vector.broadcast %109 : vector<1x256xf32> to vector<2x256xf32>
    %113 = arith.mulf %111, %112 : vector<2x256xf32>
    %114 = arith.addf %106, %113 : vector<2x256xf32>
    %c0_68 = arith.constant 0 : index
    %c34_69 = arith.constant 34 : index
    %115 = vector.load %arg14[%c0_68, %c34_69] : memref<8x324xf32, #tpu.memory_space<vmem>>, vector<2x256xf32>
    %c0_70 = arith.constant 0 : index
    %c12 = arith.constant 12 : index
    %116 = vector.load %arg5[%c0_70, %c12] : memref<2x25xf32, #tpu.memory_space<vmem>>, vector<2x1xf32>
    %c2_71 = arith.constant 2 : index
    %c0_72 = arith.constant 0 : index
    %117 = vector.load %arg2[%c2_71, %c0_72] : memref<5x256xf32, #tpu.memory_space<vmem>>, vector<1x256xf32>
    %118 = vector.broadcast %116 : vector<2x1xf32> to vector<2x256xf32>
    %119 = arith.mulf %115, %118 : vector<2x256xf32>
    %120 = vector.broadcast %117 : vector<1x256xf32> to vector<2x256xf32>
    %121 = arith.mulf %119, %120 : vector<2x256xf32>
    %122 = arith.addf %114, %121 : vector<2x256xf32>
    %c0_73 = arith.constant 0 : index
    %c35 = arith.constant 35 : index
    %123 = vector.load %arg14[%c0_73, %c35] : memref<8x324xf32, #tpu.memory_space<vmem>>, vector<2x256xf32>
    %c0_74 = arith.constant 0 : index
    %c13 = arith.constant 13 : index
    %124 = vector.load %arg5[%c0_74, %c13] : memref<2x25xf32, #tpu.memory_space<vmem>>, vector<2x1xf32>
    %c3_75 = arith.constant 3 : index
    %c0_76 = arith.constant 0 : index
    %125 = vector.load %arg2[%c3_75, %c0_76] : memref<5x256xf32, #tpu.memory_space<vmem>>, vector<1x256xf32>
    %126 = vector.broadcast %124 : vector<2x1xf32> to vector<2x256xf32>
    %127 = arith.mulf %123, %126 : vector<2x256xf32>
    %128 = vector.broadcast %125 : vector<1x256xf32> to vector<2x256xf32>
    %129 = arith.mulf %127, %128 : vector<2x256xf32>
    %130 = arith.addf %122, %129 : vector<2x256xf32>
    %c0_77 = arith.constant 0 : index
    %c36 = arith.constant 36 : index
    %131 = vector.load %arg14[%c0_77, %c36] : memref<8x324xf32, #tpu.memory_space<vmem>>, vector<2x256xf32>
    %c0_78 = arith.constant 0 : index
    %c14 = arith.constant 14 : index
    %132 = vector.load %arg5[%c0_78, %c14] : memref<2x25xf32, #tpu.memory_space<vmem>>, vector<2x1xf32>
    %c4_79 = arith.constant 4 : index
    %c0_80 = arith.constant 0 : index
    %133 = vector.load %arg2[%c4_79, %c0_80] : memref<5x256xf32, #tpu.memory_space<vmem>>, vector<1x256xf32>
    %134 = vector.broadcast %132 : vector<2x1xf32> to vector<2x256xf32>
    %135 = arith.mulf %131, %134 : vector<2x256xf32>
    %136 = vector.broadcast %133 : vector<1x256xf32> to vector<2x256xf32>
    %137 = arith.mulf %135, %136 : vector<2x256xf32>
    %138 = arith.addf %130, %137 : vector<2x256xf32>
    %c0_81 = arith.constant 0 : index
    %c48 = arith.constant 48 : index
    %139 = vector.load %arg14[%c0_81, %c48] : memref<8x324xf32, #tpu.memory_space<vmem>>, vector<2x256xf32>
    %c0_82 = arith.constant 0 : index
    %c15 = arith.constant 15 : index
    %140 = vector.load %arg5[%c0_82, %c15] : memref<2x25xf32, #tpu.memory_space<vmem>>, vector<2x1xf32>
    %c0_83 = arith.constant 0 : index
    %c0_84 = arith.constant 0 : index
    %141 = vector.load %arg2[%c0_83, %c0_84] : memref<5x256xf32, #tpu.memory_space<vmem>>, vector<1x256xf32>
    %142 = vector.broadcast %140 : vector<2x1xf32> to vector<2x256xf32>
    %143 = arith.mulf %139, %142 : vector<2x256xf32>
    %144 = vector.broadcast %141 : vector<1x256xf32> to vector<2x256xf32>
    %145 = arith.mulf %143, %144 : vector<2x256xf32>
    %146 = arith.addf %138, %145 : vector<2x256xf32>
    %c0_85 = arith.constant 0 : index
    %c49 = arith.constant 49 : index
    %147 = vector.load %arg14[%c0_85, %c49] : memref<8x324xf32, #tpu.memory_space<vmem>>, vector<2x256xf32>
    %c0_86 = arith.constant 0 : index
    %c16_87 = arith.constant 16 : index
    %148 = vector.load %arg5[%c0_86, %c16_87] : memref<2x25xf32, #tpu.memory_space<vmem>>, vector<2x1xf32>
    %c1_88 = arith.constant 1 : index
    %c0_89 = arith.constant 0 : index
    %149 = vector.load %arg2[%c1_88, %c0_89] : memref<5x256xf32, #tpu.memory_space<vmem>>, vector<1x256xf32>
    %150 = vector.broadcast %148 : vector<2x1xf32> to vector<2x256xf32>
    %151 = arith.mulf %147, %150 : vector<2x256xf32>
    %152 = vector.broadcast %149 : vector<1x256xf32> to vector<2x256xf32>
    %153 = arith.mulf %151, %152 : vector<2x256xf32>
    %154 = arith.addf %146, %153 : vector<2x256xf32>
    %c0_90 = arith.constant 0 : index
    %c50 = arith.constant 50 : index
    %155 = vector.load %arg14[%c0_90, %c50] : memref<8x324xf32, #tpu.memory_space<vmem>>, vector<2x256xf32>
    %c0_91 = arith.constant 0 : index
    %c17_92 = arith.constant 17 : index
    %156 = vector.load %arg5[%c0_91, %c17_92] : memref<2x25xf32, #tpu.memory_space<vmem>>, vector<2x1xf32>
    %c2_93 = arith.constant 2 : index
    %c0_94 = arith.constant 0 : index
    %157 = vector.load %arg2[%c2_93, %c0_94] : memref<5x256xf32, #tpu.memory_space<vmem>>, vector<1x256xf32>
    %158 = vector.broadcast %156 : vector<2x1xf32> to vector<2x256xf32>
    %159 = arith.mulf %155, %158 : vector<2x256xf32>
    %160 = vector.broadcast %157 : vector<1x256xf32> to vector<2x256xf32>
    %161 = arith.mulf %159, %160 : vector<2x256xf32>
    %162 = arith.addf %154, %161 : vector<2x256xf32>
    %c0_95 = arith.constant 0 : index
    %c51 = arith.constant 51 : index
    %163 = vector.load %arg14[%c0_95, %c51] : memref<8x324xf32, #tpu.memory_space<vmem>>, vector<2x256xf32>
    %c0_96 = arith.constant 0 : index
    %c18_97 = arith.constant 18 : index
    %164 = vector.load %arg5[%c0_96, %c18_97] : memref<2x25xf32, #tpu.memory_space<vmem>>, vector<2x1xf32>
    %c3_98 = arith.constant 3 : index
    %c0_99 = arith.constant 0 : index
    %165 = vector.load %arg2[%c3_98, %c0_99] : memref<5x256xf32, #tpu.memory_space<vmem>>, vector<1x256xf32>
    %166 = vector.broadcast %164 : vector<2x1xf32> to vector<2x256xf32>
    %167 = arith.mulf %163, %166 : vector<2x256xf32>
    %168 = vector.broadcast %165 : vector<1x256xf32> to vector<2x256xf32>
    %169 = arith.mulf %167, %168 : vector<2x256xf32>
    %170 = arith.addf %162, %169 : vector<2x256xf32>
    %c0_100 = arith.constant 0 : index
    %c52 = arith.constant 52 : index
    %171 = vector.load %arg14[%c0_100, %c52] : memref<8x324xf32, #tpu.memory_space<vmem>>, vector<2x256xf32>
    %c0_101 = arith.constant 0 : index
    %c19_102 = arith.constant 19 : index
    %172 = vector.load %arg5[%c0_101, %c19_102] : memref<2x25xf32, #tpu.memory_space<vmem>>, vector<2x1xf32>
    %c4_103 = arith.constant 4 : index
    %c0_104 = arith.constant 0 : index
    %173 = vector.load %arg2[%c4_103, %c0_104] : memref<5x256xf32, #tpu.memory_space<vmem>>, vector<1x256xf32>
    %174 = vector.broadcast %172 : vector<2x1xf32> to vector<2x256xf32>
    %175 = arith.mulf %171, %174 : vector<2x256xf32>
    %176 = vector.broadcast %173 : vector<1x256xf32> to vector<2x256xf32>
    %177 = arith.mulf %175, %176 : vector<2x256xf32>
    %178 = arith.addf %170, %177 : vector<2x256xf32>
    %c0_105 = arith.constant 0 : index
    %c64 = arith.constant 64 : index
    %179 = vector.load %arg14[%c0_105, %c64] : memref<8x324xf32, #tpu.memory_space<vmem>>, vector<2x256xf32>
    %c0_106 = arith.constant 0 : index
    %c20_107 = arith.constant 20 : index
    %180 = vector.load %arg5[%c0_106, %c20_107] : memref<2x25xf32, #tpu.memory_space<vmem>>, vector<2x1xf32>
    %c0_108 = arith.constant 0 : index
    %c0_109 = arith.constant 0 : index
    %181 = vector.load %arg2[%c0_108, %c0_109] : memref<5x256xf32, #tpu.memory_space<vmem>>, vector<1x256xf32>
    %182 = vector.broadcast %180 : vector<2x1xf32> to vector<2x256xf32>
    %183 = arith.mulf %179, %182 : vector<2x256xf32>
    %184 = vector.broadcast %181 : vector<1x256xf32> to vector<2x256xf32>
    %185 = arith.mulf %183, %184 : vector<2x256xf32>
    %186 = arith.addf %178, %185 : vector<2x256xf32>
    %c0_110 = arith.constant 0 : index
    %c65 = arith.constant 65 : index
    %187 = vector.load %arg14[%c0_110, %c65] : memref<8x324xf32, #tpu.memory_space<vmem>>, vector<2x256xf32>
    %c0_111 = arith.constant 0 : index
    %c21 = arith.constant 21 : index
    %188 = vector.load %arg5[%c0_111, %c21] : memref<2x25xf32, #tpu.memory_space<vmem>>, vector<2x1xf32>
    %c1_112 = arith.constant 1 : index
    %c0_113 = arith.constant 0 : index
    %189 = vector.load %arg2[%c1_112, %c0_113] : memref<5x256xf32, #tpu.memory_space<vmem>>, vector<1x256xf32>
    %190 = vector.broadcast %188 : vector<2x1xf32> to vector<2x256xf32>
    %191 = arith.mulf %187, %190 : vector<2x256xf32>
    %192 = vector.broadcast %189 : vector<1x256xf32> to vector<2x256xf32>
    %193 = arith.mulf %191, %192 : vector<2x256xf32>
    %194 = arith.addf %186, %193 : vector<2x256xf32>
    %c0_114 = arith.constant 0 : index
    %c66 = arith.constant 66 : index
    %195 = vector.load %arg14[%c0_114, %c66] : memref<8x324xf32, #tpu.memory_space<vmem>>, vector<2x256xf32>
    %c0_115 = arith.constant 0 : index
    %c22 = arith.constant 22 : index
    %196 = vector.load %arg5[%c0_115, %c22] : memref<2x25xf32, #tpu.memory_space<vmem>>, vector<2x1xf32>
    %c2_116 = arith.constant 2 : index
    %c0_117 = arith.constant 0 : index
    %197 = vector.load %arg2[%c2_116, %c0_117] : memref<5x256xf32, #tpu.memory_space<vmem>>, vector<1x256xf32>
    %198 = vector.broadcast %196 : vector<2x1xf32> to vector<2x256xf32>
    %199 = arith.mulf %195, %198 : vector<2x256xf32>
    %200 = vector.broadcast %197 : vector<1x256xf32> to vector<2x256xf32>
    %201 = arith.mulf %199, %200 : vector<2x256xf32>
    %202 = arith.addf %194, %201 : vector<2x256xf32>
    %c0_118 = arith.constant 0 : index
    %c67 = arith.constant 67 : index
    %203 = vector.load %arg14[%c0_118, %c67] : memref<8x324xf32, #tpu.memory_space<vmem>>, vector<2x256xf32>
    %c0_119 = arith.constant 0 : index
    %c23 = arith.constant 23 : index
    %204 = vector.load %arg5[%c0_119, %c23] : memref<2x25xf32, #tpu.memory_space<vmem>>, vector<2x1xf32>
    %c3_120 = arith.constant 3 : index
    %c0_121 = arith.constant 0 : index
    %205 = vector.load %arg2[%c3_120, %c0_121] : memref<5x256xf32, #tpu.memory_space<vmem>>, vector<1x256xf32>
    %206 = vector.broadcast %204 : vector<2x1xf32> to vector<2x256xf32>
    %207 = arith.mulf %203, %206 : vector<2x256xf32>
    %208 = vector.broadcast %205 : vector<1x256xf32> to vector<2x256xf32>
    %209 = arith.mulf %207, %208 : vector<2x256xf32>
    %210 = arith.addf %202, %209 : vector<2x256xf32>
    %c0_122 = arith.constant 0 : index
    %c68 = arith.constant 68 : index
    %211 = vector.load %arg14[%c0_122, %c68] : memref<8x324xf32, #tpu.memory_space<vmem>>, vector<2x256xf32>
    %c0_123 = arith.constant 0 : index
    %c24 = arith.constant 24 : index
    %212 = vector.load %arg5[%c0_123, %c24] : memref<2x25xf32, #tpu.memory_space<vmem>>, vector<2x1xf32>
    %c4_124 = arith.constant 4 : index
    %c0_125 = arith.constant 0 : index
    %213 = vector.load %arg2[%c4_124, %c0_125] : memref<5x256xf32, #tpu.memory_space<vmem>>, vector<1x256xf32>
    %214 = vector.broadcast %212 : vector<2x1xf32> to vector<2x256xf32>
    %215 = arith.mulf %211, %214 : vector<2x256xf32>
    %216 = vector.broadcast %213 : vector<1x256xf32> to vector<2x256xf32>
    %217 = arith.mulf %215, %216 : vector<2x256xf32>
    %218 = arith.addf %210, %217 : vector<2x256xf32>
    %c0_126 = arith.constant 0 : index
    %c0_127 = arith.constant 0 : index
    %219 = vector.load %arg6[%c0_126, %c0_127] : memref<2x1xf32, #tpu.memory_space<vmem>>, vector<2x1xf32>
    %220 = vector.broadcast %219 : vector<2x1xf32> to vector<2x256xf32>
    %221 = arith.addf %218, %220 : vector<2x256xf32>
    %cst_128 = arith.constant 0.000000e+00 : f32
    %222 = vector.broadcast %cst_128 : f32 to vector<2x256xf32>
    %223 = arith.subf %222, %221 : vector<2x256xf32>
    %224 = math.exp %223 : vector<2x256xf32>
    %cst_129 = arith.constant 1.000000e+00 : f32
    %225 = vector.broadcast %cst_129 : f32 to vector<2x256xf32>
    %226 = arith.addf %225, %224 : vector<2x256xf32>
    %cst_130 = arith.constant 1.000000e+00 : f32
    %227 = vector.broadcast %cst_130 : f32 to vector<2x256xf32>
    %228 = arith.divf %227, %226 : vector<2x256xf32>
    %229 = arith.mulf %221, %228 : vector<2x256xf32>
    %c0_131 = arith.constant 0 : index
    %c0_132 = arith.constant 0 : index
    %230 = vector.load %arg7[%c0_131, %c0_132] : memref<4x4xf32, #tpu.memory_space<vmem>>, vector<4x4xf32>
    %231 = vector.extract_strided_slice %230 {offsets = [0, 0], sizes = [4, 2], strides = [1, 1]} : vector<4x4xf32> to vector<4x2xf32>
    %cst_133 = arith.constant dense<0.000000e+00> : vector<4x256xf32>
    %232 = tpu.matmul %231, %14, %cst_133 {dimension_numbers = #tpu.dot_dimension_numbers<[1], [0], [0], [1], [0, 0, 1, 1], [], []>} : vector<4x2xf32>, vector<2x256xf32>, vector<4x256xf32> -> vector<4x256xf32>
    %233 = vector.extract_strided_slice %230 {offsets = [0, 2], sizes = [4, 2], strides = [1, 1]} : vector<4x4xf32> to vector<4x2xf32>
    %cst_134 = arith.constant dense<0.000000e+00> : vector<4x256xf32>
    %234 = tpu.matmul %233, %229, %cst_134 {dimension_numbers = #tpu.dot_dimension_numbers<[1], [0], [0], [1], [0, 0, 1, 1], [], []>} : vector<4x2xf32>, vector<2x256xf32>, vector<4x256xf32> -> vector<4x256xf32>
    %235 = arith.addf %232, %234 : vector<4x256xf32>
    %c0_135 = arith.constant 0 : index
    %c0_136 = arith.constant 0 : index
    %236 = vector.load %arg8[%c0_135, %c0_136] : memref<4x1xf32, #tpu.memory_space<vmem>>, vector<4x1xf32>
    %237 = vector.broadcast %236 : vector<4x1xf32> to vector<4x256xf32>
    %238 = arith.addf %235, %237 : vector<4x256xf32>
    %cst_137 = arith.constant 0.000000e+00 : f32
    %239 = vector.broadcast %cst_137 : f32 to vector<8x324xf32>
    %c0_138 = arith.constant 0 : index
    %c0_139 = arith.constant 0 : index
    %240 = vector.load %arg14[%c0_138, %c0_139] : memref<8x324xf32, #tpu.memory_space<vmem>>, vector<8x324xf32>
    tpu.vector_store %arg14[%c0_138, %c0_139], %239 {strides = array<i32>} : memref<8x324xf32, #tpu.memory_space<vmem>>, vector<8x324xf32>,
    %c0_140 = arith.constant 0 : index
    %c34_141 = arith.constant 34 : index
    %241 = vector.load %arg14[%c0_140, %c34_141] : memref<8x324xf32, #tpu.memory_space<vmem>>, vector<4x256xf32>
    tpu.vector_store %arg14[%c0_140, %c34_141], %238 {strides = array<i32>} : memref<8x324xf32, #tpu.memory_space<vmem>>, vector<4x256xf32>,
    %cst_142 = arith.constant 0.000000e+00 : f32
    %242 = vector.broadcast %cst_142 : f32 to vector<4x256xf32>
    %c0_143 = arith.constant 0 : index
    %c0_144 = arith.constant 0 : index
    %243 = vector.load %arg14[%c0_143, %c0_144] : memref<8x324xf32, #tpu.memory_space<vmem>>, vector<4x256xf32>
    %c0_145 = arith.constant 0 : index
    %c0_146 = arith.constant 0 : index
    %244 = vector.load %arg9[%c0_145, %c0_146] : memref<4x25xf32, #tpu.memory_space<vmem>>, vector<4x1xf32>
    %c0_147 = arith.constant 0 : index
    %c0_148 = arith.constant 0 : index
    %245 = vector.load %arg2[%c0_147, %c0_148] : memref<5x256xf32, #tpu.memory_space<vmem>>, vector<1x256xf32>
    %246 = vector.broadcast %244 : vector<4x1xf32> to vector<4x256xf32>
    %247 = arith.mulf %243, %246 : vector<4x256xf32>
    %248 = vector.broadcast %245 : vector<1x256xf32> to vector<4x256xf32>
    %249 = arith.mulf %247, %248 : vector<4x256xf32>
    %250 = arith.addf %242, %249 : vector<4x256xf32>
    %c0_149 = arith.constant 0 : index
    %c1_150 = arith.constant 1 : index
    %251 = vector.load %arg14[%c0_149, %c1_150] : memref<8x324xf32, #tpu.memory_space<vmem>>, vector<4x256xf32>
    %c0_151 = arith.constant 0 : index
    %c1_152 = arith.constant 1 : index
    %252 = vector.load %arg9[%c0_151, %c1_152] : memref<4x25xf32, #tpu.memory_space<vmem>>, vector<4x1xf32>
    %c1_153 = arith.constant 1 : index
    %c0_154 = arith.constant 0 : index
    %253 = vector.load %arg2[%c1_153, %c0_154] : memref<5x256xf32, #tpu.memory_space<vmem>>, vector<1x256xf32>
    %254 = vector.broadcast %252 : vector<4x1xf32> to vector<4x256xf32>
    %255 = arith.mulf %251, %254 : vector<4x256xf32>
    %256 = vector.broadcast %253 : vector<1x256xf32> to vector<4x256xf32>
    %257 = arith.mulf %255, %256 : vector<4x256xf32>
    %258 = arith.addf %250, %257 : vector<4x256xf32>
    %c0_155 = arith.constant 0 : index
    %c2_156 = arith.constant 2 : index
    %259 = vector.load %arg14[%c0_155, %c2_156] : memref<8x324xf32, #tpu.memory_space<vmem>>, vector<4x256xf32>
    %c0_157 = arith.constant 0 : index
    %c2_158 = arith.constant 2 : index
    %260 = vector.load %arg9[%c0_157, %c2_158] : memref<4x25xf32, #tpu.memory_space<vmem>>, vector<4x1xf32>
    %c2_159 = arith.constant 2 : index
    %c0_160 = arith.constant 0 : index
    %261 = vector.load %arg2[%c2_159, %c0_160] : memref<5x256xf32, #tpu.memory_space<vmem>>, vector<1x256xf32>
    %262 = vector.broadcast %260 : vector<4x1xf32> to vector<4x256xf32>
    %263 = arith.mulf %259, %262 : vector<4x256xf32>
    %264 = vector.broadcast %261 : vector<1x256xf32> to vector<4x256xf32>
    %265 = arith.mulf %263, %264 : vector<4x256xf32>
    %266 = arith.addf %258, %265 : vector<4x256xf32>
    %c0_161 = arith.constant 0 : index
    %c3_162 = arith.constant 3 : index
    %267 = vector.load %arg14[%c0_161, %c3_162] : memref<8x324xf32, #tpu.memory_space<vmem>>, vector<4x256xf32>
    %c0_163 = arith.constant 0 : index
    %c3_164 = arith.constant 3 : index
    %268 = vector.load %arg9[%c0_163, %c3_164] : memref<4x25xf32, #tpu.memory_space<vmem>>, vector<4x1xf32>
    %c3_165 = arith.constant 3 : index
    %c0_166 = arith.constant 0 : index
    %269 = vector.load %arg2[%c3_165, %c0_166] : memref<5x256xf32, #tpu.memory_space<vmem>>, vector<1x256xf32>
    %270 = vector.broadcast %268 : vector<4x1xf32> to vector<4x256xf32>
    %271 = arith.mulf %267, %270 : vector<4x256xf32>
    %272 = vector.broadcast %269 : vector<1x256xf32> to vector<4x256xf32>
    %273 = arith.mulf %271, %272 : vector<4x256xf32>
    %274 = arith.addf %266, %273 : vector<4x256xf32>
    %c0_167 = arith.constant 0 : index
    %c4_168 = arith.constant 4 : index
    %275 = vector.load %arg14[%c0_167, %c4_168] : memref<8x324xf32, #tpu.memory_space<vmem>>, vector<4x256xf32>
    %c0_169 = arith.constant 0 : index
    %c4_170 = arith.constant 4 : index
    %276 = vector.load %arg9[%c0_169, %c4_170] : memref<4x25xf32, #tpu.memory_space<vmem>>, vector<4x1xf32>
    %c4_171 = arith.constant 4 : index
    %c0_172 = arith.constant 0 : index
    %277 = vector.load %arg2[%c4_171, %c0_172] : memref<5x256xf32, #tpu.memory_space<vmem>>, vector<1x256xf32>
    %278 = vector.broadcast %276 : vector<4x1xf32> to vector<4x256xf32>
    %279 = arith.mulf %275, %278 : vector<4x256xf32>
    %280 = vector.broadcast %277 : vector<1x256xf32> to vector<4x256xf32>
    %281 = arith.mulf %279, %280 : vector<4x256xf32>
    %282 = arith.addf %274, %281 : vector<4x256xf32>
    %c0_173 = arith.constant 0 : index
    %c16_174 = arith.constant 16 : index
    %283 = vector.load %arg14[%c0_173, %c16_174] : memref<8x324xf32, #tpu.memory_space<vmem>>, vector<4x256xf32>
    %c0_175 = arith.constant 0 : index
    %c5_176 = arith.constant 5 : index
    %284 = vector.load %arg9[%c0_175, %c5_176] : memref<4x25xf32, #tpu.memory_space<vmem>>, vector<4x1xf32>
    %c0_177 = arith.constant 0 : index
    %c0_178 = arith.constant 0 : index
    %285 = vector.load %arg2[%c0_177, %c0_178] : memref<5x256xf32, #tpu.memory_space<vmem>>, vector<1x256xf32>
    %286 = vector.broadcast %284 : vector<4x1xf32> to vector<4x256xf32>
    %287 = arith.mulf %283, %286 : vector<4x256xf32>
    %288 = vector.broadcast %285 : vector<1x256xf32> to vector<4x256xf32>
    %289 = arith.mulf %287, %288 : vector<4x256xf32>
    %290 = arith.addf %282, %289 : vector<4x256xf32>
    %c0_179 = arith.constant 0 : index
    %c17_180 = arith.constant 17 : index
    %291 = vector.load %arg14[%c0_179, %c17_180] : memref<8x324xf32, #tpu.memory_space<vmem>>, vector<4x256xf32>
    %c0_181 = arith.constant 0 : index
    %c6_182 = arith.constant 6 : index
    %292 = vector.load %arg9[%c0_181, %c6_182] : memref<4x25xf32, #tpu.memory_space<vmem>>, vector<4x1xf32>
    %c1_183 = arith.constant 1 : index
    %c0_184 = arith.constant 0 : index
    %293 = vector.load %arg2[%c1_183, %c0_184] : memref<5x256xf32, #tpu.memory_space<vmem>>, vector<1x256xf32>
    %294 = vector.broadcast %292 : vector<4x1xf32> to vector<4x256xf32>
    %295 = arith.mulf %291, %294 : vector<4x256xf32>
    %296 = vector.broadcast %293 : vector<1x256xf32> to vector<4x256xf32>
    %297 = arith.mulf %295, %296 : vector<4x256xf32>
    %298 = arith.addf %290, %297 : vector<4x256xf32>
    %c0_185 = arith.constant 0 : index
    %c18_186 = arith.constant 18 : index
    %299 = vector.load %arg14[%c0_185, %c18_186] : memref<8x324xf32, #tpu.memory_space<vmem>>, vector<4x256xf32>
    %c0_187 = arith.constant 0 : index
    %c7_188 = arith.constant 7 : index
    %300 = vector.load %arg9[%c0_187, %c7_188] : memref<4x25xf32, #tpu.memory_space<vmem>>, vector<4x1xf32>
    %c2_189 = arith.constant 2 : index
    %c0_190 = arith.constant 0 : index
    %301 = vector.load %arg2[%c2_189, %c0_190] : memref<5x256xf32, #tpu.memory_space<vmem>>, vector<1x256xf32>
    %302 = vector.broadcast %300 : vector<4x1xf32> to vector<4x256xf32>
    %303 = arith.mulf %299, %302 : vector<4x256xf32>
    %304 = vector.broadcast %301 : vector<1x256xf32> to vector<4x256xf32>
    %305 = arith.mulf %303, %304 : vector<4x256xf32>
    %306 = arith.addf %298, %305 : vector<4x256xf32>
    %c0_191 = arith.constant 0 : index
    %c19_192 = arith.constant 19 : index
    %307 = vector.load %arg14[%c0_191, %c19_192] : memref<8x324xf32, #tpu.memory_space<vmem>>, vector<4x256xf32>
    %c0_193 = arith.constant 0 : index
    %c8_194 = arith.constant 8 : index
    %308 = vector.load %arg9[%c0_193, %c8_194] : memref<4x25xf32, #tpu.memory_space<vmem>>, vector<4x1xf32>
    %c3_195 = arith.constant 3 : index
    %c0_196 = arith.constant 0 : index
    %309 = vector.load %arg2[%c3_195, %c0_196] : memref<5x256xf32, #tpu.memory_space<vmem>>, vector<1x256xf32>
    %310 = vector.broadcast %308 : vector<4x1xf32> to vector<4x256xf32>
    %311 = arith.mulf %307, %310 : vector<4x256xf32>
    %312 = vector.broadcast %309 : vector<1x256xf32> to vector<4x256xf32>
    %313 = arith.mulf %311, %312 : vector<4x256xf32>
    %314 = arith.addf %306, %313 : vector<4x256xf32>
    %c0_197 = arith.constant 0 : index
    %c20_198 = arith.constant 20 : index
    %315 = vector.load %arg14[%c0_197, %c20_198] : memref<8x324xf32, #tpu.memory_space<vmem>>, vector<4x256xf32>
    %c0_199 = arith.constant 0 : index
    %c9_200 = arith.constant 9 : index
    %316 = vector.load %arg9[%c0_199, %c9_200] : memref<4x25xf32, #tpu.memory_space<vmem>>, vector<4x1xf32>
    %c4_201 = arith.constant 4 : index
    %c0_202 = arith.constant 0 : index
    %317 = vector.load %arg2[%c4_201, %c0_202] : memref<5x256xf32, #tpu.memory_space<vmem>>, vector<1x256xf32>
    %318 = vector.broadcast %316 : vector<4x1xf32> to vector<4x256xf32>
    %319 = arith.mulf %315, %318 : vector<4x256xf32>
    %320 = vector.broadcast %317 : vector<1x256xf32> to vector<4x256xf32>
    %321 = arith.mulf %319, %320 : vector<4x256xf32>
    %322 = arith.addf %314, %321 : vector<4x256xf32>
    %c0_203 = arith.constant 0 : index
    %c32_204 = arith.constant 32 : index
    %323 = vector.load %arg14[%c0_203, %c32_204] : memref<8x324xf32, #tpu.memory_space<vmem>>, vector<4x256xf32>
    %c0_205 = arith.constant 0 : index
    %c10_206 = arith.constant 10 : index
    %324 = vector.load %arg9[%c0_205, %c10_206] : memref<4x25xf32, #tpu.memory_space<vmem>>, vector<4x1xf32>
    %c0_207 = arith.constant 0 : index
    %c0_208 = arith.constant 0 : index
    %325 = vector.load %arg2[%c0_207, %c0_208] : memref<5x256xf32, #tpu.memory_space<vmem>>, vector<1x256xf32>
    %326 = vector.broadcast %324 : vector<4x1xf32> to vector<4x256xf32>
    %327 = arith.mulf %323, %326 : vector<4x256xf32>
    %328 = vector.broadcast %325 : vector<1x256xf32> to vector<4x256xf32>
    %329 = arith.mulf %327, %328 : vector<4x256xf32>
    %330 = arith.addf %322, %329 : vector<4x256xf32>
    %c0_209 = arith.constant 0 : index
    %c33_210 = arith.constant 33 : index
    %331 = vector.load %arg14[%c0_209, %c33_210] : memref<8x324xf32, #tpu.memory_space<vmem>>, vector<4x256xf32>
    %c0_211 = arith.constant 0 : index
    %c11_212 = arith.constant 11 : index
    %332 = vector.load %arg9[%c0_211, %c11_212] : memref<4x25xf32, #tpu.memory_space<vmem>>, vector<4x1xf32>
    %c1_213 = arith.constant 1 : index
    %c0_214 = arith.constant 0 : index
    %333 = vector.load %arg2[%c1_213, %c0_214] : memref<5x256xf32, #tpu.memory_space<vmem>>, vector<1x256xf32>
    %334 = vector.broadcast %332 : vector<4x1xf32> to vector<4x256xf32>
    %335 = arith.mulf %331, %334 : vector<4x256xf32>
    %336 = vector.broadcast %333 : vector<1x256xf32> to vector<4x256xf32>
    %337 = arith.mulf %335, %336 : vector<4x256xf32>
    %338 = arith.addf %330, %337 : vector<4x256xf32>
    %c0_215 = arith.constant 0 : index
    %c34_216 = arith.constant 34 : index
    %339 = vector.load %arg14[%c0_215, %c34_216] : memref<8x324xf32, #tpu.memory_space<vmem>>, vector<4x256xf32>
    %c0_217 = arith.constant 0 : index
    %c12_218 = arith.constant 12 : index
    %340 = vector.load %arg9[%c0_217, %c12_218] : memref<4x25xf32, #tpu.memory_space<vmem>>, vector<4x1xf32>
    %c2_219 = arith.constant 2 : index
    %c0_220 = arith.constant 0 : index
    %341 = vector.load %arg2[%c2_219, %c0_220] : memref<5x256xf32, #tpu.memory_space<vmem>>, vector<1x256xf32>
    %342 = vector.broadcast %340 : vector<4x1xf32> to vector<4x256xf32>
    %343 = arith.mulf %339, %342 : vector<4x256xf32>
    %344 = vector.broadcast %341 : vector<1x256xf32> to vector<4x256xf32>
    %345 = arith.mulf %343, %344 : vector<4x256xf32>
    %346 = arith.addf %338, %345 : vector<4x256xf32>
    %c0_221 = arith.constant 0 : index
    %c35_222 = arith.constant 35 : index
    %347 = vector.load %arg14[%c0_221, %c35_222] : memref<8x324xf32, #tpu.memory_space<vmem>>, vector<4x256xf32>
    %c0_223 = arith.constant 0 : index
    %c13_224 = arith.constant 13 : index
    %348 = vector.load %arg9[%c0_223, %c13_224] : memref<4x25xf32, #tpu.memory_space<vmem>>, vector<4x1xf32>
    %c3_225 = arith.constant 3 : index
    %c0_226 = arith.constant 0 : index
    %349 = vector.load %arg2[%c3_225, %c0_226] : memref<5x256xf32, #tpu.memory_space<vmem>>, vector<1x256xf32>
    %350 = vector.broadcast %348 : vector<4x1xf32> to vector<4x256xf32>
    %351 = arith.mulf %347, %350 : vector<4x256xf32>
    %352 = vector.broadcast %349 : vector<1x256xf32> to vector<4x256xf32>
    %353 = arith.mulf %351, %352 : vector<4x256xf32>
    %354 = arith.addf %346, %353 : vector<4x256xf32>
    %c0_227 = arith.constant 0 : index
    %c36_228 = arith.constant 36 : index
    %355 = vector.load %arg14[%c0_227, %c36_228] : memref<8x324xf32, #tpu.memory_space<vmem>>, vector<4x256xf32>
    %c0_229 = arith.constant 0 : index
    %c14_230 = arith.constant 14 : index
    %356 = vector.load %arg9[%c0_229, %c14_230] : memref<4x25xf32, #tpu.memory_space<vmem>>, vector<4x1xf32>
    %c4_231 = arith.constant 4 : index
    %c0_232 = arith.constant 0 : index
    %357 = vector.load %arg2[%c4_231, %c0_232] : memref<5x256xf32, #tpu.memory_space<vmem>>, vector<1x256xf32>
    %358 = vector.broadcast %356 : vector<4x1xf32> to vector<4x256xf32>
    %359 = arith.mulf %355, %358 : vector<4x256xf32>
    %360 = vector.broadcast %357 : vector<1x256xf32> to vector<4x256xf32>
    %361 = arith.mulf %359, %360 : vector<4x256xf32>
    %362 = arith.addf %354, %361 : vector<4x256xf32>
    %c0_233 = arith.constant 0 : index
    %c48_234 = arith.constant 48 : index
    %363 = vector.load %arg14[%c0_233, %c48_234] : memref<8x324xf32, #tpu.memory_space<vmem>>, vector<4x256xf32>
    %c0_235 = arith.constant 0 : index
    %c15_236 = arith.constant 15 : index
    %364 = vector.load %arg9[%c0_235, %c15_236] : memref<4x25xf32, #tpu.memory_space<vmem>>, vector<4x1xf32>
    %c0_237 = arith.constant 0 : index
    %c0_238 = arith.constant 0 : index
    %365 = vector.load %arg2[%c0_237, %c0_238] : memref<5x256xf32, #tpu.memory_space<vmem>>, vector<1x256xf32>
    %366 = vector.broadcast %364 : vector<4x1xf32> to vector<4x256xf32>
    %367 = arith.mulf %363, %366 : vector<4x256xf32>
    %368 = vector.broadcast %365 : vector<1x256xf32> to vector<4x256xf32>
    %369 = arith.mulf %367, %368 : vector<4x256xf32>
    %370 = arith.addf %362, %369 : vector<4x256xf32>
    %c0_239 = arith.constant 0 : index
    %c49_240 = arith.constant 49 : index
    %371 = vector.load %arg14[%c0_239, %c49_240] : memref<8x324xf32, #tpu.memory_space<vmem>>, vector<4x256xf32>
    %c0_241 = arith.constant 0 : index
    %c16_242 = arith.constant 16 : index
    %372 = vector.load %arg9[%c0_241, %c16_242] : memref<4x25xf32, #tpu.memory_space<vmem>>, vector<4x1xf32>
    %c1_243 = arith.constant 1 : index
    %c0_244 = arith.constant 0 : index
    %373 = vector.load %arg2[%c1_243, %c0_244] : memref<5x256xf32, #tpu.memory_space<vmem>>, vector<1x256xf32>
    %374 = vector.broadcast %372 : vector<4x1xf32> to vector<4x256xf32>
    %375 = arith.mulf %371, %374 : vector<4x256xf32>
    %376 = vector.broadcast %373 : vector<1x256xf32> to vector<4x256xf32>
    %377 = arith.mulf %375, %376 : vector<4x256xf32>
    %378 = arith.addf %370, %377 : vector<4x256xf32>
    %c0_245 = arith.constant 0 : index
    %c50_246 = arith.constant 50 : index
    %379 = vector.load %arg14[%c0_245, %c50_246] : memref<8x324xf32, #tpu.memory_space<vmem>>, vector<4x256xf32>
    %c0_247 = arith.constant 0 : index
    %c17_248 = arith.constant 17 : index
    %380 = vector.load %arg9[%c0_247, %c17_248] : memref<4x25xf32, #tpu.memory_space<vmem>>, vector<4x1xf32>
    %c2_249 = arith.constant 2 : index
    %c0_250 = arith.constant 0 : index
    %381 = vector.load %arg2[%c2_249, %c0_250] : memref<5x256xf32, #tpu.memory_space<vmem>>, vector<1x256xf32>
    %382 = vector.broadcast %380 : vector<4x1xf32> to vector<4x256xf32>
    %383 = arith.mulf %379, %382 : vector<4x256xf32>
    %384 = vector.broadcast %381 : vector<1x256xf32> to vector<4x256xf32>
    %385 = arith.mulf %383, %384 : vector<4x256xf32>
    %386 = arith.addf %378, %385 : vector<4x256xf32>
    %c0_251 = arith.constant 0 : index
    %c51_252 = arith.constant 51 : index
    %387 = vector.load %arg14[%c0_251, %c51_252] : memref<8x324xf32, #tpu.memory_space<vmem>>, vector<4x256xf32>
    %c0_253 = arith.constant 0 : index
    %c18_254 = arith.constant 18 : index
    %388 = vector.load %arg9[%c0_253, %c18_254] : memref<4x25xf32, #tpu.memory_space<vmem>>, vector<4x1xf32>
    %c3_255 = arith.constant 3 : index
    %c0_256 = arith.constant 0 : index
    %389 = vector.load %arg2[%c3_255, %c0_256] : memref<5x256xf32, #tpu.memory_space<vmem>>, vector<1x256xf32>
    %390 = vector.broadcast %388 : vector<4x1xf32> to vector<4x256xf32>
    %391 = arith.mulf %387, %390 : vector<4x256xf32>
    %392 = vector.broadcast %389 : vector<1x256xf32> to vector<4x256xf32>
    %393 = arith.mulf %391, %392 : vector<4x256xf32>
    %394 = arith.addf %386, %393 : vector<4x256xf32>
    %c0_257 = arith.constant 0 : index
    %c52_258 = arith.constant 52 : index
    %395 = vector.load %arg14[%c0_257, %c52_258] : memref<8x324xf32, #tpu.memory_space<vmem>>, vector<4x256xf32>
    %c0_259 = arith.constant 0 : index
    %c19_260 = arith.constant 19 : index
    %396 = vector.load %arg9[%c0_259, %c19_260] : memref<4x25xf32, #tpu.memory_space<vmem>>, vector<4x1xf32>
    %c4_261 = arith.constant 4 : index
    %c0_262 = arith.constant 0 : index
    %397 = vector.load %arg2[%c4_261, %c0_262] : memref<5x256xf32, #tpu.memory_space<vmem>>, vector<1x256xf32>
    %398 = vector.broadcast %396 : vector<4x1xf32> to vector<4x256xf32>
    %399 = arith.mulf %395, %398 : vector<4x256xf32>
    %400 = vector.broadcast %397 : vector<1x256xf32> to vector<4x256xf32>
    %401 = arith.mulf %399, %400 : vector<4x256xf32>
    %402 = arith.addf %394, %401 : vector<4x256xf32>
    %c0_263 = arith.constant 0 : index
    %c64_264 = arith.constant 64 : index
    %403 = vector.load %arg14[%c0_263, %c64_264] : memref<8x324xf32, #tpu.memory_space<vmem>>, vector<4x256xf32>
    %c0_265 = arith.constant 0 : index
    %c20_266 = arith.constant 20 : index
    %404 = vector.load %arg9[%c0_265, %c20_266] : memref<4x25xf32, #tpu.memory_space<vmem>>, vector<4x1xf32>
    %c0_267 = arith.constant 0 : index
    %c0_268 = arith.constant 0 : index
    %405 = vector.load %arg2[%c0_267, %c0_268] : memref<5x256xf32, #tpu.memory_space<vmem>>, vector<1x256xf32>
    %406 = vector.broadcast %404 : vector<4x1xf32> to vector<4x256xf32>
    %407 = arith.mulf %403, %406 : vector<4x256xf32>
    %408 = vector.broadcast %405 : vector<1x256xf32> to vector<4x256xf32>
    %409 = arith.mulf %407, %408 : vector<4x256xf32>
    %410 = arith.addf %402, %409 : vector<4x256xf32>
    %c0_269 = arith.constant 0 : index
    %c65_270 = arith.constant 65 : index
    %411 = vector.load %arg14[%c0_269, %c65_270] : memref<8x324xf32, #tpu.memory_space<vmem>>, vector<4x256xf32>
    %c0_271 = arith.constant 0 : index
    %c21_272 = arith.constant 21 : index
    %412 = vector.load %arg9[%c0_271, %c21_272] : memref<4x25xf32, #tpu.memory_space<vmem>>, vector<4x1xf32>
    %c1_273 = arith.constant 1 : index
    %c0_274 = arith.constant 0 : index
    %413 = vector.load %arg2[%c1_273, %c0_274] : memref<5x256xf32, #tpu.memory_space<vmem>>, vector<1x256xf32>
    %414 = vector.broadcast %412 : vector<4x1xf32> to vector<4x256xf32>
    %415 = arith.mulf %411, %414 : vector<4x256xf32>
    %416 = vector.broadcast %413 : vector<1x256xf32> to vector<4x256xf32>
    %417 = arith.mulf %415, %416 : vector<4x256xf32>
    %418 = arith.addf %410, %417 : vector<4x256xf32>
    %c0_275 = arith.constant 0 : index
    %c66_276 = arith.constant 66 : index
    %419 = vector.load %arg14[%c0_275, %c66_276] : memref<8x324xf32, #tpu.memory_space<vmem>>, vector<4x256xf32>
    %c0_277 = arith.constant 0 : index
    %c22_278 = arith.constant 22 : index
    %420 = vector.load %arg9[%c0_277, %c22_278] : memref<4x25xf32, #tpu.memory_space<vmem>>, vector<4x1xf32>
    %c2_279 = arith.constant 2 : index
    %c0_280 = arith.constant 0 : index
    %421 = vector.load %arg2[%c2_279, %c0_280] : memref<5x256xf32, #tpu.memory_space<vmem>>, vector<1x256xf32>
    %422 = vector.broadcast %420 : vector<4x1xf32> to vector<4x256xf32>
    %423 = arith.mulf %419, %422 : vector<4x256xf32>
    %424 = vector.broadcast %421 : vector<1x256xf32> to vector<4x256xf32>
    %425 = arith.mulf %423, %424 : vector<4x256xf32>
    %426 = arith.addf %418, %425 : vector<4x256xf32>
    %c0_281 = arith.constant 0 : index
    %c67_282 = arith.constant 67 : index
    %427 = vector.load %arg14[%c0_281, %c67_282] : memref<8x324xf32, #tpu.memory_space<vmem>>, vector<4x256xf32>
    %c0_283 = arith.constant 0 : index
    %c23_284 = arith.constant 23 : index
    %428 = vector.load %arg9[%c0_283, %c23_284] : memref<4x25xf32, #tpu.memory_space<vmem>>, vector<4x1xf32>
    %c3_285 = arith.constant 3 : index
    %c0_286 = arith.constant 0 : index
    %429 = vector.load %arg2[%c3_285, %c0_286] : memref<5x256xf32, #tpu.memory_space<vmem>>, vector<1x256xf32>
    %430 = vector.broadcast %428 : vector<4x1xf32> to vector<4x256xf32>
    %431 = arith.mulf %427, %430 : vector<4x256xf32>
    %432 = vector.broadcast %429 : vector<1x256xf32> to vector<4x256xf32>
    %433 = arith.mulf %431, %432 : vector<4x256xf32>
    %434 = arith.addf %426, %433 : vector<4x256xf32>
    %c0_287 = arith.constant 0 : index
    %c68_288 = arith.constant 68 : index
    %435 = vector.load %arg14[%c0_287, %c68_288] : memref<8x324xf32, #tpu.memory_space<vmem>>, vector<4x256xf32>
    %c0_289 = arith.constant 0 : index
    %c24_290 = arith.constant 24 : index
    %436 = vector.load %arg9[%c0_289, %c24_290] : memref<4x25xf32, #tpu.memory_space<vmem>>, vector<4x1xf32>
    %c4_291 = arith.constant 4 : index
    %c0_292 = arith.constant 0 : index
    %437 = vector.load %arg2[%c4_291, %c0_292] : memref<5x256xf32, #tpu.memory_space<vmem>>, vector<1x256xf32>
    %438 = vector.broadcast %436 : vector<4x1xf32> to vector<4x256xf32>
    %439 = arith.mulf %435, %438 : vector<4x256xf32>
    %440 = vector.broadcast %437 : vector<1x256xf32> to vector<4x256xf32>
    %441 = arith.mulf %439, %440 : vector<4x256xf32>
    %442 = arith.addf %434, %441 : vector<4x256xf32>
    %c0_293 = arith.constant 0 : index
    %c0_294 = arith.constant 0 : index
    %443 = vector.load %arg10[%c0_293, %c0_294] : memref<4x1xf32, #tpu.memory_space<vmem>>, vector<4x1xf32>
    %444 = vector.broadcast %443 : vector<4x1xf32> to vector<4x256xf32>
    %445 = arith.addf %442, %444 : vector<4x256xf32>
    %cst_295 = arith.constant 0.000000e+00 : f32
    %446 = vector.broadcast %cst_295 : f32 to vector<8x324xf32>
    %c0_296 = arith.constant 0 : index
    %c0_297 = arith.constant 0 : index
    %447 = vector.load %arg14[%c0_296, %c0_297] : memref<8x324xf32, #tpu.memory_space<vmem>>, vector<8x324xf32>
    tpu.vector_store %arg14[%c0_296, %c0_297], %446 {strides = array<i32>} : memref<8x324xf32, #tpu.memory_space<vmem>>, vector<8x324xf32>,
    %c0_298 = arith.constant 0 : index
    %c17_299 = arith.constant 17 : index
    %448 = vector.load %arg14[%c0_298, %c17_299] : memref<8x324xf32, #tpu.memory_space<vmem>>, vector<8x256xf32>
    tpu.vector_store %arg14[%c0_298, %c17_299], %1 {strides = array<i32>} : memref<8x324xf32, #tpu.memory_space<vmem>>, vector<8x256xf32>,
    %cst_300 = arith.constant 0.000000e+00 : f32
    %449 = vector.broadcast %cst_300 : f32 to vector<8x256xf32>
    %c0_301 = arith.constant 0 : index
    %c0_302 = arith.constant 0 : index
    %450 = vector.load %arg14[%c0_301, %c0_302] : memref<8x324xf32, #tpu.memory_space<vmem>>, vector<8x256xf32>
    %c0_303 = arith.constant 0 : index
    %c0_304 = arith.constant 0 : index
    %451 = vector.load %arg11[%c0_303, %c0_304] : memref<8x9xf32, #tpu.memory_space<vmem>>, vector<8x1xf32>
    %c1_305 = arith.constant 1 : index
    %c0_306 = arith.constant 0 : index
    %452 = vector.load %arg2[%c1_305, %c0_306] : memref<5x256xf32, #tpu.memory_space<vmem>>, vector<1x256xf32>
    %453 = vector.broadcast %451 : vector<8x1xf32> to vector<8x256xf32>
    %454 = arith.mulf %450, %453 : vector<8x256xf32>
    %455 = vector.broadcast %452 : vector<1x256xf32> to vector<8x256xf32>
    %456 = arith.mulf %454, %455 : vector<8x256xf32>
    %457 = arith.addf %449, %456 : vector<8x256xf32>
    %c0_307 = arith.constant 0 : index
    %c1_308 = arith.constant 1 : index
    %458 = vector.load %arg14[%c0_307, %c1_308] : memref<8x324xf32, #tpu.memory_space<vmem>>, vector<8x256xf32>
    %c0_309 = arith.constant 0 : index
    %c1_310 = arith.constant 1 : index
    %459 = vector.load %arg11[%c0_309, %c1_310] : memref<8x9xf32, #tpu.memory_space<vmem>>, vector<8x1xf32>
    %c2_311 = arith.constant 2 : index
    %c0_312 = arith.constant 0 : index
    %460 = vector.load %arg2[%c2_311, %c0_312] : memref<5x256xf32, #tpu.memory_space<vmem>>, vector<1x256xf32>
    %461 = vector.broadcast %459 : vector<8x1xf32> to vector<8x256xf32>
    %462 = arith.mulf %458, %461 : vector<8x256xf32>
    %463 = vector.broadcast %460 : vector<1x256xf32> to vector<8x256xf32>
    %464 = arith.mulf %462, %463 : vector<8x256xf32>
    %465 = arith.addf %457, %464 : vector<8x256xf32>
    %c0_313 = arith.constant 0 : index
    %c2_314 = arith.constant 2 : index
    %466 = vector.load %arg14[%c0_313, %c2_314] : memref<8x324xf32, #tpu.memory_space<vmem>>, vector<8x256xf32>
    %c0_315 = arith.constant 0 : index
    %c2_316 = arith.constant 2 : index
    %467 = vector.load %arg11[%c0_315, %c2_316] : memref<8x9xf32, #tpu.memory_space<vmem>>, vector<8x1xf32>
    %c3_317 = arith.constant 3 : index
    %c0_318 = arith.constant 0 : index
    %468 = vector.load %arg2[%c3_317, %c0_318] : memref<5x256xf32, #tpu.memory_space<vmem>>, vector<1x256xf32>
    %469 = vector.broadcast %467 : vector<8x1xf32> to vector<8x256xf32>
    %470 = arith.mulf %466, %469 : vector<8x256xf32>
    %471 = vector.broadcast %468 : vector<1x256xf32> to vector<8x256xf32>
    %472 = arith.mulf %470, %471 : vector<8x256xf32>
    %473 = arith.addf %465, %472 : vector<8x256xf32>
    %c0_319 = arith.constant 0 : index
    %c16_320 = arith.constant 16 : index
    %474 = vector.load %arg14[%c0_319, %c16_320] : memref<8x324xf32, #tpu.memory_space<vmem>>, vector<8x256xf32>
    %c0_321 = arith.constant 0 : index
    %c3_322 = arith.constant 3 : index
    %475 = vector.load %arg11[%c0_321, %c3_322] : memref<8x9xf32, #tpu.memory_space<vmem>>, vector<8x1xf32>
    %c1_323 = arith.constant 1 : index
    %c0_324 = arith.constant 0 : index
    %476 = vector.load %arg2[%c1_323, %c0_324] : memref<5x256xf32, #tpu.memory_space<vmem>>, vector<1x256xf32>
    %477 = vector.broadcast %475 : vector<8x1xf32> to vector<8x256xf32>
    %478 = arith.mulf %474, %477 : vector<8x256xf32>
    %479 = vector.broadcast %476 : vector<1x256xf32> to vector<8x256xf32>
    %480 = arith.mulf %478, %479 : vector<8x256xf32>
    %481 = arith.addf %473, %480 : vector<8x256xf32>
    %c0_325 = arith.constant 0 : index
    %c17_326 = arith.constant 17 : index
    %482 = vector.load %arg14[%c0_325, %c17_326] : memref<8x324xf32, #tpu.memory_space<vmem>>, vector<8x256xf32>
    %c0_327 = arith.constant 0 : index
    %c4_328 = arith.constant 4 : index
    %483 = vector.load %arg11[%c0_327, %c4_328] : memref<8x9xf32, #tpu.memory_space<vmem>>, vector<8x1xf32>
    %c2_329 = arith.constant 2 : index
    %c0_330 = arith.constant 0 : index
    %484 = vector.load %arg2[%c2_329, %c0_330] : memref<5x256xf32, #tpu.memory_space<vmem>>, vector<1x256xf32>
    %485 = vector.broadcast %483 : vector<8x1xf32> to vector<8x256xf32>
    %486 = arith.mulf %482, %485 : vector<8x256xf32>
    %487 = vector.broadcast %484 : vector<1x256xf32> to vector<8x256xf32>
    %488 = arith.mulf %486, %487 : vector<8x256xf32>
    %489 = arith.addf %481, %488 : vector<8x256xf32>
    %c0_331 = arith.constant 0 : index
    %c18_332 = arith.constant 18 : index
    %490 = vector.load %arg14[%c0_331, %c18_332] : memref<8x324xf32, #tpu.memory_space<vmem>>, vector<8x256xf32>
    %c0_333 = arith.constant 0 : index
    %c5_334 = arith.constant 5 : index
    %491 = vector.load %arg11[%c0_333, %c5_334] : memref<8x9xf32, #tpu.memory_space<vmem>>, vector<8x1xf32>
    %c3_335 = arith.constant 3 : index
    %c0_336 = arith.constant 0 : index
    %492 = vector.load %arg2[%c3_335, %c0_336] : memref<5x256xf32, #tpu.memory_space<vmem>>, vector<1x256xf32>
    %493 = vector.broadcast %491 : vector<8x1xf32> to vector<8x256xf32>
    %494 = arith.mulf %490, %493 : vector<8x256xf32>
    %495 = vector.broadcast %492 : vector<1x256xf32> to vector<8x256xf32>
    %496 = arith.mulf %494, %495 : vector<8x256xf32>
    %497 = arith.addf %489, %496 : vector<8x256xf32>
    %c0_337 = arith.constant 0 : index
    %c32_338 = arith.constant 32 : index
    %498 = vector.load %arg14[%c0_337, %c32_338] : memref<8x324xf32, #tpu.memory_space<vmem>>, vector<8x256xf32>
    %c0_339 = arith.constant 0 : index
    %c6_340 = arith.constant 6 : index
    %499 = vector.load %arg11[%c0_339, %c6_340] : memref<8x9xf32, #tpu.memory_space<vmem>>, vector<8x1xf32>
    %c1_341 = arith.constant 1 : index
    %c0_342 = arith.constant 0 : index
    %500 = vector.load %arg2[%c1_341, %c0_342] : memref<5x256xf32, #tpu.memory_space<vmem>>, vector<1x256xf32>
    %501 = vector.broadcast %499 : vector<8x1xf32> to vector<8x256xf32>
    %502 = arith.mulf %498, %501 : vector<8x256xf32>
    %503 = vector.broadcast %500 : vector<1x256xf32> to vector<8x256xf32>
    %504 = arith.mulf %502, %503 : vector<8x256xf32>
    %505 = arith.addf %497, %504 : vector<8x256xf32>
    %c0_343 = arith.constant 0 : index
    %c33_344 = arith.constant 33 : index
    %506 = vector.load %arg14[%c0_343, %c33_344] : memref<8x324xf32, #tpu.memory_space<vmem>>, vector<8x256xf32>
    %c0_345 = arith.constant 0 : index
    %c7_346 = arith.constant 7 : index
    %507 = vector.load %arg11[%c0_345, %c7_346] : memref<8x9xf32, #tpu.memory_space<vmem>>, vector<8x1xf32>
    %c2_347 = arith.constant 2 : index
    %c0_348 = arith.constant 0 : index
    %508 = vector.load %arg2[%c2_347, %c0_348] : memref<5x256xf32, #tpu.memory_space<vmem>>, vector<1x256xf32>
    %509 = vector.broadcast %507 : vector<8x1xf32> to vector<8x256xf32>
    %510 = arith.mulf %506, %509 : vector<8x256xf32>
    %511 = vector.broadcast %508 : vector<1x256xf32> to vector<8x256xf32>
    %512 = arith.mulf %510, %511 : vector<8x256xf32>
    %513 = arith.addf %505, %512 : vector<8x256xf32>
    %c0_349 = arith.constant 0 : index
    %c34_350 = arith.constant 34 : index
    %514 = vector.load %arg14[%c0_349, %c34_350] : memref<8x324xf32, #tpu.memory_space<vmem>>, vector<8x256xf32>
    %c0_351 = arith.constant 0 : index
    %c8_352 = arith.constant 8 : index
    %515 = vector.load %arg11[%c0_351, %c8_352] : memref<8x9xf32, #tpu.memory_space<vmem>>, vector<8x1xf32>
    %c3_353 = arith.constant 3 : index
    %c0_354 = arith.constant 0 : index
    %516 = vector.load %arg2[%c3_353, %c0_354] : memref<5x256xf32, #tpu.memory_space<vmem>>, vector<1x256xf32>
    %517 = vector.broadcast %515 : vector<8x1xf32> to vector<8x256xf32>
    %518 = arith.mulf %514, %517 : vector<8x256xf32>
    %519 = vector.broadcast %516 : vector<1x256xf32> to vector<8x256xf32>
    %520 = arith.mulf %518, %519 : vector<8x256xf32>
    %521 = arith.addf %513, %520 : vector<8x256xf32>
    %c0_355 = arith.constant 0 : index
    %c0_356 = arith.constant 0 : index
    %522 = vector.load %arg12[%c0_355, %c0_356] : memref<8x1xf32, #tpu.memory_space<vmem>>, vector<8x1xf32>
    %523 = vector.broadcast %522 : vector<8x1xf32> to vector<8x256xf32>
    %524 = arith.addf %521, %523 : vector<8x256xf32>
    %525 = vector.extract_strided_slice %524 {offsets = [0, 0], sizes = [4, 256], strides = [1, 1]} : vector<8x256xf32> to vector<4x256xf32>
    %526 = arith.addf %238, %525 : vector<4x256xf32>
    %c0_357 = arith.constant 0 : index
    %c0_358 = arith.constant 0 : index
    %c0_359 = arith.constant 0 : index
    %527 = vector.load %arg13[%c0_357, %c0_358, %c0_359] : memref<1x8x256xf32, #tpu.memory_space<vmem>>, vector<1x4x256xf32>
    %528 = vector.shape_cast %527 : vector<1x4x256xf32> to vector<4x256xf32>
    %529 = vector.shape_cast %526 : vector<4x256xf32> to vector<1x4x256xf32>
    tpu.vector_store %arg13[%c0_357, %c0_358, %c0_359], %529 {strides = array<i32>} : memref<1x8x256xf32, #tpu.memory_space<vmem>>, vector<1x4x256xf32>,
    %530 = vector.extract_strided_slice %524 {offsets = [4, 0], sizes = [4, 256], strides = [1, 1]} : vector<8x256xf32> to vector<4x256xf32>
    %531 = arith.addf %445, %530 : vector<4x256xf32>
    %c0_360 = arith.constant 0 : index
    %c4_361 = arith.constant 4 : index
    %c0_362 = arith.constant 0 : index
    %532 = vector.load %arg13[%c0_360, %c4_361, %c0_362] : memref<1x8x256xf32, #tpu.memory_space<vmem>>, vector<1x4x256xf32>
    %533 = vector.shape_cast %532 : vector<1x4x256xf32> to vector<4x256xf32>
    %534 = vector.shape_cast %531 : vector<4x256xf32> to vector<1x4x256xf32>
    tpu.vector_store %arg13[%c0_360, %c4_361, %c0_362], %534 {strides = array<i32>} : memref<1x8x256xf32, #tpu.memory_space<vmem>>, vector<1x4x256xf32>,
    return
  }
  func.func @transform_0(%arg0: i32) -> (i32, i32, i32) {
    %c0_i32 = arith.constant 0 : i32
    %c0_i32_0 = arith.constant 0 : i32
    %c0_i32_1 = arith.constant 0 : i32
    return %arg0, %c0_i32, %c0_i32_0 : i32, i32, i32
  }
  func.func @transform_1(%arg0: i32) -> (i32, i32) {
    %c0_i32 = arith.constant 0 : i32
    %c0_i32_0 = arith.constant 0 : i32
    %c0_i32_1 = arith.constant 0 : i32
    return %c0_i32, %c0_i32_0 : i32, i32
  }
  func.func @transform_2(%arg0: i32) -> (i32, i32) {
    %c0_i32 = arith.constant 0 : i32
    %c0_i32_0 = arith.constant 0 : i32
    %c0_i32_1 = arith.constant 0 : i32
    return %c0_i32, %c0_i32_0 : i32, i32
  }
  func.func @transform_3(%arg0: i32) -> (i32, i32) {
    %c0_i32 = arith.constant 0 : i32
    %c0_i32_0 = arith.constant 0 : i32
    %c0_i32_1 = arith.constant 0 : i32
    return %c0_i32, %c0_i32_0 : i32, i32
  }
  func.func @transform_4(%arg0: i32) -> (i32, i32) {
    %c0_i32 = arith.constant 0 : i32
    %c0_i32_0 = arith.constant 0 : i32
    %c0_i32_1 = arith.constant 0 : i32
    return %c0_i32, %c0_i32_0 : i32, i32
  }
  func.func @transform_5(%arg0: i32) -> (i32, i32) {
    %c0_i32 = arith.constant 0 : i32
    %c0_i32_0 = arith.constant 0 : i32
    %c0_i32_1 = arith.constant 0 : i32
    return %c0_i32, %c0_i32_0 : i32, i32
  }
  func.func @transform_6(%arg0: i32) -> (i32, i32) {
    %c0_i32 = arith.constant 0 : i32
    %c0_i32_0 = arith.constant 0 : i32
    %c0_i32_1 = arith.constant 0 : i32
    return %c0_i32, %c0_i32_0 : i32, i32
  }
  func.func @transform_7(%arg0: i32) -> (i32, i32) {
    %c0_i32 = arith.constant 0 : i32
    %c0_i32_0 = arith.constant 0 : i32
    %c0_i32_1 = arith.constant 0 : i32
    return %c0_i32, %c0_i32_0 : i32, i32
  }
  func.func @transform_8(%arg0: i32) -> (i32, i32) {
    %c0_i32 = arith.constant 0 : i32
    %c0_i32_0 = arith.constant 0 : i32
    %c0_i32_1 = arith.constant 0 : i32
    return %c0_i32, %c0_i32_0 : i32, i32
  }
  func.func @transform_9(%arg0: i32) -> (i32, i32) {
    %c0_i32 = arith.constant 0 : i32
    %c0_i32_0 = arith.constant 0 : i32
    %c0_i32_1 = arith.constant 0 : i32
    return %c0_i32, %c0_i32_0 : i32, i32
  }
  func.func @transform_10(%arg0: i32) -> (i32, i32) {
    %c0_i32 = arith.constant 0 : i32
    %c0_i32_0 = arith.constant 0 : i32
    %c0_i32_1 = arith.constant 0 : i32
    return %c0_i32, %c0_i32_0 : i32, i32
  }
  func.func @transform_11(%arg0: i32) -> (i32, i32) {
    %c0_i32 = arith.constant 0 : i32
    %c0_i32_0 = arith.constant 0 : i32
    %c0_i32_1 = arith.constant 0 : i32
    return %c0_i32, %c0_i32_0 : i32, i32
  }
  func.func @transform_12(%arg0: i32) -> (i32, i32, i32) {
    %c0_i32 = arith.constant 0 : i32
    %c0_i32_0 = arith.constant 0 : i32
    %c0_i32_1 = arith.constant 0 : i32
    return %arg0, %c0_i32, %c0_i32_0 : i32, i32, i32
  }
}

</mosaic_0001>

<bundles_post_ra>
// kernel: tpu_custom_call.1
= control target key start
LH: loop header
LB: loop body
LE: loop exit
PB: predicated region body
PF: predicated region fallthrough
CT: control target
= control target key end

     0   :  { %s5789_s0 = inlined_call_operand.hbm [shape: f32[2,8,256], index: 0, kind: input, shape index: {}]   ;;  %s5790_s1 = inlined_call_operand.vmem [shape: f32[5,256], index: 1, kind: input, shape index: {}]   ;;  %s5791_s2 = inlined_call_operand.vmem [shape: f32[2,8], index: 2, kind: input, shape index: {}]   ;;  %s5792_s3 = inlined_call_operand.vmem [shape: f32[2,1], index: 3, kind: input, shape index: {}]   ;;  %s5793_s4 = inlined_call_operand.vmem [shape: f32[2,25], index: 4, kind: input, shape index: {}]   ;;  %s5794_s5 = inlined_call_operand.vmem [shape: f32[2,1], index: 5, kind: input, shape index: {}]   ;;  %s5795_s6 = inlined_call_operand.vmem [shape: f32[4,4], index: 6, kind: input, shape index: {}]   ;;  %s5796_s7 = inlined_call_operand.vmem [shape: f32[4,1], index: 7, kind: input, shape index: {}]   ;;  %s5797_s8 = inlined_call_operand.vmem [shape: f32[4,25], index: 8, kind: input, shape index: {}]   ;;  %s5798_s9 = inlined_call_operand.vmem [shape: f32[4,1], index: 9, kind: input, shape index: {}]   ;;  %s5799_s10 = inlined_call_operand.vmem [shape: f32[8,9], index: 10, kind: input, shape index: {}]   ;;  %s5800_s11 = inlined_call_operand.vmem [shape: f32[8,1], index: 11, kind: input, shape index: {}]   ;;  %s5801_s12 = inlined_call_operand.hbm [shape: f32[2,8,256], index: 12, kind: output, shape index: {}]  }
   0x1   :  { %6075 = sst [smem:[#allocation77_spill]] %s5789_s0 }
   0x2   :  { %6076 = sst [smem:[#allocation78_spill]] %s5791_s2 }
   0x3   :  { %6077 = sst [smem:[#allocation79_spill]] %s5792_s3 }
   0x4   :  { %6078 = sst [smem:[#allocation80_spill]] %s5793_s4 }
   0x5   :  { %6079 = sst [smem:[#allocation81_spill]] %s5794_s5 }
   0x6   :  { %6080 = sst [smem:[#allocation82_spill]] %s5795_s6 }
   0x7   :  { %6081 = sst [smem:[#allocation83_spill]] %s5797_s8 }
   0x8   :  { %6082 = sst [smem:[#allocation84_spill]] %s5801_s12 }
   0x9   :  { %17 = vsyncpa [#allocation4], 0 }
   0xa   :  { %19 = vsyncpa [#allocation4 + $0x1], 0 }
   0xb   :  { %20 = vsyncpa [#allocation5], 0 }
   0xc   :  { %22 = vsyncpa [#allocation5 + $0x1], 0  ;;  %s3451_s21 = smov 0   ;;  %s3453_s22 = smov 0  }
   0xd   :  { %s3455_s23 = smov 0   ;;  %s3457_s24 = smov 0  }
   0xe LB: > { %6083 = sst [smem:[#allocation9_spill]] %s3297_s21  ;;  %s3472_s25 = sadd.s32 4294967295, %s3309_s24   ;;  %s3309_s24 = sphi %s3457_s24, %s6497_s24   ;;  %s3305_s23 = sphi %s3455_s23, %s6500_s23   ;;  %s3301_s22 = sphi %s3453_s22, %s6499_s22   ;;  %s3297_s21 = sphi %s3451_s21, %s6498_s21  }
   0xf   : > { %6084 = sst [smem:[#allocation10_spill]] %s3301_s22  ;;  %s2979_s26 = sadd.s32 4294967294, %s3309_s24  }
  0x10   : > { %6085 = sst [smem:[#allocation11_spill]] %s3305_s23  ;;  %s3476_s27 = sadd.s32 1, %s3309_s24  }
  0x11   : > { %6086 = sst [smem:[#allocation12_spill]] %s3309_s24  ;;  %s35_s28 = sadd.s32 1, %s3305_s23 }
  0x12   : > { %6087 = sst [smem:[#allocation13_spill]] %s3472_s25  ;;  %s32_s29 = ssub.s32 %s3309_s24, %s3476_s27 }
  0x13   : > { %6088 = sst [smem:[#allocation14_spill]] %s3476_s27  ;;  %p42_p0 = scmp.ne.s32.totalorder %s3305_s23, %s3301_s22 }
  0x14   : > { %p33_p1 = scmp.eq.s32.totalorder %s32_s29, 0  ;;  %p43_p2 = scmp.eq.s32.totalorder %s3309_s24, 0 }
  0x15   : > { %p48_p3 = scmp.ne.s32.totalorder %s3301_s22, %s3297_s21  ;;  %p49_p4 = scmp.eq.s32.totalorder %s3472_s25, 0 }
  0x16   : > { %s3488_s30 = scalar_select %p33_p1, %s3305_s23, %s35_s28  }
  0x17   : > { %p3490_p5 = por %p43_p2, %p42_p0  ;;  %p3494_p6 = por %p49_p4, %p48_p3 }
  0x18   : > { %6089 = sst [smem:[#allocation15_spill]] %s3488_s30  ;;  %p303_p7 = scmp.eq.s32.totalorder %s3472_s25, 1 }
  0x19   : > { %p309_p8 = scmp.eq.s32.totalorder %s2979_s26, 1  ;;  %p3027_p10 = scmp.lt.s32.totalorder %s3309_s24, 2 }
  0x1a   : > { %p3501_p11 = por %p303_p7, %p42_p0  ;;  %s362_s17 = sand.u32 1, %s3305_s23  }
  0x1b   : > { %p3505_p12 = por %p309_p8, %p48_p3  ;;  %s3011_s18 = sshll.u32 %s3309_s24, 8 }
  0x1c   : > { %s6092_s15 = scalar_select %p3501_p11, 1, 0 }
  0x1d   : > { %s6094_s16 = scalar_select %p3505_p12, 1, 0 }
  0x1e   : > { %6093 = sst [smem:[#allocation16_spill]] %s6092_s15  ;;  %s2982_s19 = sshll.u32 %s362_s17, 4 }
  0x1f   : > { %6095 = sst [smem:[#allocation17_spill]] %s6094_s16  ;;  %s366_s26 = scalar_lea.vmem [#allocation3], %s2982_s19 }
  0x20   : > { %s6096_s0 = sld [smem:[#allocation77_spill]]  ;;  %s374_s30 = sshll.u32 %s366_s26, 4  ;;  %s3522_s30 = int_to_ptr.vmem [resolvable:$true] %s374_s30 }
  0x21   : > { %p3518_p13 = pnand %p3027_p10, %p3490_p5  ;;  %s363_s20 = scalar_lea.sflag [#allocation4], %s362_s17 }
  0x23   : > { %p3215_p3 = pneg %p3518_p13 }
  0x26   : > { %s3514_s29 = scalar_lea.hbm %s6096_s0, %s3011_s18  ;;  %s3218_s28 = scalar_lea.hbm %s6096_s0, 512 }
  0x27   : > { %s3213_s18 = scalar_lea.hbm %s3514_s29, 256  ;;  %p3219_p5 = scmp.lt.u32.totalorder %s3514_s29, %s6096_s0 }
  0x28   : > { %p3214_p2 = scmp.ne.s32.totalorder %s3514_s29, %s3213_s18  ;;  %p3220_p8 = scmp.lt.u32.totalorder %s3218_s28, %s3213_s18 }
  0x29   : > { %p3222_p9 = scmp.lt.u32.totalorder %s3213_s18, %s3514_s29 }
  0x2a   : > { %p3216_p4 = pnand %p3215_p3, %p3214_p2  ;;  %p3221_p10 = por %p3220_p8, %p3219_p5 }
  0x2c   : > { %p3217_p7 = pneg %p3216_p4  ;;  %p3223_p0 = por %p3222_p9, %p3221_p10 }
  0x2e   : > { %p3224_p1 = pnand %p3223_p0, %p3217_p7 }
  0x30   : > { %3227 = shalt.err (!%p3224_p1)
}
  0x31   : > { %s3228_s17 = scalar_lea.vmem %s3522_s30, 256  ;;  %s3311_s13 = smov [#allocation3]  }
  0x32   : > { %p3229_p2 = scmp.ne.s32.totalorder %s3522_s30, %s3228_s17  ;;  %s3233_s19 = sshll.u32 %s3311_s13, 4  ;;  %s3234_s19 = int_to_ptr.vmem [resolvable:$false] %s3233_s19 }
  0x33   : > { %s3235_s23 = scalar_lea.vmem %s3234_s19, 512  ;;  %p3236_p11 = scmp.lt.s32.totalorder %s3522_s30, %s3234_s19 }
  0x34   : > { %p3231_p4 = pnand %p3229_p2, %p3215_p3  ;;  %p3237_p5 = scmp.lt.s32.totalorder %s3235_s23, %s3228_s17 }
  0x36   : > { %p3232_p12 = pneg %p3231_p4  ;;  %p3238_p8 = por %p3237_p5, %p3236_p11 }
  0x38   : > { %p3239_p9 = pnand %p3238_p8, %p3232_p12 }
  0x3a   : > { %3242 = shalt.err (!%p3239_p9)
}
  0x3b   : > { %3022 = dma.hbm_to_vmem [thread:$0]  (!%p3518_p13), %s3514_s29, 256, %s3522_s30, %s363_s20  }
  0x3c   : > { %p6098_p0 = scmp.lt.s32.totalorder %s3309_s24, 3  ;;  %p6099_p1 = scmp.ge.s32.totalorder %s3309_s24, 1 }
  0x3e   : > { %p380_p3 = pnand %p6099_p1, %p6098_p0 }
  0x40   : > { %383 = sbr.rel (%p380_p3) target bundleno = 1514 (0x5ea), region = 68 }
  0x47   : > { %s3556_s18 = sand.u32 1, %s3301_s22  }
  0x48   : > { %6100 = sst [smem:[#allocation18_spill]] %s3556_s18  ;;  %s5806_s28 = sshll.u32 %s3556_s18, 4 }
  0x49   : > { %s386_s26 = scalar_lea.sflag [#allocation4], %s3556_s18  ;;  %s3562_s27 = scalar_lea.vmem [#allocation3], %s5806_s28 }
  0x4a   : > { %3288 = dma.done.wait (%p3494_p6), %s386_s26, 256  }
  0x4b   : > { %3290 = vsyncadd (%p3494_p6), %s386_s26, 4294967040  ;;  %v560_v0 = vlaneseq  ;;  %v5873_v1 = vmov 0.0   ;;  %v5836_v2 = vmov 0   ;;  %v431_v5 = vld [vmem:[%s3562_s27 + $0x8] sm:$0xff]  ;;  %v430_v6 = vld [vmem:[%s3562_s27] sm:$0xff]  ;;  %s6102_s2 = sld [smem:[#allocation78_spill]] }
  0x4c   : > { %507 = vmatprep.mubr.f32.mxu0 %v5873_v1  ;;  %528 = vst [vmem:[#allocation2] sm:$0xff] %v5873_v1  ;;  %529 = vst [vmem:[#allocation2 + $0x8] sm:$0xff] %v5873_v1  ;;  %3135 = vset.pattern.permute.xlu1 %v5836_v2  ;;  %vm439_vm0 = vcmask 64512   ;;  %s6103_s4 = sld [smem:[#allocation80_spill]]  ;;  %s6105_s3 = sld [smem:[#allocation79_spill]]  ;;  %v5871_v16 = vmov 2  }
  0x4d   : > { %v561_v3 = vshrl.u32 %v560_v0, 7  ;;  %3134 = vset.pattern.permute.xlu0 %v5836_v2  ;;  %1557 = vmatprep.mubr.f32.mxu1 %v5873_v1  ;;  %v2989_v9 = vld [vmem:[%s5790_s1 + $0x1] ss:$8 sm:$0x3]  ;;  %s5817_s14 = smov 1   ;;  %s5813_s17 = smov 2  }
  0x4e   : > { %443 = vmatprep.subr.mxu0 %v431_v5  ;;  %v2990_v12 = vld [vmem:[%s5790_s1 + $0x2] ss:$8 sm:$0x3]  ;;  %v2991_v17 = vld [vmem:[%s5790_s1 + $0x3] ss:$8 sm:$0x3] }
  0x4f   : > { %v3574_v4 = vsub.s32 0, %v561_v3  ;;  %444 = vmatpush1.msra.mxu0 %v430_v6  ;;  %v3593_v11 = vsub.s32 1, %v561_v3  ;;  %v2992_v19 = vld [vmem:[%s5790_s1 + $0x4] ss:$8 sm:$0x3]  ;;  %s5809_s23 = smov 3  }
  0x50   : > { %v551_v22 = vld [vmem:[%s5790_s1] ss:$8 sm:$0x3]  ;;  %s5807_s29 = smov 4   ;;  %v5869_v24 = vmov 3   ;;  %s5811_s20 = smov 16  }
  0x51   : > { %6101 = vst [vmem:[#allocation19_spill] sm:$0xff] %v3574_v4  ;;  %v432_v7 = vld [vmem:[%s6102_s2] sm:$0x3]  ;;  %v3591_v10 = vrot.slane %v2989_v9, %v3574_v4  ;;  %6104 = vst [vmem:[#allocation20_spill] sm:$0xff] %v3593_v11  ;;  %v3602_v14 = vrot.slane %v2990_v12, %v3574_v4  ;;  %v3607_v15 = vrot.slane %v2989_v9, %v3593_v11  ;;  %s5815_s13 = smov 17   ;;  %v5867_v26 = vmov 4  }
  0x52   : > { %v3584_v8 = vld [vmem:[%s6103_s4] sm:$0x3]  ;;  %2988 = vmatmul.mubr.msk.f32.vlgmr.msra.gmra.mrb[0].mxu0 %vm439_vm0, %v432_v7  ;;  %v3616_v18 = vrot.slane %v2991_v17, %v3574_v4  ;;  %v3626_v20 = vrot.slane %v2992_v19, %v3574_v4  ;;  %v3630_v21 = vrot.slane %v2990_v12, %v3593_v11  ;;  %v3638_v23 = vrot.slane %v551_v22, %v3574_v4  ;;  %s5819_s19 = smov 18   ;;  %s5912_s26 = smov 19  }
  0x53   : > { %554 = vperm.xlu1 %3135, %v3584_v8   ;;  %v433_v13 = vld [vmem:[%s6105_s3] sm:$0x3]  ;;  %v3647_v25 = vrot.slane %v2991_v17, %v3593_v11  ;;  %v3658_v27 = vrot.slane %v2992_v19, %v3593_v11  ;;  %v5842_v28 = vmov 19   ;;  %v5865_v29 = vmov 5   ;;  %s5910_s30 = smov 20   ;;  %s5825_s28 = smov 32  }
  0x54   : > { %436 = vperm.xlu0 %3134, %v433_v13   ;;  %6106 = vst [vmem:[#allocation21_spill] sm:$0xff] %v3638_v23  ;;  %v3670_v30 = vrot.slane %v551_v22, %v3593_v11  ;;  %v5863_v31 = vmov 6   ;;  %v5861_v32 = vmov 7   ;;  %v5859_v33 = vmov 8   ;;  %s6113_s5 = sld [smem:[#allocation81_spill]]  ;;  %s6153_s6 = sld [smem:[#allocation82_spill]] }
  0x55   : > { %v5858_v34 = vmov 9   ;;  %v5857_v35 = vmov 10   ;;  %v5839_v36 = vmov 22   ;;  %v5856_v37 = vmov 11   ;;  %s6156_s8 = sld [smem:[#allocation83_spill]]  ;;  %s6162_s0 = smov 1  }
  0x56   : > { %6107 = vst [vmem:[#allocation22_spill] sm:$0xff] %v3670_v30  ;;  %v5838_v38 = vmov 23   ;;  %v5855_v39 = vmov 12   ;;  %v5835_v40 = vmov 24   ;;  %v5854_v41 = vmov 13   ;;  %s6165_s2 = smov 109  }
  0x57   : > { %595 = vrot.lane.b32.xlu1 %v3591_v10, %s5817_s14  ;;  %v5853_v42 = vmov 14   ;;  %v5852_v43 = vmov 15   ;;  %v5851_v44 = vmov 16   ;;  %v5844_v46 = vmov 17   ;;  %s6169_s3 = smov 96   ;;  %s6175_s4 = smov 94  }
  0x58   : > { %3136 = vset.pattern.permute.xlu1 %v5871_v16  ;;  %641 = vrot.lane.b32.xlu0 %v3602_v14, %s5813_s17  ;;  %v5843_v49 = vmov 18   ;;  %v5841_v52 = vmov 20   ;;  %v5840_v54 = vmov 21   ;;  %vm530_vm1 = vcmask 556032   ;;  %s6178_s22 = smov 93   ;;  %s6184_s21 = smov 80  }
  0x59   : > { %3153 = vset.pattern.permute.xlu0 %v5842_v28  ;;  %531 = vst.msk [vmem:[#allocation2 + $0x10] sm:$0xff] %vm530_vm1, %v5873_v1  ;;  %vm543_vm2 = vcmask 1041680   ;;  %vm546_vm3 = vcmask 271360   ;;  %vm538_vm4 = vcmask 277504   ;;  %vm599_vm5 = vcmask 7168   ;;  %s6186_s24 = smov 79  }
  0x5a   : > { %vm645_vm6 = vcmask 15360   ;;  %vm691_vm7 = vcmask 23552   ;;  %vm737_vm8 = vcmask 31744   ;;  %vm772_vm9 = vcmask 130048   ;;  %s6187_s16 = smov 16   ;;  %s6189_s12 = smov 77  }
  0x5b   : > { %597 = vrot.lane.b32.xlu1 %v3607_v15, %s5817_s14  ;;  %s5821_s14 = smov 49   ;;  %vm807_vm10 = vcmask 138240   ;;  %vm842_vm11 = vcmask 146432   ;;  %vm877_vm12 = vcmask 154624   ;;  %vm912_vm13 = vcmask 162816   ;;  %s6190_s15 = smov 64  }
  0x5c   : > { %687 = vrot.lane.b32.xlu0 %v3616_v18, %s5809_s23  ;;  %vm5993_vm14 = vcmask 261120   ;;  %vm5989_vm15 = vcmask 269312   ;;  %vm5942_vm0 = vcmask 285696   ;;  %s6191_s25 = smov 17   ;;  %s6193_s18 = smov 63  }
  0x5f   : > { %626 = vperm.xlu1 %3136, %v3584_v8  }
  0x60   : > { %733 = vrot.lane.b32.xlu0 %v3626_v20, %s5807_s29 }
  0x63   : > { %643 = vrot.lane.b32.xlu1 %v3630_v21, %s5813_s17  ;;  %s5827_s17 = smov 36  }
  0x64   : > { %3137 = vset.pattern.permute.xlu1 %v5869_v24  ;;  %768 = vrot.lane.b32.xlu0 %v3638_v23, %s5811_s20 }
  0x67   : > { %672 = vperm.xlu1 %3137, %v3584_v8  }
  0x68   : > { %803 = vrot.lane.b32.xlu0 %v3591_v10, %s5815_s13 }
  0x6b   : > { %689 = vrot.lane.b32.xlu1 %v3647_v25, %s5809_s23  ;;  %s5907_s23 = smov 34  }
  0x6c   : > { %3138 = vset.pattern.permute.xlu1 %v5867_v26  ;;  %838 = vrot.lane.b32.xlu0 %v3602_v14, %s5819_s19 }
  0x6f   : > { %718 = vperm.xlu1 %3138, %v3584_v8  }
  0x70   : > { %873 = vrot.lane.b32.xlu0 %v3616_v18, %s5912_s26 }
  0x73   : > { %735 = vrot.lane.b32.xlu1 %v3658_v27, %s5807_s29  ;;  %s5823_s29 = smov 33  }
  0x74   : > { %3139 = vset.pattern.permute.xlu1 %v5865_v29  ;;  %908 = vrot.lane.b32.xlu0 %v3626_v20, %s5910_s30 }
  0x77   : > { %762 = vperm.xlu1 %3139, %v3584_v8  }
  0x78   : > { %943 = vrot.lane.b32.xlu0 %v3638_v23, %s5825_s28 }
  0x7b   : > { %770 = vrot.lane.b32.xlu1 %v3670_v30, %s5811_s20  ;;  %s5904_s20 = smov 35  }
  0x7c   : > { %3140 = vset.pattern.permute.xlu1 %v5863_v31  ;;  %978 = vrot.lane.b32.xlu0 %v3591_v10, %s5823_s29 }
  0x7f   : > { %797 = vperm.xlu1 %3140, %v3584_v8  }
  0x80   : > { %1013 = vrot.lane.b32.xlu0 %v3602_v14, %s5907_s23 }
  0x83   : > { %805 = vrot.lane.b32.xlu1 %v3607_v15, %s5815_s13  ;;  %s5831_s13 = smov 48  }
  0x84   : > { %3141 = vset.pattern.permute.xlu1 %v5861_v32  ;;  %1047 = vrot.lane.b32.xlu0 %v3616_v18, %s5904_s20 }
  0x87   : > { %832 = vperm.xlu1 %3141, %v3584_v8  }
  0x88   : > { %1082 = vrot.lane.b32.xlu0 %v3626_v20, %s5827_s17 }
  0x8b   : > { %840 = vrot.lane.b32.xlu1 %v3630_v21, %s5819_s19  ;;  %s5829_s19 = smov 50  }
  0x8c   : > { %3142 = vset.pattern.permute.xlu1 %v5859_v33  ;;  %1117 = vrot.lane.b32.xlu0 %v3638_v23, %s5831_s13 }
  0x8f   : > { %867 = vperm.xlu1 %3142, %v3584_v8  }
  0x90   : > { %1152 = vrot.lane.b32.xlu0 %v3591_v10, %s5821_s14  ;;  %s5833_s14 = smov 51  }
  0x93   : > { %875 = vrot.lane.b32.xlu1 %v3647_v25, %s5912_s26  ;;  %s5921_s26 = smov 125  }
  0x94   : > { %3143 = vset.pattern.permute.xlu1 %v5858_v34  ;;  %1187 = vrot.lane.b32.xlu0 %v3602_v14, %s5829_s19 }
  0x97   : > { %902 = vperm.xlu1 %3143, %v3584_v8  }
  0x98   : > { %1251 = vperm.xlu0 %3153, %v3584_v8  }
  0x9b   : > { %910 = vrot.lane.b32.xlu1 %v3658_v27, %s5910_s30  ;;  %s5966_s30 = smov 126  }
  0x9c   : > { %3144 = vset.pattern.permute.xlu1 %v5857_v35  ;;  %1222 = vrot.lane.b32.xlu0 %v3616_v18, %s5833_s14 }
  0x9d   : > { %3156 = vset.pattern.permute.xlu0 %v5839_v36 }
  0x9f   : > { %937 = vperm.xlu1 %3144, %v3584_v8  }
  0xa0   : > { %1355 = vperm.xlu0 %3156, %v3584_v8  }
  0xa3   : > { %945 = vrot.lane.b32.xlu1 %v3670_v30, %s5825_s28  ;;  %s5901_s28 = smov 67  }
  0xa4   : > { %3145 = vset.pattern.permute.xlu1 %v5856_v37  ;;  %3157 = vset.pattern.permute.xlu0 %v5838_v38 }
  0xa5   : > { %1390 = vperm.xlu0 %3157, %v3584_v8  }
  0xa7   : > { %972 = vperm.xlu1 %3145, %v3584_v8  }
  0xa9   : > { %3158 = vset.pattern.permute.xlu0 %v5835_v40 }
  0xaa   : > { %1425 = vperm.xlu0 %3158, %v3584_v8  }
  0xab   : > { %980 = vrot.lane.b32.xlu1 %v3607_v15, %s5823_s29  ;;  %s5845_s29 = smov 66  }
  0xac   : > { %3146 = vset.pattern.permute.xlu1 %v5855_v39 }
  0xae   : > { %3159 = vset.pattern.permute.xlu0 %v5836_v2 }
  0xaf   : > { %1007 = vperm.xlu1 %3146, %v3584_v8   ;;  %1361 = vrot.lane.b32.xlu0 %v3602_v14, %s5845_s29 }
  0xb3   : > { %1015 = vrot.lane.b32.xlu1 %v3630_v21, %s5907_s23  ;;  %1396 = vrot.lane.b32.xlu0 %v3616_v18, %s5901_s28 }
  0xb4   : > { %3147 = vset.pattern.permute.xlu1 %v5854_v41 }
  0xb7   : > { %1041 = vperm.xlu1 %3147, %v3584_v8  }
  0xbb   : > { %1049 = vrot.lane.b32.xlu1 %v3647_v25, %s5904_s20  ;;  %s5950_s20 = smov 78  }
  0xbc   : > { %3148 = vset.pattern.permute.xlu1 %v5853_v42 }
  0xbf   : > { %1076 = vperm.xlu1 %3148, %v3584_v8  }
  0xc3   : > { %1084 = vrot.lane.b32.xlu1 %v3658_v27, %s5827_s17  ;;  %s6109_s17 = smov 49  }
  0xc4   : > { %3149 = vset.pattern.permute.xlu1 %v5852_v43 }
  0xc7   : > { %1111 = vperm.xlu1 %3149, %v3584_v8  }
  0xcb   : > { %1119 = vrot.lane.b32.xlu1 %v3670_v30, %s5831_s13  ;;  %s5954_s13 = smov 64  }
  0xcc   : > { %3150 = vset.pattern.permute.xlu1 %v5851_v44 }
  0xcf   : > { %1146 = vperm.xlu1 %3150, %v3584_v8  }
  0xd2   : > { %v3746_v45 = vpop.permute.xlu1 %554 }
  0xd3   : > { %6108 = vst [vmem:[#allocation23_spill] sm:$0xff] %v3746_v45  ;;  %1154 = vrot.lane.b32.xlu1 %v3607_v15, %s6109_s17 }
  0xd4   : > { %3151 = vset.pattern.permute.xlu1 %v5844_v46 }
  0xd6   : > { %v3751_v47 = vpop.permute.xlu1 %595 }
  0xd7   : > { %1181 = vperm.xlu1 %3151, %v3584_v8  }
  0xda   : > { %v3754_v48 = vpop.permute.xlu1 %597 }
  0xdb   : > { %1189 = vrot.lane.b32.xlu1 %v3630_v21, %s5829_s19  ;;  %s5849_s19 = smov 52  }
  0xdc   : > { %3152 = vset.pattern.permute.xlu1 %v5843_v49 }
  0xde   : > { %v3759_v50 = vpop.permute.xlu1 %626 }
  0xdf   : > { %1216 = vperm.xlu1 %3152, %v3584_v8  }
  0xe2   : > { %v3762_v51 = vpop.permute.xlu1 %643 }
  0xe3   : > { %3154 = vset.pattern.permute.xlu1 %v5841_v52 }
  0xe4   : > { %1286 = vperm.xlu1 %3154, %v3584_v8  }
  0xe6   : > { %v3766_v53 = vpop.permute.xlu1 %672 }
  0xe8   : > { %3155 = vset.pattern.permute.xlu1 %v5840_v54 }
  0xe9   : > { %1320 = vperm.xlu1 %3155, %v3584_v8  }
  0xea   : > { %v3770_v55 = vpop.permute.xlu1 %689 }
  0xed   : > { %1224 = vrot.lane.b32.xlu1 %v3647_v25, %s5833_s14  ;;  %s5847_s14 = smov 65  }
  0xee   : > { %v3774_v56 = vpop.permute.xlu1 %718  ;;  %3161 = vset.pattern.permute.xlu1 %v5836_v2 }
  0xf1   : > { %1257 = vrot.lane.b32.xlu1 %v3626_v20, %s5849_s19 }
  0xf2   : > { %v3779_v57 = vpop.permute.xlu1 %735 }
  0xf5   : > { %1259 = vrot.lane.b32.xlu1 %v3658_v27, %s5849_s19  ;;  %s5952_s19 = smov 63  }
  0xf6   : > { %v3783_v58 = vpop.permute.xlu1 %762 }
  0xf9   : > { %1292 = vrot.lane.b32.xlu1 %v3638_v23, %s5954_s13 }
  0xfa   : > { %v3787_v59 = vpop.permute.xlu1 %770 }
  0xfd   : > { %1294 = vrot.lane.b32.xlu1 %v3670_v30, %s5954_s13 }
  0xfe   : > { %v3791_v60 = vpop.permute.xlu1 %797 }
 0x101   : > { %1326 = vrot.lane.b32.xlu1 %v3591_v10, %s5847_s14  ;;  %v437_v10 = vpop.permute.xlu0 %436 }
 0x102   : > { %v3795_v61 = vpop.permute.xlu1 %805 }
 0x105   : > { %1328 = vrot.lane.b32.xlu1 %v3607_v15, %s5847_s14  ;;  %v3821_v2 = vpop.permute.xlu0 %641  ;;  %s5917_s14 = smov 76  }
 0x106   : > { %v3799_v62 = vpop.permute.xlu1 %832 }
 0x109   : > { %1363 = vrot.lane.b32.xlu1 %v3630_v21, %s5845_s29  ;;  %v3825_v54 = vpop.permute.xlu0 %687  ;;  %s5899_s29 = smov 68  }
 0x10a   : > { %v3803_v63 = vpop.permute.xlu1 %840 }
 0x10e   : > { %v3805_v0 = vpop.permute.xlu1 %867 }
 0x112   : > { %v3807_v3 = vpop.permute.xlu1 %875 }
 0x116   : > { %v3809_v5 = vpop.permute.xlu1 %902 }
 0x11a   : > { %v3811_v6 = vpop.permute.xlu1 %910 }
 0x11e   : > { %v3813_v7 = vpop.permute.xlu1 %937 }
 0x122   : > { %v3815_v9 = vpop.permute.xlu1 %945 }
 0x125   : > { %v509_v12 = vpop.f32.mrb[0].mxu0 }
 0x126   : > { %v3817_v13 = vpop.permute.xlu1 %972  ;;  %v510_v14 = vadd.f32 %v509_v12, %v437_v10  ;;  %v511_v15 = vpop.f32.mrb[1].mxu0 }
 0x127   : > { %v512_v17 = vadd.f32 %v511_v15, %v437_v10  ;;  %v3831_v15 = vpop.permute.xlu0 %733 }
 0x128   : > { %v514_v18 = vsub.f32 0.0, %v510_v14 }
 0x129   : > { %v515_v19 = vsub.f32 0.0, %v512_v17 }
 0x12a   : > { %v516_v21 = vmul.f32 1.442695, %v514_v18  ;;  %v3819_v40 = vpop.permute.xlu1 %980 }
 0x12b   : > { %v518_v22 = vmul.f32 1.442695, %v515_v19  ;;  %v3835_v19 = vpop.permute.xlu0 %768 }
 0x12c   : > { %3194 = vpow2.f32 %v516_v21 }
 0x12d   : > { %3196 = vpow2.f32 %v518_v22 }
 0x12e   : > { %v3823_v38 = vpop.permute.xlu1 %1007 }
 0x132   : > { %v3827_v12 = vpop.permute.xlu1 %1015 }
 0x136   : > { %v3195_v36 = vpop.eup %3194  ;;  %v3833_v18 = vpop.permute.xlu1 %1041 }
 0x137   : > { %v3197_v52 = vpop.eup %3196  ;;  %v520_v28 = vadd.f32 1.0, %v3195_v36 }
 0x138   : > { %v521_v10 = vadd.f32 1.0, %v3197_v52 }
 0x139   : > { %3198 = vrcp.f32 %v520_v28  ;;  %v3847_v28 = vpop.permute.xlu0 %803 }
 0x13a   : > { %3200 = vrcp.f32 %v521_v10  ;;  %v3837_v22 = vpop.permute.xlu1 %1049  ;;  %v3361_v10 = vmov 1  }
 0x13b   : > { %6110 = vst [vmem:[#allocation24_spill] sm:$0xff] %v3837_v22 }
 0x13e   : > { %v3849_v52 = vpop.permute.xlu1 %1076 }
 0x143   : > { %v3199_v21 = vpop.eup %3198 }
 0x144   : > { %v3201_v49 = vpop.eup %3200  ;;  %v3839_v36 = vmul.f32 %v3199_v21, %v510_v14  ;;  %v3858_v14 = vpop.permute.xlu0 %838 }
 0x145   : > { %v3841_v46 = vmul.f32 %v3201_v49, %v512_v17  ;;  %v1458_v49 = vld [vmem:[%s6113_s5] sm:$0x3]  ;;  %v3862_v17 = vpop.permute.xlu1 %1084  ;;  %s6173_s5 = smov 95  }
 0x146   : > { %6111 = vst [vmem:[#allocation25_spill] sm:$0xff] %v3839_v36  ;;  %534 = vrot.lane.b32.xlu0 %v3839_v36, %s5907_s23  ;;  %6114 = vst [vmem:[#allocation27_spill] sm:$0xff] %v3862_v17  ;;  %v6131_v17 = vmov 0.0  }
 0x147   : > { %6112 = vst [vmem:[#allocation26_spill] sm:$0xff] %v3841_v46  ;;  %536 = vrot.lane.b32.xlu1 %v3841_v46, %s5907_s23  ;;  %s5948_s23 = smov 127  }
 0x149   : > { %v3867_v21 = vpop.permute.xlu1 %1111 }
 0x14a   : > { %1431 = vrot.lane.b32.xlu0 %v3626_v20, %s5899_s29  ;;  %v3865_v20 = vpop.permute.xlu0 %873 }
 0x14b   : > { %1398 = vrot.lane.b32.xlu1 %v3647_v25, %s5901_s28  ;;  %s5919_s28 = smov 61  }
 0x14d   : > { %v3871_v44 = vpop.permute.xlu1 %1119 }
 0x14e   : > { %1461 = vperm.xlu0 %3159, %v1458_v49   ;;  %v3869_v25 = vpop.permute.xlu0 %908  ;;  %6115 = vst [vmem:[#allocation28_spill] sm:$0xff] %v3871_v44 }
 0x14f   : > { %1433 = vrot.lane.b32.xlu1 %v3658_v27, %s5899_s29  ;;  %s5915_s29 = smov 62  }
 0x151   : > { %v3875_v43 = vpop.permute.xlu1 %1146 }
 0x152   : > { %3160 = vset.pattern.permute.xlu0 %v3361_v10  ;;  %v3873_v49 = vpop.permute.xlu0 %943  ;;  %6116 = vst [vmem:[#allocation29_spill] sm:$0xff] %v3875_v43 }
 0x153   : > { %580 = vperm.xlu0 %3160, %v3584_v8  }
 0x155   : > { %v3879_v27 = vpop.permute.xlu1 %1154 }
 0x156   : > { %v3877_v42 = vpop.permute.xlu0 %978  ;;  %6117 = vst [vmem:[#allocation30_spill] sm:$0xff] %v3879_v27 }
 0x159   : > { %v3883_v10 = vpop.permute.xlu1 %1181 }
 0x15a   : > { %v3881_v41 = vpop.permute.xlu0 %1013 }
 0x15d   : > { %v3887_v39 = vpop.permute.xlu1 %1189 }
 0x15e   : > { %v3885_v8 = vpop.permute.xlu0 %1047 }
 0x161   : > { %v3891_v35 = vpop.permute.xlu1 %1216 }
 0x162   : > { %v3889_v37 = vpop.permute.xlu0 %1082  ;;  %6118 = vst [vmem:[#allocation31_spill] sm:$0xff] %v3891_v35 }
 0x165   : > { %v3895_v33 = vpop.permute.xlu1 %1286 }
 0x166   : > { %v3893_v34 = vpop.permute.xlu0 %1117  ;;  %6119 = vst [vmem:[#allocation32_spill] sm:$0xff] %v3895_v33 }
 0x169   : > { %v3899_v31 = vpop.permute.xlu1 %1320 }
 0x16a   : > { %v3897_v32 = vpop.permute.xlu0 %1152 }
 0x16b   : > { %6120 = vst [vmem:[#allocation33_spill] sm:$0xff] %v3897_v32 }
 0x16d   : > { %v3903_v26 = vpop.permute.xlu1 %1224 }
 0x16e   : > { %v3901_v29 = vpop.permute.xlu0 %1187  ;;  %6122 = vst [vmem:[#allocation35_spill] sm:$0xff] %v3903_v26 }
 0x16f   : > { %6121 = vst [vmem:[#allocation34_spill] sm:$0xff] %v3901_v29 }
 0x171   : > { %v3907_v16 = vpop.permute.xlu1 %1257 }
 0x172   : > { %v3905_v24 = vpop.permute.xlu0 %1251 }
 0x175   : > { %v3911_v36 = vpop.permute.xlu1 %1259 }
 0x176   : > { %v3909_v1 = vpop.permute.xlu0 %1222 }
 0x177   : > { %6123 = vst [vmem:[#allocation36_spill] sm:$0xff] %v3909_v1 }
 0x179   : > { %v3915_v30 = vpop.permute.xlu1 %1292 }
 0x17a   : > { %v3913_v46 = vpop.permute.xlu0 %1355  ;;  %6125 = vst [vmem:[#allocation38_spill] sm:$0xff] %v3915_v30 }
 0x17b   : > { %6124 = vst [vmem:[#allocation37_spill] sm:$0xff] %v3913_v46 }
 0x17d   : > { %v3919_v45 = vpop.permute.xlu1 %1294 }
 0x17e   : > { %v3917_v23 = vpop.permute.xlu0 %1390  ;;  %6126 = vst [vmem:[#allocation39_spill] sm:$0xff] %v3919_v45 }
 0x181   : > { %v3923_v4 = vpop.permute.xlu1 %1326 }
 0x182   : > { %v3921_v11 = vpop.permute.xlu0 %1425 }
 0x183   : > { %6127 = vst [vmem:[#allocation40_spill] sm:$0xff] %v3921_v11 }
 0x185   : > { %v3927_v27 = vpop.permute.xlu1 %1328 }
 0x186   : > { %v3925_v26 = vpop.permute.xlu0 %1361  ;;  %6129 = vst [vmem:[#allocation42_spill] sm:$0xff] %v3927_v27 }
 0x187   : > { %6128 = vst [vmem:[#allocation41_spill] sm:$0xff] %v3925_v26 }
 0x189   : > { %v3931_v1 = vpop.permute.xlu1 %1363 }
 0x18a   : > { %v3929_v33 = vpop.permute.xlu0 %1396 }
 0x1b8   : > { %v535_v44 = vpop.permute.xlu0 %534 }
 0x1b9   : > { %544 = vst.msk [vmem:[#allocation2] sm:$0x3] %vm543_vm2, %v535_v44  ;;  %v537_v30 = vpop.permute.xlu1 %536  ;;  %vm5941_vm2 = vcmask 293888  }
 0x1ba   : > { %v539_v45 = vsel %vm538_vm4, %v535_v44, %v537_v30  ;;  %547 = vst.msk [vmem:[#allocation2 + $0x10] sm:$0x3] %vm546_vm3, %v537_v30  ;;  %vm5945_vm3 = vcmask 392192  }
 0x1bb   : > { %545 = vst [vmem:[#allocation2 + $0x8] sm:$0x3] %v539_v45 }
 0x1bc   : > { %v3957_v43 = vpop.permute.xlu0 %1431 }
 0x1bd   : > { %6133 = vst [vmem:[#allocation45_spill] sm:$0xff] %v3957_v43 }
 0x1c0   : > { %v3934_v11 = vld [vmem:[#allocation2] sm:$0x3] }
 0x1c1   : > { %v3936_v35 = vld [vmem:[#allocation2] sm:$0x3]  ;;  %v3938_v29 = vld [vmem:[#allocation2 + $0x10] sm:$0x3]  ;;  %v1254_v27 = vmul.f32 %v3905_v24, %v3934_v11  ;;  %v1323_v44 = vmul.f32 %v3899_v31, %v3934_v11 }
 0x1c2   : > { %6130 = vst [vmem:[#allocation43_spill] sm:$0xff] %v3936_v35  ;;  %1649 = vst [vmem:[#allocation2] sm:$0xff] %v6131_v17  ;;  %v3943_v32 = vld [vmem:[#allocation2 + $0x8] sm:$0x3]  ;;  %v1358_v35 = vmul.f32 %v3913_v46, %v3934_v11 }
 0x1c3   : > { %1651 = vst.msk [vmem:[#allocation2 + $0x10] sm:$0xff] %vm530_vm1, %v6131_v17  ;;  %v3947_v22 = vld [vmem:[#allocation2 + $0x8] sm:$0x3]  ;;  %v1266_v30 = vmul.f32 %v3907_v16, %v1254_v27  ;;  %v1335_v45 = vmul.f32 %v3923_v4, %v1323_v44  ;;  %v1186_v44 = vmul.f32 %v3883_v10, %v3938_v29 }
 0x1c4   : > { %6132 = vst [vmem:[#allocation44_spill] sm:$0xff] %v3947_v22  ;;  %1650 = vst [vmem:[#allocation2 + $0x8] sm:$0xff] %v6131_v17  ;;  %v1370_v27 = vmul.f32 %v3925_v26, %v1358_v35  ;;  %v1393_v22 = vmul.f32 %v3917_v23, %v3934_v11  ;;  %v1360_v26 = vmul.f32 %v3913_v46, %v3938_v29 }
 0x1c5   : > { %1272 = vrot.lane.b32.xlu1 %v1266_v30, %s5917_s14 }
 0x1c6   : > { %v1405_v30 = vmul.f32 %v3929_v33, %v1393_v22 }
 0x1c9   : > { %1341 = vrot.lane.b32.xlu1 %v1335_v45, %s5952_s19  ;;  %v1198_v45 = vmul.f32 %v3887_v39, %v1186_v44 }
 0x1cd   : > { %1376 = vrot.lane.b32.xlu1 %v1370_v27, %s5915_s29  ;;  %v3964_v17 = vpop.permute.xlu0 %1461  ;;  %v1256_v27 = vmul.f32 %v3905_v24, %v3938_v29 }
 0x1ce   : > { %6134 = vst [vmem:[#allocation46_spill] sm:$0xff] %v3964_v17  ;;  %v629_v17 = vmul.f32 %v3759_v50, %v3934_v11 }
 0x1d0   : > { %v650_v44 = vmul.f32 %v3821_v2, %v629_v17  ;;  %v600_v17 = vsel %vm599_vm5, %v3751_v47, %v3754_v48 }
 0x1d1   : > { %1411 = vrot.lane.b32.xlu1 %v1405_v30, %s5919_s28  ;;  %v1268_v30 = vmul.f32 %v3911_v36, %v1256_v27  ;;  %s5927_s28 = smov 111  }
 0x1d2   : > { %v3970_v43 = vpop.permute.xlu0 %580 }
 0x1d3   : > { %v583_v35 = vmul.f32 %v3970_v43, %v3934_v11 }
 0x1d5   : > { %1206 = vrot.lane.b32.xlu1 %v1198_v45, %s5950_s20  ;;  %v604_v22 = vmul.f32 %v3751_v47, %v583_v35  ;;  %v675_v45 = vmul.f32 %v3766_v53, %v3934_v11  ;;  %v584_v35 = vmul.f32 %v3970_v43, %v3943_v32 }
 0x1d7   : > { %610 = vrot.lane.b32.xlu0 %v604_v22, %s5948_s23  ;;  %v1372_v22 = vmul.f32 %v3931_v1, %v1360_v26  ;;  %v696_v27 = vmul.f32 %v3825_v54, %v675_v45  ;;  %v605_v46 = vmul.f32 %v600_v17, %v584_v35  ;;  %v765_v45 = vmul.f32 %v3783_v58, %v3934_v11 }
 0x1d8   : > { %v676_v35 = vmul.f32 %v3766_v53, %v3943_v32  ;;  %v722_v17 = vmul.f32 %v3774_v56, %v3943_v32 }
 0x1d9   : > { %1276 = vrot.lane.b32.xlu1 %v1268_v30, %s5917_s14  ;;  %v721_v30 = vmul.f32 %v3774_v56, %v3934_v11  ;;  %s5925_s14 = smov 112  }
 0x1db   : > { %656 = vrot.lane.b32.xlu0 %v650_v44, %s5966_s30  ;;  %v630_v44 = vmul.f32 %v3759_v50, %v3943_v32  ;;  %v742_v26 = vmul.f32 %v3831_v15, %v721_v30  ;;  %v692_v30 = vsel %vm691_vm7, %v3825_v54, %v3770_v55 }
 0x1dd   : > { %1380 = vrot.lane.b32.xlu1 %v1372_v22, %s5915_s29  ;;  %v646_v22 = vsel %vm645_vm6, %v3821_v2, %v3762_v51  ;;  %s5923_s29 = smov 124   ;;  %v697_v2 = vmul.f32 %v692_v30, %v676_v35  ;;  %v870_v35 = vmul.f32 %v3805_v0, %v3934_v11 }
 0x1de   : > { %v651_v47 = vmul.f32 %v646_v22, %v630_v44  ;;  %v766_v22 = vmul.f32 %v3783_v58, %v3943_v32 }
 0x1df   : > { %702 = vrot.lane.b32.xlu0 %v696_v27, %s5921_s26  ;;  %v800_v27 = vmul.f32 %v3791_v60, %v3934_v11  ;;  %v882_v30 = vmul.f32 %v3865_v20, %v870_v35  ;;  %v975_v35 = vmul.f32 %v3817_v13, %v3934_v11 }
 0x1e1   : > { %612 = vrot.lane.b32.xlu1 %v605_v46, %s5948_s23  ;;  %v777_v46 = vmul.f32 %v3835_v19, %v765_v45  ;;  %v812_v44 = vmul.f32 %v3847_v28, %v800_v27  ;;  %v738_v45 = vsel %vm737_vm8, %v3831_v15, %v3779_v57  ;;  %v801_v27 = vmul.f32 %v3791_v60, %v3943_v32 }
 0x1e2   : > { %v743_v54 = vmul.f32 %v738_v45, %v722_v17  ;;  %v808_v17 = vsel %vm807_vm10, %v3847_v28, %v3795_v61  ;;  %v940_v45 = vmul.f32 %v3813_v7, %v3934_v11 }
 0x1e3   : > { %748 = vrot.lane.b32.xlu0 %v742_v26, %s5923_s29  ;;  %v835_v26 = vmul.f32 %v3799_v62, %v3934_v11 }
 0x1e5   : > { %658 = vrot.lane.b32.xlu1 %v651_v47, %s5966_s30  ;;  %v847_v47 = vmul.f32 %v3858_v14, %v835_v26 }
 0x1e7   : > { %783 = vrot.lane.b32.xlu0 %v777_v46, %s5925_s14  ;;  %v773_v46 = vsel %vm772_vm9, %v3835_v19, %v3787_v59  ;;  %v813_v19 = vmul.f32 %v808_v17, %v801_v27  ;;  %v987_v27 = vmul.f32 %v3877_v42, %v975_v35  ;;  %v941_v17 = vmul.f32 %v3813_v7, %v3943_v32 }
 0x1e8   : > { %v778_v15 = vmul.f32 %v773_v46, %v766_v22  ;;  %v871_v22 = vmul.f32 %v3805_v0, %v3943_v32  ;;  %v878_v46 = vsel %vm877_vm12, %v3865_v20, %v3807_v3 }
 0x1e9   : > { %704 = vrot.lane.b32.xlu1 %v697_v2, %s5921_s26  ;;  %s5929_s26 = smov 110   ;;  %v905_v2 = vmul.f32 %v3809_v5, %v3934_v11 }
 0x1eb   : > { %818 = vrot.lane.b32.xlu0 %v812_v44, %s5927_s28  ;;  %v836_v44 = vmul.f32 %v3799_v62, %v3943_v32  ;;  %v917_v26 = vmul.f32 %v3869_v25, %v905_v2  ;;  %v913_v2 = vsel %vm912_vm13, %v3869_v25, %v3811_v6 }
 0x1ed   : > { %750 = vrot.lane.b32.xlu1 %v743_v54, %s5923_s29  ;;  %s5931_s29 = smov 109   ;;  %v843_v54 = vsel %vm842_vm11, %v3858_v14, %v3803_v63  ;;  %v883_v14 = vmul.f32 %v878_v46, %v871_v22  ;;  %v983_v22 = vsel %vm5989_vm15, %v3877_v42, %v3819_v40  ;;  %v1114_v46 = vmul.f32 %v3867_v21, %v3934_v11 }
 0x1ee   : > { %v848_v28 = vmul.f32 %v843_v54, %v836_v44  ;;  %v1044_v44 = vmul.f32 %v3833_v18, %v3934_v11  ;;  %vm5994_vm15 = vcmask 1022976  }
 0x1ef   : > { %853 = vrot.lane.b32.xlu0 %v847_v47, %s5929_s26  ;;  %v952_v47 = vmul.f32 %v3873_v49, %v940_v45  ;;  %v976_v45 = vmul.f32 %v3817_v13, %v3943_v32 }
 0x1f0   : > { %v1056_v54 = vmul.f32 %v3885_v8, %v1044_v44  ;;  %v6137_v44 = vld [vmem:[#allocation33_spill] sm:$0xff] }
 0x1f1   : > { %785 = vrot.lane.b32.xlu1 %v778_v15, %s5925_s14  ;;  %s5933_s14 = smov 108   ;;  %v906_v15 = vmul.f32 %v3809_v5, %v3943_v32 }
 0x1f3   : > { %888 = vrot.lane.b32.xlu0 %v882_v30, %s5931_s29  ;;  %v1010_v30 = vmul.f32 %v3823_v38, %v3934_v11  ;;  %v918_v20 = vmul.f32 %v913_v2, %v906_v15  ;;  %v1045_v15 = vmul.f32 %v3833_v18, %v3943_v32 }
 0x1f5   : > { %820 = vrot.lane.b32.xlu1 %v813_v19, %s5927_s28  ;;  %s5935_s28 = smov 96   ;;  %v1021_v19 = vmul.f32 %v3881_v41, %v1010_v30  ;;  %v6135_v30 = vld [vmem:[#allocation29_spill] sm:$0xff] }
 0x1f6   : > { %v1149_v2 = vmul.f32 %v6135_v30, %v3934_v11 }
 0x1f7   : > { %923 = vrot.lane.b32.xlu0 %v917_v26, %s5933_s14  ;;  %v948_v26 = vsel %vm5993_vm14, %v3873_v49, %v3815_v9  ;;  %v988_v49 = vmul.f32 %v983_v22, %v976_v45  ;;  %v6138_v45 = vld [vmem:[#allocation27_spill] sm:$0xff]  ;;  %v6139_v22 = vld [vmem:[#allocation34_spill] sm:$0xff]  ;;  %vm5997_vm14 = vcmask 916480  }
 0x1f8   : > { %v953_v25 = vmul.f32 %v948_v26, %v941_v17  ;;  %v1161_v26 = vmul.f32 %v6137_v44, %v1149_v2  ;;  %v6143_v2 = vld [vmem:[#allocation32_spill] sm:$0xff] }
 0x1f9   : > { %855 = vrot.lane.b32.xlu1 %v848_v28, %s5929_s26  ;;  %s5937_s26 = smov 95   ;;  %v1079_v28 = vmul.f32 %v3849_v52, %v3934_v11 }
 0x1fb   : > { %958 = vrot.lane.b32.xlu0 %v952_v47, %s5935_s28  ;;  %v1011_v47 = vmul.f32 %v3823_v38, %v3943_v32  ;;  %v1091_v35 = vmul.f32 %v3889_v37, %v1079_v28  ;;  %v1115_v28 = vmul.f32 %v3867_v21, %v3943_v32 }
 0x1fd   : > { %890 = vrot.lane.b32.xlu1 %v883_v14, %s5931_s29  ;;  %s5939_s29 = smov 94   ;;  %v1017_v14 = vsel %vm538_vm4, %v3881_v41, %v3827_v12 }
 0x1fe   : > { %v1022_v42 = vmul.f32 %v1017_v14, %v1011_v47  ;;  %v6140_v47 = vld [vmem:[#allocation31_spill] sm:$0xff] }
 0x1ff   : > { %993 = vrot.lane.b32.xlu0 %v987_v27, %s5937_s26  ;;  %v1126_v27 = vmul.f32 %v3893_v34, %v1114_v46  ;;  %v6141_v46 = vld [vmem:[#allocation28_spill] sm:$0xff] }
 0x200   : > { %v1122_v14 = vsel %vm5945_vm3, %v3893_v34, %v6141_v46  ;;  %vm1296_vm3 = vcmask 523264  }
 0x201   : > { %925 = vrot.lane.b32.xlu1 %v918_v20, %s5933_s14  ;;  %s5964_s14 = smov 93   ;;  %v6136_v20 = vld [vmem:[#allocation24_spill] sm:$0xff] }
 0x202   : > { %v1052_v17 = vsel %vm5942_vm0, %v3885_v8, %v6136_v20  ;;  %vm5947_vm0 = vcmask 416768  }
 0x203   : > { %1027 = vrot.lane.b32.xlu0 %v1021_v19, %s5939_s29  ;;  %v1057_v41 = vmul.f32 %v1052_v17, %v1045_v15  ;;  %v1080_v19 = vmul.f32 %v3849_v52, %v3943_v32  ;;  %v6142_v15 = vld [vmem:[#allocation36_spill] sm:$0xff]  ;;  %v1289_v17 = vmul.f32 %v6143_v2, %v3934_v11 }
 0x205   : > { %960 = vrot.lane.b32.xlu1 %v953_v25, %s5935_s28  ;;  %s5943_s28 = smov 92   ;;  %v1184_v25 = vmul.f32 %v3883_v10, %v3934_v11 }
 0x207   : > { %1062 = vrot.lane.b32.xlu0 %v1056_v54, %s5964_s14  ;;  %v1087_v54 = vsel %vm5941_vm2, %v3889_v37, %v6138_v45  ;;  %vm5946_vm2 = vcmask 400384   ;;  %v1127_v37 = vmul.f32 %v1122_v14, %v1115_v28  ;;  %v6146_v28 = vld [vmem:[#allocation35_spill] sm:$0xff] }
 0x208   : > { %v1092_v8 = vmul.f32 %v1087_v54, %v1080_v19  ;;  %v6145_v54 = vld [vmem:[#allocation38_spill] sm:$0xff]  ;;  %v6147_v14 = vld [vmem:[#allocation39_spill] sm:$0xff] }
 0x209   : > { %995 = vrot.lane.b32.xlu1 %v988_v49, %s5937_s26  ;;  %s5960_s26 = smov 80   ;;  %v1196_v49 = vmul.f32 %v6139_v22, %v1184_v25  ;;  %v585_v25 = vmul.f32 %v3970_v43, %v3938_v29 }
 0x20b   : > { %1097 = vrot.lane.b32.xlu0 %v1091_v35, %s5943_s28  ;;  %v1219_v35 = vmul.f32 %v6140_v47, %v3934_v11  ;;  %v606_v43 = vmul.f32 %v3754_v48, %v585_v25  ;;  %v677_v48 = vmul.f32 %v3766_v53, %v3938_v29 }
 0x20d   : > { %1029 = vrot.lane.b32.xlu1 %v1022_v42, %s5939_s29  ;;  %s5958_s29 = smov 79   ;;  %v1150_v42 = vmul.f32 %v6135_v30, %v3943_v32 }
 0x20f   : > { %1132 = vrot.lane.b32.xlu0 %v1126_v27, %s5960_s26  ;;  %v1231_v27 = vmul.f32 %v6142_v15, %v1219_v35  ;;  %v1290_v35 = vmul.f32 %v6143_v2, %v3943_v32 }
 0x211   : > { %1064 = vrot.lane.b32.xlu1 %v1057_v41, %s5964_s14  ;;  %v6144_v41 = vld [vmem:[#allocation30_spill] sm:$0xff]  ;;  %s6176_s14 = smov 3  }
 0x212   : > { %v1157_v19 = vsel %vm5946_vm2, %v6137_v44, %v6144_v41  ;;  %v1227_v44 = vsel %vm5947_vm0, %v6142_v15, %v6146_v28  ;;  %vm5979_vm2 = vcmask 531456   ;;  %vm5978_vm0 = vcmask 547840  }
 0x213   : > { %1167 = vrot.lane.b32.xlu0 %v1161_v26, %s5958_s29  ;;  %v1162_v34 = vmul.f32 %v1157_v19, %v1150_v42  ;;  %v1220_v26 = vmul.f32 %v6140_v47, %v3943_v32  ;;  %v631_v42 = vmul.f32 %v3759_v50, %v3938_v29  ;;  %v1394_v50 = vmul.f32 %v3917_v23, %v3943_v32 }
 0x215   : > { %1099 = vrot.lane.b32.xlu1 %v1092_v8, %s5943_s28  ;;  %s5956_s28 = smov 77   ;;  %v1301_v8 = vmul.f32 %v6145_v54, %v1289_v17  ;;  %v6148_v17 = vld [vmem:[#allocation42_spill] sm:$0xff] }
 0x216   : > { %v1331_v19 = vsel %vm5979_vm2, %v3923_v4, %v6148_v17  ;;  %v698_v4 = vmul.f32 %v3770_v55, %v677_v48  ;;  %v767_v55 = vmul.f32 %v3783_v58, %v3938_v29  ;;  %v907_v48 = vmul.f32 %v3809_v5, %v3938_v29  ;;  %v4259_v5 = vld [vmem:[%s5790_s1 + $0x2] ss:$8 sm:$0x3] }
 0x217   : > { %1202 = vrot.lane.b32.xlu0 %v1196_v49, %s5950_s20  ;;  %v1232_v49 = vmul.f32 %v1227_v44, %v1220_v26  ;;  %v4180_v26 = vpop.permute.xlu1 %1398  ;;  %s6151_s20 = smov 61   ;;  %vm5987_vm2 = vcmask 424960  }
 0x219   : > { %1134 = vrot.lane.b32.xlu1 %v1127_v37, %s5960_s26  ;;  %v1297_v37 = vsel %vm1296_vm3, %v6145_v54, %v6147_v14  ;;  %v723_v54 = vmul.f32 %v3774_v56, %v3938_v29  ;;  %s6155_s26 = smov 112  }
 0x21a   : > { %v1302_v15 = vmul.f32 %v1297_v37, %v1290_v35  ;;  %v802_v37 = vmul.f32 %v3791_v60, %v3938_v29  ;;  %v2999_v60 = vld [vmem:[%s5790_s1 + $0x1] ss:$8 sm:$0x3] }
 0x21b   : > { %1237 = vrot.lane.b32.xlu0 %v1231_v27, %s5956_s28  ;;  %v1324_v27 = vmul.f32 %v3899_v31, %v3943_v32  ;;  %v4199_v35 = vpop.permute.xlu1 %1433 }
 0x21c   : > { %v814_v58 = vmul.f32 %v3795_v61, %v802_v37 }
 0x21d   : > { %1169 = vrot.lane.b32.xlu1 %v1162_v34, %s5958_s29  ;;  %v652_v34 = vmul.f32 %v3762_v51, %v631_v42  ;;  %v1336_v25 = vmul.f32 %v1331_v19, %v1324_v27  ;;  %v1401_v51 = vsel %vm5978_vm0, %v3929_v33, %v4180_v26  ;;  %v779_v33 = vmul.f32 %v3787_v59, %v767_v55  ;;  %v4221_v59 = vld [vmem:[%s6156_s8] sm:$0xf]  ;;  %s6160_s29 = smov 110   ;;  %s6181_s8 = smov 4  }
 0x21e   : > { %v1406_v53 = vmul.f32 %v1401_v51, %v1394_v50  ;;  %vm5981_vm0 = vcmask 408576  }
 0x21f   : > { %1307 = vrot.lane.b32.xlu0 %v1301_v8, %s5954_s13  ;;  %v6149_v8 = vld [vmem:[#allocation40_spill] sm:$0xff] }
 0x220   : > { %v1430_v44 = vmul.f32 %v6149_v8, %v3938_v29 }
 0x221   : > { %1239 = vrot.lane.b32.xlu1 %v1232_v49, %s5956_s28  ;;  %v744_v49 = vmul.f32 %v3779_v57, %v723_v54  ;;  %v4210_v57 = vld [vmem:[%s6153_s6] sm:$0xf]  ;;  %s6158_s28 = smov 111   ;;  %s6180_s6 = smov 92  }
 0x222   : > { %v1441_v56 = vmul.f32 %v4199_v35, %v1430_v44  ;;  %6154 = vst [vmem:[#allocation29_spill] sm:$0xff] %v4210_v57 }
 0x223   : > { %614 = vrot.lane.b32.xlu0 %v606_v43, %s5948_s23  ;;  %s6150_s23 = smov 125   ;;  %v837_v43 = vmul.f32 %v3799_v62, %v3938_v29  ;;  %v872_v62 = vmul.f32 %v3805_v0, %v3938_v29  ;;  %v6164_v0 = vmov 2  }
 0x225   : > { %1309 = vrot.lane.b32.xlu1 %v1302_v15, %s5954_s13  ;;  %s5962_s13 = smov 60   ;;  %v849_v61 = vmul.f32 %v3803_v63, %v837_v43  ;;  %v6159_v15 = vld [vmem:[#allocation19_spill] sm:$0xff]  ;;  %v6163_v63 = vld [vmem:[#allocation20_spill] sm:$0xff]  ;;  %v6177_v43 = vmov 4  }
 0x226   : > { %v4234_v27 = vrot.slane %v2999_v60, %v6159_v15  ;;  %v4245_v50 = vrot.slane %v2999_v60, %v6163_v63 }
 0x227   : > { %660 = vrot.lane.b32.xlu0 %v652_v34, %s5966_s30  ;;  %v884_v34 = vmul.f32 %v3807_v3, %v872_v62 }
 0x229   : > { %1343 = vrot.lane.b32.xlu1 %v1336_v25, %s5952_s19  ;;  %s6152_s19 = smov 124   ;;  %v919_v25 = vmul.f32 %v3811_v6, %v907_v48  ;;  %v977_v6 = vmul.f32 %v3817_v13, %v3938_v29  ;;  %v4283_v13 = vld [vmem:[%s5790_s1 + $0x3] ss:$8 sm:$0x3] }
 0x22b   : > { %706 = vrot.lane.b32.xlu0 %v698_v4, %s6150_s23  ;;  %v942_v4 = vmul.f32 %v3813_v7, %v3938_v29  ;;  %v4268_v7 = vrot.slane %v4259_v5, %v6163_v63  ;;  %v989_v44 = vmul.f32 %v3819_v40, %v977_v6  ;;  %v1046_v40 = vmul.f32 %v3833_v18, %v3938_v29  ;;  %v4310_v18 = vld [vmem:[%s5790_s1 + $0x4] ss:$8 sm:$0x3] }
 0x22c   : > { %v4324_v62 = vrot.slane %v4310_v18, %v6163_v63 }
 0x22d   : > { %1413 = vrot.lane.b32.xlu1 %v1406_v53, %s6151_s20  ;;  %v954_v54 = vmul.f32 %v3815_v9, %v942_v4  ;;  %6168 = vst [vmem:[#allocation34_spill] sm:$0xff] %v4268_v7  ;;  %v1012_v9 = vmul.f32 %v3823_v38, %v3938_v29  ;;  %v4295_v38 = vrot.slane %v4283_v13, %v6163_v63  ;;  %v6183_v4 = vmov 5  }
 0x22f   : > { %752 = vrot.lane.b32.xlu0 %v744_v49, %s6152_s19  ;;  %v6172_v49 = vmov 3  }
 0x231   : > { %1449 = vrot.lane.b32.xlu1 %v1441_v56, %s5962_s13  ;;  %s6171_s13 = smov 2   ;;  %v1023_v56 = vmul.f32 %v3827_v12, %v1012_v9  ;;  %v1081_v12 = vmul.f32 %v3849_v52, %v3938_v29  ;;  %v1116_v52 = vmul.f32 %v3867_v21, %v3938_v29  ;;  %v4339_v21 = vld [vmem:[%s5790_s1] ss:$8 sm:$0x3] }
 0x232   : > { %v4351_v6 = vrot.slane %v4339_v21, %v6163_v63  ;;  %v6229_v63 = vld [vmem:[#allocation44_spill] sm:$0xff] }
 0x233   : > { %787 = vrot.lane.b32.xlu0 %v779_v33, %s6155_s26  ;;  %v1128_v48 = vmul.f32 %v6141_v46, %v1116_v52 }
 0x234   : > { %6185 = vst [vmem:[#allocation30_spill] sm:$0xff] %v4351_v6 }
 0x235   : > { %1482 = vrot.lane.b32.xlu1 %v4210_v57, %s5966_s30  ;;  %s6167_s30 = smov 108   ;;  %v6219_v57 = vmov 14  }
 0x237   : > { %v4226_v42 = vpop.permute.xlu1 %1272  ;;  %822 = vrot.lane.b32.xlu0 %v814_v58, %s6158_s28  ;;  %v1058_v58 = vmul.f32 %v6136_v20, %v1046_v40  ;;  %v1093_v20 = vmul.f32 %v6138_v45, %v1081_v12  ;;  %v1325_v12 = vmul.f32 %v3899_v31, %v3938_v29 }
 0x238   : > { %6157 = vst [vmem:[#allocation24_spill] sm:$0xff] %v4226_v42 }
 0x239   : > { %1673 = vperm.xlu1 %3161, %v4221_v59   ;;  %v1337_v52 = vmul.f32 %v6148_v17, %v1325_v12  ;;  %v1429_v12 = vmul.f32 %v6149_v8, %v3943_v32 }
 0x23b   : > { %857 = vrot.lane.b32.xlu0 %v849_v61, %s6160_s29  ;;  %v4237_v19 = vpop.permute.xlu1 %1341 }
 0x23c   : > { %6161 = vst [vmem:[#allocation33_spill] sm:$0xff] %v4237_v19 }
 0x23d   : > { %1713 = vrot.lane.b32.xlu1 %v4234_v27, %s6162_s0 }
 0x23e   : > { %3162 = vset.pattern.permute.xlu1 %v6164_v0  ;;  %v6223_v0 = vmov 16  }
 0x23f   : > { %892 = vrot.lane.b32.xlu0 %v884_v34, %s6165_s2  ;;  %v4254_v3 = vpop.permute.xlu1 %1376 }
 0x240   : > { %6166 = vst [vmem:[#allocation27_spill] sm:$0xff] %v4254_v3 }
 0x241   : > { %1715 = vrot.lane.b32.xlu1 %v4245_v50, %s6162_s0 }
 0x243   : > { %927 = vrot.lane.b32.xlu0 %v919_v25, %s6167_s30  ;;  %v4271_v51 = vpop.permute.xlu1 %1411  ;;  %v1151_v25 = vmul.f32 %v6135_v30, %v3938_v29  ;;  %v1221_v30 = vmul.f32 %v6140_v47, %v3938_v29  ;;  %v6188_v47 = vmov 6  }
 0x244   : > { %6170 = vst [vmem:[#allocation31_spill] sm:$0xff] %v4271_v51 }
 0x245   : > { %1741 = vperm.xlu1 %3162, %v4221_v59   ;;  %v1163_v46 = vmul.f32 %v6144_v41, %v1151_v25  ;;  %v1291_v41 = vmul.f32 %v6143_v2, %v3938_v29  ;;  %v1395_v2 = vmul.f32 %v3917_v23, %v3938_v29  ;;  %v1185_v23 = vmul.f32 %v3883_v10, %v3943_v32 }
 0x246   : > { %v1192_v29 = vsel %vm5981_vm0, %v6139_v22, %v3887_v39  ;;  %v1262_v10 = vsel %vm5987_vm2, %v3907_v16, %v3911_v36  ;;  %vm5985_vm0 = vcmask 539648   ;;  %vm5996_vm2 = vcmask 1031168  }
 0x247   : > { %962 = vrot.lane.b32.xlu0 %v954_v54, %s6169_s3  ;;  %v4297_v33 = vpop.permute.xlu1 %1206 }
 0x248   : > { %6174 = vst [vmem:[#allocation28_spill] sm:$0xff] %v4297_v33  ;;  %v6232_v33 = vld [vmem:[#allocation21_spill] sm:$0xff] }
 0x249   : > { %v4273_v53 = vpop.permute.xlu0 %610  ;;  %1758 = vrot.lane.b32.xlu1 %v4268_v7, %s6171_s13 }
 0x24a   : > { %3163 = vset.pattern.permute.xlu1 %v6172_v49  ;;  %v6231_v49 = vmov 18  }
 0x24b   : > { %997 = vrot.lane.b32.xlu0 %v989_v44, %s6173_s5  ;;  %v4314_v60 = vpop.permute.xlu1 %1276 }
 0x24c   : > { %6179 = vst [vmem:[#allocation36_spill] sm:$0xff] %v4314_v60  ;;  %v6228_v60 = vld [vmem:[#allocation23_spill] sm:$0xff] }
 0x24d   : > { %v4287_v55 = vpop.permute.xlu0 %656  ;;  %1784 = vperm.xlu1 %3163, %v4221_v59  }
 0x24f   : > { %1031 = vrot.lane.b32.xlu0 %v1023_v56, %s6175_s4  ;;  %v4334_v45 = vpop.permute.xlu1 %1380  ;;  %v1233_v56 = vmul.f32 %v6146_v28, %v1221_v30 }
 0x250   : > { %6182 = vst [vmem:[#allocation32_spill] sm:$0xff] %v4334_v45 }
 0x251   : > { %v4300_v37 = vpop.permute.xlu0 %702  ;;  %1801 = vrot.lane.b32.xlu1 %v4295_v38, %s6176_s14 }
 0x252   : > { %3164 = vset.pattern.permute.xlu1 %v6177_v43  ;;  %v6221_v43 = vmov 15  }
 0x253   : > { %1066 = vrot.lane.b32.xlu0 %v1058_v58, %s6178_s22  ;;  %v4354_v44 = vpop.permute.xlu1 %612  ;;  %v1303_v58 = vmul.f32 %v6147_v14, %v1291_v41  ;;  %v6192_v14 = vmov 7   ;;  %v6197_v41 = vld [vmem:[#allocation37_spill] sm:$0xff] }
 0x255   : > { %v4316_v61 = vpop.permute.xlu0 %748  ;;  %1827 = vperm.xlu1 %3164, %v4221_v59  }
 0x257   : > { %1101 = vrot.lane.b32.xlu0 %v1093_v20, %s6180_s6  ;;  %v4371_v28 = vpop.permute.xlu1 %658  ;;  %s6220_s6 = smov 36  }
 0x259   : > { %v4327_v34 = vpop.permute.xlu0 %783  ;;  %1844 = vrot.lane.b32.xlu1 %v4324_v62, %s6181_s8 }
 0x25a   : > { %3165 = vset.pattern.permute.xlu1 %v6183_v4 }
 0x25b   : > { %1136 = vrot.lane.b32.xlu0 %v1128_v48, %s6184_s21  ;;  %v4383_v31 = vpop.permute.xlu1 %704  ;;  %v1407_v48 = vmul.f32 %v4180_v26, %v1395_v2  ;;  %v1255_v26 = vmul.f32 %v3905_v24, %v3943_v32  ;;  %v1359_v24 = vmul.f32 %v6197_v41, %v3943_v32  ;;  %v4453_v41 = vrot.slane %v4259_v5, %v6159_v15  ;;  %s6209_s21 = smov 32  }
 0x25c   : > { %v4475_v5 = vrot.slane %v4310_v18, %v6159_v15 }
 0x25d   : > { %v4343_v54 = vpop.permute.xlu0 %818  ;;  %1869 = vperm.xlu1 %3165, %v4221_v59   ;;  %v1267_v22 = vmul.f32 %v1262_v10, %v1255_v26 }
 0x25f   : > { %1171 = vrot.lane.b32.xlu0 %v1163_v46, %s6186_s24  ;;  %v1197_v46 = vmul.f32 %v1192_v29, %v1185_v23  ;;  %v4404_v30 = vpop.permute.xlu1 %750  ;;  %s6202_s24 = smov 62   ;;  %v6203_v23 = vld [vmem:[#allocation45_spill] sm:$0xff] }
 0x260   : > { %v1435_v29 = vsel %vm530_vm1, %v6203_v23, %v4199_v35  ;;  %v6206_v35 = vmov 10  }
 0x261   : > { %v4356_v9 = vpop.permute.xlu0 %853  ;;  %1877 = vrot.lane.b32.xlu1 %v4351_v6, %s6187_s16 }
 0x262   : > { %3166 = vset.pattern.permute.xlu1 %v6188_v47 }
 0x263   : > { %1241 = vrot.lane.b32.xlu0 %v1233_v56, %s6189_s12  ;;  %v6195_v56 = vmov 8   ;;  %s6198_s12 = smov 76   ;;  %v4417_v36 = vpop.permute.xlu1 %785 }
 0x265   : > { %v4365_v40 = vpop.permute.xlu0 %888  ;;  %1902 = vperm.xlu1 %3166, %v4221_v59  }
 0x267   : > { %1311 = vrot.lane.b32.xlu0 %v1303_v58, %s6190_s15  ;;  %v6199_v58 = vld [vmem:[#allocation41_spill] sm:$0xff]  ;;  %v4435_v32 = vpop.permute.xlu1 %820 }
 0x268   : > { %v1366_v16 = vsel %vm5985_vm0, %v6199_v58, %v3931_v1  ;;  %v1428_v1 = vmul.f32 %v6149_v8, %v3934_v11  ;;  %vm5992_vm0 = vcmask 1039360  }
 0x269   : > { %v4376_v20 = vpop.permute.xlu0 %923  ;;  %1910 = vrot.lane.b32.xlu1 %v4245_v50, %s6191_s25 }
 0x26a   : > { %3167 = vset.pattern.permute.xlu1 %v6192_v14  ;;  %v1439_v10 = vmul.f32 %v6203_v23, %v1428_v1 }
 0x26b   : > { %1345 = vrot.lane.b32.xlu0 %v1337_v52, %s6193_s18  ;;  %s6194_s18 = smov 18   ;;  %v1371_v52 = vmul.f32 %v1366_v16, %v1359_v24  ;;  %v4445_v11 = vpop.permute.xlu1 %855  ;;  %v6210_v16 = vmov 11  }
 0x26d   : > { %v4386_v25 = vpop.permute.xlu0 %958  ;;  %1935 = vperm.xlu1 %3167, %v4221_v59  }
 0x26f   : > { %1415 = vrot.lane.b32.xlu0 %v1407_v48, %s6151_s20  ;;  %s6196_s20 = smov 78   ;;  %v6201_v48 = vmov 9   ;;  %v4459_v58 = vpop.permute.xlu1 %890 }
 0x271   : > { %v4395_v17 = vpop.permute.xlu0 %993  ;;  %1943 = vrot.lane.b32.xlu1 %v4268_v7, %s6194_s18 }
 0x272   : > { %3168 = vset.pattern.permute.xlu1 %v6195_v56 }
 0x273   : > { %1204 = vrot.lane.b32.xlu0 %v1197_v46, %s6196_s20  ;;  %s6200_s20 = smov 19   ;;  %v1440_v46 = vmul.f32 %v1435_v29, %v1429_v12  ;;  %v4466_v12 = vrot.slane %v4283_v13, %v6159_v15  ;;  %v6214_v13 = vmov 12   ;;  %v4488_v29 = vrot.slane %v4339_v21, %v6159_v15 }
 0x275   : > { %v4408_v39 = vpop.permute.xlu0 %1027  ;;  %1968 = vperm.xlu1 %3168, %v4221_v59   ;;  %6215 = vst [vmem:[#allocation40_spill] sm:$0xff] %v4488_v29 }
 0x277   : > { %1274 = vrot.lane.b32.xlu0 %v1267_v22, %s6198_s12  ;;  %s6204_s12 = smov 60  }
 0x279   : > { %v4421_v2 = vpop.permute.xlu0 %1062  ;;  %1976 = vrot.lane.b32.xlu1 %v4295_v38, %s6200_s20 }
 0x27a   : > { %3169 = vset.pattern.permute.xlu1 %v6201_v48  ;;  %v4477_v48 = vpop.permute.xlu1 %925 }
 0x27b   : > { %1378 = vrot.lane.b32.xlu0 %v1371_v52, %s6202_s24  ;;  %s6205_s24 = smov 20  }
 0x27d   : > { %v4432_v26 = vpop.permute.xlu0 %1097  ;;  %2001 = vperm.xlu1 %3169, %v4221_v59  }
 0x27e   : > { %v4491_v18 = vpop.permute.xlu1 %960 }
 0x27f   : > { %1447 = vrot.lane.b32.xlu0 %v1440_v46, %s6204_s12 }
 0x281   : > { %v4439_v22 = vpop.permute.xlu0 %1132  ;;  %2009 = vrot.lane.b32.xlu1 %v4324_v62, %s6205_s24 }
 0x282   : > { %3170 = vset.pattern.permute.xlu1 %v6206_v35  ;;  %v4500_v35 = vpop.permute.xlu1 %995 }
 0x283   : > { %1445 = vrot.lane.b32.xlu0 %v1439_v10, %s6204_s12  ;;  %s6213_s12 = smov 33   ;;  %v6217_v10 = vmov 13  }
 0x285   : > { %v4447_v8 = vpop.permute.xlu0 %1167  ;;  %2034 = vperm.xlu1 %3170, %v4221_v59  }
 0x286   : > { %6207 = vst [vmem:[#allocation38_spill] sm:$0xff] %v4447_v8 }
 0x287   : > { %1698 = vperm.xlu0 %3160, %v4221_v59  }
 0x289   : > { %v4455_v24 = vpop.permute.xlu0 %1202  ;;  %2042 = vrot.lane.b32.xlu1 %v4351_v6, %s6209_s21 }
 0x28a   : > { %6208 = vst [vmem:[#allocation35_spill] sm:$0xff] %v4455_v24  ;;  %3171 = vset.pattern.permute.xlu1 %v6210_v16 }
 0x28b   : > { %1756 = vrot.lane.b32.xlu0 %v4453_v41, %s6171_s13 }
 0x28d   : > { %v4468_v52 = vpop.permute.xlu0 %1237  ;;  %2067 = vperm.xlu1 %3171, %v4221_v59  }
 0x28e   : > { %6211 = vst [vmem:[#allocation39_spill] sm:$0xff] %v4468_v52  ;;  %v558_v52 = vmul.f32 %v6228_v60, %v6229_v63 }
 0x28f   : > { %1799 = vrot.lane.b32.xlu0 %v4466_v12, %s6176_s14  ;;  %s6216_s14 = smov 34  }
 0x291   : > { %v4479_v23 = vpop.permute.xlu0 %1307  ;;  %2075 = vrot.lane.b32.xlu1 %v4245_v50, %s6213_s12 }
 0x292   : > { %6212 = vst [vmem:[#allocation42_spill] sm:$0xff] %v4479_v23  ;;  %3172 = vset.pattern.permute.xlu1 %v6214_v13  ;;  %v4509_v13 = vpop.permute.xlu1 %1029  ;;  %v6227_v23 = vld [vmem:[#allocation43_spill] sm:$0xff] }
 0x293   : > { %1842 = vrot.lane.b32.xlu0 %v4475_v5, %s6181_s8  ;;  %s6218_s8 = smov 35   ;;  %v557_v42 = vmul.f32 %v6228_v60, %v6227_v23  ;;  %v6233_v60 = vld [vmem:[#allocation22_spill] sm:$0xff] }
 0x294   : > { %v571_v24 = vmul.f32 %v6233_v60, %v558_v52 }
 0x295   : > { %v615_v1 = vpop.permute.xlu0 %614  ;;  %2100 = vperm.xlu1 %3172, %v4221_v59   ;;  %v570_v63 = vmul.f32 %v6232_v33, %v557_v42  ;;  %v709_v42 = vsel %vm5994_vm15, %v4300_v37, %v4383_v31  ;;  %v6235_v37 = vmov 19  }
 0x296   : > { %v4519_v4 = vpop.permute.xlu1 %1064  ;;  %v618_v23 = vsel %vm5992_vm0, %v4354_v44, %v615_v1 }
 0x297   : > { %1875 = vrot.lane.b32.xlu0 %v4488_v29, %s6187_s16 }
 0x299   : > { %v661_v46 = vpop.permute.xlu0 %660  ;;  %2108 = vrot.lane.b32.xlu1 %v4268_v7, %s6216_s14 }
 0x29a   : > { %3173 = vset.pattern.permute.xlu1 %v6217_v10  ;;  %v4531_v14 = vpop.permute.xlu1 %1099 }
 0x29b   : > { %1908 = vrot.lane.b32.xlu0 %v4234_v27, %s6191_s25 }
 0x29d   : > { %v707_v21 = vpop.permute.xlu0 %706  ;;  %2133 = vperm.xlu1 %3173, %v4221_v59  }
 0x29e   : > { %v710_v33 = vsel %vm5994_vm15, %v4383_v31, %v707_v21  ;;  %vm5999_vm15 = vcmask 908288   ;;  %v790_v31 = vsel %vm5997_vm14, %v4327_v34, %v4417_v36 }
 0x29f   : > { %1941 = vrot.lane.b32.xlu0 %v4453_v41, %s6194_s18 }
 0x2a1   : > { %v4505_v16 = vpop.permute.xlu0 %752  ;;  %2141 = vrot.lane.b32.xlu1 %v4295_v38, %s6218_s8 }
 0x2a2   : > { %3174 = vset.pattern.permute.xlu1 %v6219_v57 }
 0x2a3   : > { %1974 = vrot.lane.b32.xlu0 %v4466_v12, %s6200_s20  ;;  %s6222_s20 = smov 48  }
 0x2a5   : > { %v4514_v10 = vpop.permute.xlu0 %787  ;;  %2166 = vperm.xlu1 %3174, %v4221_v59  }
 0x2a7   : > { %2007 = vrot.lane.b32.xlu0 %v4475_v5, %s6205_s24  ;;  %s6230_s24 = smov 50  }
 0x2a9   : > { %v4521_v56 = vpop.permute.xlu0 %822  ;;  %2174 = vrot.lane.b32.xlu1 %v4324_v62, %s6220_s6 }
 0x2aa   : > { %3175 = vset.pattern.permute.xlu1 %v6221_v43  ;;  %v4542_v43 = vpop.permute.xlu1 %1134  ;;  %v826_v34 = vsel %vm5999_vm15, %v4435_v32, %v4521_v56 }
 0x2ab   : > { %2040 = vrot.lane.b32.xlu0 %v4488_v29, %s6209_s21 }
 0x2ad   : > { %v4528_v57 = vpop.permute.xlu0 %857  ;;  %2199 = vperm.xlu1 %3175, %v4221_v59  }
 0x2ae   : > { %v4553_v19 = vpop.permute.xlu1 %1169 }
 0x2af   : > { %2073 = vrot.lane.b32.xlu0 %v4234_v27, %s6213_s12  ;;  %6224 = vst [vmem:[#allocation37_spill] sm:$0xff] %v4553_v19 }
 0x2b1   : > { %v4535_v51 = vpop.permute.xlu0 %892  ;;  %2207 = vrot.lane.b32.xlu1 %v4351_v6, %s6222_s20 }
 0x2b2   : > { %3176 = vset.pattern.permute.xlu1 %v6223_v0  ;;  %v6225_v0 = vmov 17   ;;  %v4563_v15 = vpop.permute.xlu1 %1239 }
 0x2b3   : > { %2106 = vrot.lane.b32.xlu0 %v4453_v41, %s6216_s14  ;;  %6226 = vst [vmem:[#allocation41_spill] sm:$0xff] %v4563_v15  ;;  %v617_v15 = vsel %vm5992_vm0, %v4273_v53, %v4354_v44  ;;  %v664_v53 = vsel %vm5996_vm2, %v4371_v28, %v661_v46  ;;  %vm5995_vm0 = vcmask 1014784   ;;  %v622_v44 = vadd.f32 %v618_v23, %v571_v24 }
 0x2b4   : > { %v621_v19 = vadd.f32 %v617_v15, %v570_v63  ;;  %v755_v15 = vsel %vm5995_vm0, %v4316_v61, %v4404_v30  ;;  %v791_v61 = vsel %vm5997_vm14, %v4417_v36, %v4514_v10  ;;  %v825_v23 = vsel %vm5999_vm15, %v4343_v54, %v4435_v32 }
 0x2b5   : > { %v4544_v45 = vpop.permute.xlu0 %927  ;;  %2232 = vperm.xlu1 %3176, %v4221_v59   ;;  %vm6001_vm14 = vcmask 883712   ;;  %vm6002_vm15 = vcmask 777216  }
 0x2b7   : > { %2139 = vrot.lane.b32.xlu0 %v4466_v12, %s6218_s8  ;;  %s6238_s8 = smov 65  }
 0x2b9   : > { %v4549_v3 = vpop.permute.xlu0 %962  ;;  %2240 = vrot.lane.b32.xlu1 %v4245_v50, %s6109_s17 }
 0x2ba   : > { %3177 = vset.pattern.permute.xlu1 %v6225_v0 }
 0x2bb   : > { %2172 = vrot.lane.b32.xlu0 %v4475_v5, %s6220_s6  ;;  %s6236_s6 = smov 52  }
 0x2bd   : > { %v4558_v47 = vpop.permute.xlu0 %997  ;;  %2265 = vperm.xlu1 %3177, %v4221_v59  }
 0x2bf   : > { %2205 = vrot.lane.b32.xlu0 %v4488_v29, %s6222_s20  ;;  %s6240_s20 = smov 66  }
 0x2c1   : > { %v4569_v0 = vpop.permute.xlu0 %1031  ;;  %2273 = vrot.lane.b32.xlu1 %v4268_v7, %s6230_s24  ;;  %v4589_v7 = vpop.permute.xlu1 %1309 }
 0x2c2   : > { %3178 = vset.pattern.permute.xlu1 %v6231_v49  ;;  %v663_v49 = vsel %vm5996_vm2, %v4287_v55, %v4371_v28  ;;  %v668_v55 = vadd.f32 %v664_v53, %v622_v44  ;;  %v756_v28 = vsel %vm5995_vm0, %v4404_v30, %v4505_v16  ;;  %vm5998_vm0 = vcmask 900096  }
 0x2c3   : > { %2238 = vrot.lane.b32.xlu0 %v4234_v27, %s6109_s17  ;;  %v667_v52 = vadd.f32 %v663_v49, %v621_v19  ;;  %s6234_s17 = smov 51   ;;  %vm6000_vm2 = vcmask 891904   ;;  %v860_v36 = vsel %vm5998_vm0, %v4356_v9, %v4445_v11  ;;  %v861_v10 = vsel %vm5998_vm0, %v4445_v11, %v4528_v57 }
 0x2c4   : > { %v714_v19 = vadd.f32 %v710_v33, %v668_v55  ;;  %v895_v56 = vsel %vm6000_vm2, %v4365_v40, %v4459_v58  ;;  %v896_v9 = vsel %vm6000_vm2, %v4459_v58, %v4535_v51  ;;  %v6237_v44 = vmov 20  }
 0x2c5   : > { %v4583_v8 = vpop.permute.xlu0 %1066  ;;  %2298 = vperm.xlu1 %3178, %v4221_v59   ;;  %v713_v24 = vadd.f32 %v709_v42, %v667_v52  ;;  %v4616_v46 = vpop.permute.xlu1 %1343  ;;  %vm6004_vm0 = vcmask 785408   ;;  %v930_v42 = vsel %vm6001_vm14, %v4376_v20, %v4477_v48  ;;  %v931_v40 = vsel %vm6001_vm14, %v4477_v48, %v4544_v45 }
 0x2c6   : > { %v760_v30 = vadd.f32 %v756_v28, %v714_v19  ;;  %v965_v58 = vsel %vm6004_vm0, %v4386_v25, %v4491_v18  ;;  %v966_v55 = vsel %vm6004_vm0, %v4491_v18, %v4549_v3  ;;  %vm6003_vm2 = vcmask 769024  }
 0x2c7   : > { %2271 = vrot.lane.b32.xlu0 %v4453_v41, %s6230_s24  ;;  %v759_v21 = vadd.f32 %v755_v15, %v713_v24  ;;  %v1000_v45 = vsel %vm6002_vm15, %v4395_v17, %v4500_v35  ;;  %v1001_v25 = vsel %vm6002_vm15, %v4500_v35, %v4558_v47  ;;  %vm6011_vm14 = vcmask 760832   ;;  %s6336_s24 = smov 92  }
 0x2c8   : > { %v795_v60 = vadd.f32 %v791_v61, %v760_v30  ;;  %v1035_v17 = vsel %vm6003_vm2, %v4509_v13, %v4569_v0  ;;  %v6239_v18 = vmov 21   ;;  %vm6006_vm15 = vcmask 752640  }
 0x2c9   : > { %v4600_v1 = vpop.permute.xlu0 %1101  ;;  %2306 = vrot.lane.b32.xlu1 %v4295_v38, %s6234_s17  ;;  %v794_v63 = vadd.f32 %v790_v31, %v759_v21  ;;  %v4643_v32 = vpop.permute.xlu1 %1413  ;;  %v1069_v35 = vsel %vm6011_vm14, %v4421_v2, %v4519_v4  ;;  %vm6007_vm0 = vcmask 646144  }
 0x2ca   : > { %3179 = vset.pattern.permute.xlu1 %v6235_v37  ;;  %v830_v54 = vadd.f32 %v826_v34, %v795_v60  ;;  %v1105_v2 = vsel %vm6006_vm15, %v4531_v14, %v4600_v1  ;;  %v6241_v34 = vld [vmem:[#allocation37_spill] sm:$0xff] }
 0x2cb   : > { %2304 = vrot.lane.b32.xlu0 %v4466_v12, %s6234_s17  ;;  %v829_v49 = vadd.f32 %v825_v23, %v794_v63  ;;  %v6242_v63 = vld [vmem:[#allocation38_spill] sm:$0xff]  ;;  %s6338_s17 = smov 80  }
 0x2cc   : > { %v865_v57 = vadd.f32 %v861_v10, %v830_v54 }
 0x2cd   : > { %v4621_v16 = vpop.permute.xlu0 %1136  ;;  %2331 = vperm.xlu1 %3179, %v4221_v59   ;;  %v864_v11 = vadd.f32 %v860_v36, %v829_v49  ;;  %v4671_v48 = vpop.permute.xlu1 %1449 }
 0x2ce   : > { %v900_v52 = vadd.f32 %v896_v9, %v865_v57 }
 0x2cf   : > { %2337 = vrot.lane.b32.xlu0 %v4475_v5, %s6236_s6  ;;  %v899_v33 = vadd.f32 %v895_v56, %v864_v11  ;;  %v4736_v56 = vld [vmem:[%s5790_s1 + $0x2] ss:$8 sm:$0x3] }
 0x2d0   : > { %v935_v15 = vadd.f32 %v931_v40, %v900_v52  ;;  %v6247_v40 = vmov 3   ;;  %v6249_v52 = vld [vmem:[#allocation39_spill] sm:$0xff] }
 0x2d1   : > { %v1172_v53 = vpop.permute.xlu0 %1171  ;;  %2339 = vrot.lane.b32.xlu1 %v4324_v62, %s6236_s6  ;;  %v934_v20 = vadd.f32 %v930_v42, %v899_v33  ;;  %v4695_v19 = vpop.permute.xlu1 %1482  ;;  %v6248_v33 = vld [vmem:[#allocation41_spill] sm:$0xff]  ;;  %s6349_s6 = smov 77  }
 0x2d2   : > { %3180 = vset.pattern.permute.xlu1 %v6237_v44  ;;  %v970_v37 = vadd.f32 %v966_v55, %v935_v15  ;;  %v1175_v60 = vsel %vm6007_vm0, %v6241_v34, %v1172_v53  ;;  %v6245_v53 = vld [vmem:[#allocation35_spill] sm:$0xff]  ;;  %v6246_v44 = vld [vmem:[#allocation28_spill] sm:$0xff] }
 0x2d3   : > { %2370 = vrot.lane.b32.xlu0 %v4488_v29, %s6190_s15  ;;  %v969_v28 = vadd.f32 %v965_v58, %v934_v20  ;;  %v6250_v15 = vld [vmem:[#allocation20_spill] sm:$0xff] }
 0x2d4   : > { %v1005_v47 = vadd.f32 %v1001_v25, %v970_v37 }
 0x2d5   : > { %v4657_v51 = vpop.permute.xlu0 %1241  ;;  %2364 = vperm.xlu1 %3180, %v4221_v59   ;;  %v1004_v24 = vadd.f32 %v1000_v45, %v969_v28  ;;  %v4754_v45 = vrot.slane %v4736_v56, %v6250_v15 }
 0x2d6   : > { %v1039_v0 = vadd.f32 %v1035_v17, %v1005_v47  ;;  %v6252_v17 = vld [vmem:[#allocation24_spill] sm:$0xff]  ;;  %v6254_v47 = vmov 23  }
 0x2d7   : > { %2403 = vrot.lane.b32.xlu0 %v4234_v27, %s6238_s8  ;;  %v1034_v27 = vsel %vm6003_vm2, %v4408_v39, %v4509_v13  ;;  %v1070_v39 = vsel %vm6011_vm14, %v4519_v4, %v4583_v8  ;;  %vm6005_vm2 = vcmask 654336   ;;  %v3210_v8 = vld [vmem:[%s3562_s27] sm:$0xff]  ;;  %vm6012_vm14 = vcmask 490496  }
 0x2d8   : > { %v1038_v13 = vadd.f32 %v1034_v27, %v1004_v24  ;;  %v1074_v4 = vadd.f32 %v1070_v39, %v1039_v0  ;;  %v1139_v21 = vsel %vm6005_vm2, %v4439_v22, %v4542_v43  ;;  %v1140_v30 = vsel %vm6005_vm2, %v4542_v43, %v4621_v16  ;;  %v4728_v43 = vpop.permute.xlu1 %1673  ;;  %v6251_v27 = vld [vmem:[#allocation34_spill] sm:$0xff]  ;;  %v6253_v24 = vld [vmem:[#allocation36_spill] sm:$0xff] }
 0x2d9   : > { %v4676_v3 = vpop.permute.xlu0 %1311  ;;  %2372 = vrot.lane.b32.xlu1 %v4351_v6, %s6190_s15  ;;  %v1174_v22 = vsel %vm6007_vm0, %v6242_v63, %v6241_v34  ;;  %6243 = vst [vmem:[#allocation45_spill] sm:$0xff] %v4728_v43  ;;  %v6244_v16 = vmov 22   ;;  %vm6010_vm2 = vcmask 637952   ;;  %vm6009_vm0 = vcmask 621568   ;;  %v6255_v0 = vld [vmem:[#allocation42_spill] sm:$0xff] }
 0x2da   : > { %3181 = vset.pattern.permute.xlu1 %v6239_v18  ;;  %v1073_v61 = vadd.f32 %v1069_v35, %v1038_v13  ;;  %v1109_v1 = vadd.f32 %v1105_v2, %v1074_v4  ;;  %v3005_v13 = vld [vmem:[%s5790_s1 + $0x3] ss:$8 sm:$0x3]  ;;  %v1314_v2 = vsel %vm1296_vm3, %v4589_v7, %v4676_v3 }
 0x2db   : > { %2436 = vrot.lane.b32.xlu0 %v4453_v41, %s6240_s20  ;;  %v1104_v41 = vsel %vm6006_vm15, %v4432_v26, %v4531_v14  ;;  %v4717_v26 = vld [vmem:[%s5799_s10] sm:$0xff]  ;;  %vm6008_vm15 = vcmask 629760  }
 0x2dc   : > { %v1108_v14 = vadd.f32 %v1104_v41, %v1073_v61  ;;  %v1144_v10 = vadd.f32 %v1140_v30, %v1109_v1  ;;  %v1244_v58 = vsel %vm6008_vm15, %v6249_v52, %v6248_v33  ;;  %v1245_v55 = vsel %vm6008_vm15, %v6248_v33, %v4657_v51  ;;  %v4749_v20 = vpop.permute.xlu1 %1713  ;;  %v6256_v61 = vld [vmem:[#allocation19_spill] sm:$0xff]  ;;  %v6258_v1 = vld [vmem:[#allocation33_spill] sm:$0xff] }
 0x2dd   : > { %v4697_v31 = vpop.permute.xlu0 %1345  ;;  %2397 = vperm.xlu1 %3181, %v4221_v59   ;;  %vm1347_vm15 = vcmask 515072   ;;  %v1313_v41 = vsel %vm1296_vm3, %v6255_v0, %v4589_v7  ;;  %v4775_v4 = vrot.slane %v3005_v13, %v6256_v61  ;;  %v1641_v0 = vld [vmem:[%s5796_s7] sm:$0xf] }
 0x2de   : > { %v1143_v36 = vadd.f32 %v1139_v21, %v1108_v14  ;;  %v1179_v54 = vadd.f32 %v1175_v60, %v1144_v10  ;;  %v6257_v14 = vmov 6   ;;  %v1348_v34 = vsel %vm1347_vm15, %v6258_v1, %v4616_v46  ;;  %v6259_v60 = vld [vmem:[#allocation27_spill] sm:$0xff] }
 0x2df   : > { %2541 = vrot.lane.b32.xlu0 %v3210_v8, %s6191_s25  ;;  %v1349_v7 = vsel %vm1347_vm15, %v4616_v46, %v4697_v31  ;;  %v6261_v31 = vmov 2  }
 0x2e0   : > { %v1178_v49 = vadd.f32 %v1174_v22, %v1143_v36  ;;  %v4785_v3 = vpop.permute.xlu1 %1715  ;;  %v6260_v36 = vld [vmem:[#allocation32_spill] sm:$0xff] }
 0x2e1   : > { %v4719_v23 = vpop.permute.xlu0 %1415  ;;  %2405 = vrot.lane.b32.xlu1 %v4245_v50, %s6238_s8 }
 0x2e2   : > { %3182 = vset.pattern.permute.xlu1 %v6244_v16 }
 0x2e3   : > { %2584 = vperm.xlu0 %3160, %v4717_v26  }
 0x2e5   : > { %v1205_v50 = vpop.permute.xlu0 %1204  ;;  %2430 = vperm.xlu1 %3182, %v4221_v59  }
 0x2e6   : > { %v1209_v9 = vsel %vm6010_vm2, %v6245_v53, %v1205_v50  ;;  %v1210_v11 = vsel %vm6010_vm2, %v1205_v50, %v6246_v44  ;;  %vm6058_vm2 = vcmask 498688   ;;  %v3211_v53 = vld [vmem:[%s3562_s27 + $0x8] sm:$0xff]  ;;  %v6262_v44 = vld [vmem:[#allocation31_spill] sm:$0xff]  ;;  %s6340_s27 = smov 79  }
 0x2e7   : > { %v1213_v57 = vadd.f32 %v1209_v9, %v1178_v49  ;;  %v1214_v42 = vadd.f32 %v1210_v11, %v1179_v54  ;;  %3185 = vset.pattern.permute.xlu0 %v6247_v40  ;;  %v1419_v46 = vsel %vm6058_vm2, %v4643_v32, %v4719_v23  ;;  %v1418_v11 = vsel %vm6058_vm2, %v6262_v44, %v4643_v32 }
 0x2e8   : > { %2669 = vperm.xlu0 %3185, %v4717_v26   ;;  %vm1665_vm2 = vcmask 273408  }
 0x2e9   : > { %v1248_v25 = vadd.f32 %v1244_v58, %v1213_v57  ;;  %v1249_v28 = vadd.f32 %v1245_v55, %v1214_v42  ;;  %v1275_v37 = vpop.permute.xlu0 %1274  ;;  %2438 = vrot.lane.b32.xlu1 %v6251_v27, %s6240_s20  ;;  %v4804_v42 = vpop.permute.xlu1 %1741  ;;  %v6263_v55 = vld [vmem:[#allocation46_spill] sm:$0xff]  ;;  %s6344_s20 = smov 78  }
 0x2ea   : > { %v1279_v18 = vsel %vm6009_vm0, %v6252_v17, %v1275_v37  ;;  %v1280_v51 = vsel %vm6009_vm0, %v1275_v37, %v6253_v24  ;;  %3183 = vset.pattern.permute.xlu1 %v6254_v47  ;;  %vm6062_vm0 = vcmask 506880   ;;  %v2594_v17 = vrot.slane %v4736_v56, %v6256_v61 }
 0x2eb   : > { %v1283_v35 = vadd.f32 %v1279_v18, %v1248_v25  ;;  %v1284_v39 = vadd.f32 %v1280_v51, %v1249_v28  ;;  %v6264_v28 = vmov 7   ;;  %v6266_v47 = vmov 8  }
 0x2ec   : > { %2601 = vrot.lane.b32.xlu0 %v4754_v45, %s6162_s0  ;;  %v6268_v56 = vmov 0  }
 0x2ed   : > { %v1317_v8 = vadd.f32 %v1313_v41, %v1283_v35  ;;  %v1318_v21 = vadd.f32 %v1314_v2, %v1284_v39  ;;  %v1379_v30 = vpop.permute.xlu0 %1378  ;;  %2463 = vperm.xlu1 %3183, %v4221_v59   ;;  %3188 = vset.pattern.permute.xlu0 %v6257_v14  ;;  %v4814_v27 = vpop.permute.xlu1 %1758  ;;  %v6267_v35 = vmov 5   ;;  %v2641_v41 = vrot.slane %v3005_v13, %v6250_v15  ;;  %v3003_v2 = vld [vmem:[%s5790_s1 + $0x1] ss:$8 sm:$0x3] }
 0x2ee   : > { %v1383_v16 = vsel %vm6062_vm0, %v6259_v60, %v1379_v30  ;;  %v1384_v10 = vsel %vm6062_vm0, %v1379_v30, %v6260_v36  ;;  %v6270_v14 = vmov 24   ;;  %v4843_v13 = vrot.slane %v3003_v2, %v6250_v15 }
 0x2ef   : > { %v1352_v63 = vadd.f32 %v1348_v34, %v1317_v8  ;;  %v1353_v22 = vadd.f32 %v1349_v7, %v1318_v21  ;;  %v4838_v21 = vrot.slane %v3003_v2, %v6256_v61  ;;  %vm2549_vm0 = vcmask 1047688  }
 0x2f0   : > { %2642 = vrot.lane.b32.xlu0 %v4775_v4, %s6171_s13  ;;  %6271 = vst [vmem:[#allocation23_spill] sm:$0xff] %v4843_v13 }
 0x2f1   : > { %v1387_v49 = vadd.f32 %v1383_v16, %v1352_v63  ;;  %v1388_v54 = vadd.f32 %v1384_v10, %v1353_v22  ;;  %v1448_v50 = vpop.permute.xlu0 %1447  ;;  %2543 = vrot.lane.b32.xlu1 %v3211_v53, %s6191_s25  ;;  %v4823_v39 = vpop.permute.xlu1 %1784  ;;  %6269 = vst [vmem:[#allocation43_spill] sm:$0xff] %v4838_v21  ;;  %v6273_v10 = vld [vmem:[#allocation26_spill] sm:$0xff] }
 0x2f2   : > { %3184 = vset.pattern.permute.xlu1 %v6261_v31  ;;  %v1453_v57 = vsel %vm6012_vm14, %v1448_v50, %v4671_v48  ;;  %v6265_v48 = vmov 4  }
 0x2f3   : > { %v1423_v9 = vadd.f32 %v1419_v46, %v1388_v54  ;;  %v1422_v33 = vadd.f32 %v1418_v11, %v1387_v49  ;;  %v4869_v49 = vld [vmem:[#allocation2] sm:$0xff] }
 0x2f4   : > { %2768 = vperm.xlu0 %3188, %v4717_v26   ;;  %v2528_v46 = vld [vmem:[%s5798_s9] sm:$0xf] }
 0x2f5   : > { %v1457_v40 = vadd.f32 %v1453_v57, %v1423_v9  ;;  %v1446_v52 = vpop.permute.xlu0 %1445  ;;  %2627 = vperm.xlu1 %3184, %v4717_v26   ;;  %v4834_v8 = vpop.permute.xlu1 %1801 }
 0x2f6   : > { %v1452_v23 = vsel %vm6012_vm14, %v1446_v52, %v1448_v50  ;;  %vm1486_vm14 = vcmask 1041408  }
 0x2f7   : > { %v1456_v58 = vadd.f32 %v1452_v23, %v1422_v33  ;;  %v1465_v25 = vadd.f32 %v6263_v55, %v1457_v40 }
 0x2f8   : > { %3189 = vset.pattern.permute.xlu0 %v6264_v28 }
 0x2f9   : > { %v1464_v32 = vadd.f32 %v6263_v55, %v1456_v58  ;;  %v1467_v37 = vsub.f32 0.0, %v1465_v25  ;;  %3186 = vset.pattern.permute.xlu1 %v6265_v48  ;;  %2801 = vperm.xlu0 %3189, %v4717_v26   ;;  %v4849_v61 = vpop.permute.xlu1 %1827 }
 0x2fa   : > { %2702 = vperm.xlu1 %3186, %v4717_v26  }
 0x2fb   : > { %v1466_v18 = vsub.f32 0.0, %v1464_v32  ;;  %v1470_v24 = vmul.f32 1.442695, %v1467_v37 }
 0x2fd   : > { %v1468_v51 = vmul.f32 1.442695, %v1466_v18  ;;  %3202 = vpow2.f32 %v1470_v24  ;;  %3190 = vset.pattern.permute.xlu0 %v6266_v47  ;;  %v4855_v63 = vpop.permute.xlu1 %1844 }
 0x2fe   : > { %2599 = vrot.lane.b32.xlu1 %v2594_v17, %s6162_s0  ;;  %2834 = vperm.xlu0 %3190, %v4717_v26   ;;  %s6354_s0 = smov 76  }
 0x2ff   : > { %3204 = vpow2.f32 %v1468_v51  ;;  %3187 = vset.pattern.permute.xlu1 %v6267_v35 }
 0x301   : > { %v4863_v36 = vpop.permute.xlu1 %1869 }
 0x302   : > { %2735 = vperm.xlu1 %3187, %v4717_v26   ;;  %3191 = vset.pattern.permute.xlu0 %v6268_v56 }
 0x303   : > { %1644 = vperm.xlu0 %3191, %v1641_v0  }
 0x305   : > { %v4878_v54 = vpop.permute.xlu1 %1877 }
 0x306   : > { %2644 = vrot.lane.b32.xlu1 %v2641_v41, %s6171_s13  ;;  %s6272_s13 = smov 67  }
 0x307   : > { %v3203_v30 = vpop.eup %3202  ;;  %2743 = vrot.lane.b32.xlu0 %v2641_v41, %s6194_s18  ;;  %3192 = vset.pattern.permute.xlu1 %v6270_v14 }
 0x308   : > { %v1473_v1 = vadd.f32 1.0, %v3203_v30 }
 0x309   : > { %v3205_v34 = vpop.eup %3204  ;;  %v4885_v50 = vpop.permute.xlu1 %1902 }
 0x30a   : > { %v1472_v7 = vadd.f32 1.0, %v3205_v34  ;;  %3206 = vrcp.f32 %v1473_v1  ;;  %2675 = vrot.lane.b32.xlu1 %v4838_v21, %s6187_s16 }
 0x30b   : > { %2776 = vrot.lane.b32.xlu0 %v4843_v13, %s6209_s21 }
 0x30c   : > { %3208 = vrcp.f32 %v1472_v7 }
 0x30e   : > { %2677 = vrot.lane.b32.xlu1 %v4843_v13, %s6187_s16  ;;  %s6275_s16 = smov 68  }
 0x30f   : > { %2809 = vrot.lane.b32.xlu0 %v4754_v45, %s6213_s12 }
 0x312   : > { %2708 = vrot.lane.b32.xlu1 %v2594_v17, %s6191_s25 }
 0x313   : > { %2471 = vrot.lane.b32.xlu0 %v4295_v38, %s6272_s13  ;;  %v6274_v38 = vld [vmem:[#allocation25_spill] sm:$0xff] }
 0x314   : > { %v3207_v15 = vpop.eup %3206 }
 0x315   : > { %v1479_v22 = vmul.f32 %v3207_v15, %v1465_v25 }
 0x316   : > { %v3209_v60 = vpop.eup %3208  ;;  %2710 = vrot.lane.b32.xlu1 %v4754_v45, %s6191_s25  ;;  %v2866_v45 = vld [vmem:[%s5800_s11] sm:$0xff]  ;;  %s6369_s25 = smov 61  }
 0x317   : > { %2993 = vmatprep.subr.msk.mxu1 %vm1486_vm14, %v1479_v22  ;;  %v1478_v16 = vmul.f32 %v3209_v60, %v1464_v32  ;;  %2842 = vrot.lane.b32.xlu0 %v2641_v41, %s6216_s14 }
 0x319   : > { %2994 = vmatpush1.msk.msra.mxu1 %vm1486_vm14, %v1478_v16 }
 0x31a   : > { %2995 = vmatmul.mubr.msk.f32.vlgmr.msra.gmra.mrb[0].mxu1 %vm645_vm6, %v4695_v19  ;;  %2996 = vmatprep.subr.msk.mxu1 %vm1486_vm14, %v6273_v10  ;;  %v6276_v19 = vld [vmem:[#allocation29_spill] sm:$0xff] }
 0x31b   : > { %2997 = vmatpush1.msk.msra.mxu1 %vm1486_vm14, %v6274_v38  ;;  %1634 = vmatprep.mubr.f32.mxu1 %v4869_v49  ;;  %vm1662_vm14 = vcmask 1043728  }
 0x31c   : > { %2504 = vrot.lane.b32.xlu0 %v4324_v62, %s6275_s16  ;;  %2496 = vperm.xlu1 %3192, %v4221_v59   ;;  %v4890_v59 = vpop.permute.xlu1 %1910 }
 0x320   : > { %2869 = vperm.xlu0 %3191, %v2866_v45   ;;  %2741 = vrot.lane.b32.xlu1 %v4775_v4, %s6194_s18  ;;  %v4894_v62 = vpop.permute.xlu1 %1935  ;;  %s3385_s18 = smov [#allocation6]  }
 0x321   : > { %3193 = vset.pattern.permute.xlu1 %v6268_v56 }
 0x322   : > { %2998 = vmatmul.mubr.msk.f32.vlgmr.msra.gmra.mrb[0].mxu1 %vm645_vm6, %v6276_v19 }
 0x324   : > { %2774 = vrot.lane.b32.xlu1 %v4838_v21, %s6209_s21  ;;  %v4900_v53 = vpop.permute.xlu1 %1943 }
 0x328   : > { %2807 = vrot.lane.b32.xlu1 %v2594_v17, %s6213_s12  ;;  %v4906_v31 = vpop.permute.xlu1 %1968  ;;  %s6330_s12 = smov 127  }
 0x32c   : > { %2469 = vrot.lane.b32.xlu1 %v4466_v12, %s6272_s13  ;;  %v4908_v12 = vpop.permute.xlu0 %1698  ;;  %v4910_v9 = vpop.permute.xlu1 %1976  ;;  %s6362_s13 = smov 63  }
 0x330   : > { %2840 = vrot.lane.b32.xlu1 %v4775_v4, %s6216_s14  ;;  %v4912_v44 = vpop.permute.xlu0 %1756  ;;  %v4914_v4 = vpop.permute.xlu1 %2001 }
 0x334   : > { %2502 = vrot.lane.b32.xlu1 %v4475_v5, %s6275_s16  ;;  %v4916_v5 = vpop.permute.xlu0 %1799  ;;  %v4918_v11 = vpop.permute.xlu1 %2009  ;;  %s6367_s16 = smov 62  }
 0x338   : > { %2559 = vperm.xlu1 %3193, %v4717_v26   ;;  %v4920_v26 = vpop.permute.xlu0 %1842  ;;  %v4922_v57 = vpop.permute.xlu1 %2034 }
 0x33c   : > { %2531 = vperm.xlu1 %3193, %v2528_v46   ;;  %v4924_v40 = vpop.permute.xlu0 %1875  ;;  %v4926_v33 = vpop.permute.xlu1 %2042 }
 0x340   : > { %v4928_v52 = vpop.permute.xlu0 %1908  ;;  %v4930_v23 = vpop.permute.xlu1 %2067 }
 0x344   : > { %v4932_v58 = vpop.permute.xlu0 %1941  ;;  %v4934_v55 = vpop.permute.xlu1 %2075 }
 0x348   : > { %v4936_v25 = vpop.permute.xlu0 %1974  ;;  %v4938_v28 = vpop.permute.xlu1 %2100 }
 0x34c   : > { %v4940_v32 = vpop.permute.xlu0 %2007  ;;  %v4942_v37 = vpop.permute.xlu1 %2108 }
 0x350   : > { %v4944_v48 = vpop.permute.xlu0 %2040  ;;  %v4946_v17 = vpop.permute.xlu1 %2133 }
 0x354   : > { %v4948_v18 = vpop.permute.xlu0 %2073  ;;  %v4950_v24 = vpop.permute.xlu1 %2141 }
 0x358   : > { %v4952_v51 = vpop.permute.xlu0 %2106  ;;  %v4954_v47 = vpop.permute.xlu1 %2166 }
 0x35c   : > { %v4956_v35 = vpop.permute.xlu0 %2139  ;;  %v4958_v0 = vpop.permute.xlu1 %2174 }
 0x360   : > { %v4960_v56 = vpop.permute.xlu0 %2172  ;;  %v4962_v41 = vpop.permute.xlu1 %2199 }
 0x364   : > { %v4964_v2 = vpop.permute.xlu0 %2205  ;;  %v4966_v30 = vpop.permute.xlu1 %2207 }
 0x368   : > { %v4968_v14 = vpop.permute.xlu0 %2238  ;;  %v4970_v1 = vpop.permute.xlu1 %2232 }
 0x36c   : > { %v4972_v34 = vpop.permute.xlu0 %2271  ;;  %v4974_v7 = vpop.permute.xlu1 %2240 }
 0x370   : > { %v4976_v15 = vpop.permute.xlu0 %2304  ;;  %v4978_v22 = vpop.permute.xlu1 %2265 }
 0x371   : > { %6277 = vst [vmem:[#allocation44_spill] sm:$0xff] %v4976_v15 }
 0x374   : > { %v4980_v60 = vpop.permute.xlu0 %2337  ;;  %v4982_v16 = vpop.permute.xlu1 %2273 }
 0x375   : > { %6278 = vst [vmem:[#allocation21_spill] sm:$0xff] %v4980_v60  ;;  %6279 = vst [vmem:[#allocation22_spill] sm:$0xff] %v4982_v16 }
 0x378   : > { %v4984_v10 = vpop.permute.xlu0 %2370  ;;  %v4986_v38 = vpop.permute.xlu1 %2298 }
 0x379   : > { %6280 = vst [vmem:[#allocation37_spill] sm:$0xff] %v4984_v10  ;;  %6281 = vst [vmem:[#allocation38_spill] sm:$0xff] %v4986_v38 }
 0x37c   : > { %v4988_v45 = vpop.permute.xlu0 %2403  ;;  %v4990_v19 = vpop.permute.xlu1 %2306 }
 0x37d   : > { %6282 = vst [vmem:[#allocation35_spill] sm:$0xff] %v4988_v45  ;;  %6283 = vst [vmem:[#allocation28_spill] sm:$0xff] %v4990_v19 }
 0x380   : > { %v4992_v46 = vpop.permute.xlu0 %2436  ;;  %v4994_v13 = vpop.permute.xlu1 %2331 }
 0x381   : > { %6284 = vst [vmem:[#allocation41_spill] sm:$0xff] %v4992_v46  ;;  %6285 = vst [vmem:[#allocation39_spill] sm:$0xff] %v4994_v13 }
 0x384   : > { %v4996_v21 = vpop.permute.xlu0 %2541  ;;  %v4998_v6 = vpop.permute.xlu1 %2339 }
 0x385   : > { %6286 = vst [vmem:[#allocation20_spill] sm:$0xff] %v4998_v6 }
 0x388   : > { %v5000_v29 = vpop.permute.xlu0 %2584  ;;  %v5004_v60 = vpop.permute.xlu1 %2364 }
 0x389   : > { %6287 = vst [vmem:[#allocation34_spill] sm:$0xff] %v5000_v29  ;;  %6289 = vst [vmem:[#allocation36_spill] sm:$0xff] %v5004_v60 }
 0x38c   : > { %v5002_v43 = vpop.permute.xlu0 %2669  ;;  %v5008_v15 = vpop.permute.xlu1 %2372 }
 0x38d   : > { %6288 = vst [vmem:[#allocation24_spill] sm:$0xff] %v5002_v43  ;;  %6291 = vst [vmem:[#allocation19_spill] sm:$0xff] %v5008_v15 }
 0x390   : > { %v5006_v10 = vpop.permute.xlu0 %2601  ;;  %v5012_v19 = vpop.permute.xlu1 %2397 }
 0x391   : > { %6290 = vst [vmem:[#allocation42_spill] sm:$0xff] %v5006_v10  ;;  %6293 = vst [vmem:[#allocation27_spill] sm:$0xff] %v5012_v19 }
 0x394   : > { %v5010_v45 = vpop.permute.xlu0 %2642  ;;  %v5016_v13 = vpop.permute.xlu1 %2405 }
 0x395   : > { %6292 = vst [vmem:[#allocation33_spill] sm:$0xff] %v5010_v45  ;;  %6295 = vst [vmem:[#allocation31_spill] sm:$0xff] %v5016_v13 }
 0x398   : > { %v5014_v46 = vpop.permute.xlu0 %2768  ;;  %v5020_v6 = vpop.permute.xlu1 %2430 }
 0x399   : > { %6294 = vst [vmem:[#allocation32_spill] sm:$0xff] %v5014_v46  ;;  %6297 = vst [vmem:[#allocation26_spill] sm:$0xff] %v5020_v6 }
 0x39c   : > { %v5018_v16 = vpop.permute.xlu0 %2801  ;;  %v5024_v43 = vpop.permute.xlu1 %2438 }
 0x39d   : > { %6296 = vst [vmem:[#allocation46_spill] sm:$0xff] %v5018_v16  ;;  %6299 = vst [vmem:[#allocation29_spill] sm:$0xff] %v5024_v43 }
 0x3a0   : > { %v5022_v29 = vpop.permute.xlu0 %2834  ;;  %v5030_v19 = vpop.permute.xlu1 %2463 }
 0x3a1   : > { %6298 = vst [vmem:[#allocation25_spill] sm:$0xff] %v5022_v29  ;;  %6302 = vst [vmem:[#allocation49_spill] sm:$0xff] %v5030_v19 }
 0x3a4   : > { %v1645_v60 = vpop.permute.xlu0 %1644  ;;  %v2544_v16 = vpop.permute.xlu1 %2543 }
 0x3a8   : > { %v5036_v46 = vpop.permute.xlu1 %2627 }
 0x3a9   : > { %6303 = vst [vmem:[#allocation50_spill] sm:$0xff] %v5036_v46 }
 0x3ac   : > { %v5038_v29 = vpop.permute.xlu1 %2702 }
 0x3ad   : > { %6304 = vst [vmem:[#allocation51_spill] sm:$0xff] %v5038_v29  ;;  %v5060_v29 = vpop.permute.xlu0 %2743 }
 0x3ae   : > { %6315 = vst [vmem:[#allocation62_spill] sm:$0xff] %v5060_v29 }
 0x3b0   : > { %v5040_v43 = vpop.permute.xlu1 %2599 }
 0x3b1   : > { %6305 = vst [vmem:[#allocation52_spill] sm:$0xff] %v5040_v43 }
 0x3f5   : > { %v1636_v10 = vpop.f32.mrb[0].mxu1 }
 0x3f6   : > { %v5026_v38 = vadd.f32 %v1645_v60, %v1636_v10  ;;  %v1638_v15 = vpop.f32.mrb[1].mxu1  ;;  %v5042_v10 = vpop.permute.xlu1 %2735 }
 0x3f7   : > { %v5028_v45 = vadd.f32 %v1645_v60, %v1638_v15  ;;  %6306 = vst [vmem:[#allocation53_spill] sm:$0xff] %v5042_v10  ;;  %v5064_v10 = vpop.permute.xlu0 %2776 }
 0x3f8   : > { %6300 = vst [vmem:[#allocation47_spill] sm:$0xff] %v5026_v38  ;;  %1654 = vrot.lane.b32.xlu1 %v5026_v38, %s6216_s14  ;;  %6317 = vst [vmem:[#allocation64_spill] sm:$0xff] %v5064_v10 }
 0x3f9   : > { %6301 = vst [vmem:[#allocation48_spill] sm:$0xff] %v5028_v45  ;;  %1656 = vrot.lane.b32.xlu0 %v5028_v45, %s6216_s14  ;;  %s6331_s14 = smov 126  }
 0x3fa   : > { %v5044_v13 = vpop.permute.xlu1 %2644 }
 0x3fb   : > { %6307 = vst [vmem:[#allocation54_spill] sm:$0xff] %v5044_v13 }
 0x3fe   : > { %v5046_v15 = vpop.permute.xlu1 %2675 }
 0x3ff   : > { %6308 = vst [vmem:[#allocation55_spill] sm:$0xff] %v5046_v15  ;;  %v5068_v15 = vpop.permute.xlu0 %2809 }
 0x400   : > { %6318 = vst [vmem:[#allocation65_spill] sm:$0xff] %v5068_v15 }
 0x402   : > { %v5048_v60 = vpop.permute.xlu1 %2677 }
 0x403   : > { %6309 = vst [vmem:[#allocation56_spill] sm:$0xff] %v5048_v60 }
 0x406   : > { %v5050_v19 = vpop.permute.xlu1 %2708 }
 0x407   : > { %6310 = vst [vmem:[#allocation57_spill] sm:$0xff] %v5050_v19  ;;  %v5072_v19 = vpop.permute.xlu0 %2471 }
 0x40a   : > { %v5052_v38 = vpop.permute.xlu1 %2710 }
 0x40b   : > { %6311 = vst [vmem:[#allocation58_spill] sm:$0xff] %v5052_v38 }
 0x40e   : > { %v5054_v45 = vpop.permute.xlu1 %2496 }
 0x40f   : > { %6312 = vst [vmem:[#allocation59_spill] sm:$0xff] %v5054_v45  ;;  %v5076_v45 = vpop.permute.xlu0 %2842 }
 0x410   : > { %6321 = vst [vmem:[#allocation68_spill] sm:$0xff] %v5076_v45 }
 0x412   : > { %v5056_v6 = vpop.permute.xlu1 %2741 }
 0x413   : > { %6313 = vst [vmem:[#allocation60_spill] sm:$0xff] %v5056_v6  ;;  %v5078_v6 = vpop.permute.xlu0 %2504 }
 0x414   : > { %6322 = vst [vmem:[#allocation69_spill] sm:$0xff] %v5078_v6 }
 0x416   : > { %v5058_v46 = vpop.permute.xlu1 %2774 }
 0x417   : > { %6314 = vst [vmem:[#allocation61_spill] sm:$0xff] %v5058_v46 }
 0x41a   : > { %v5062_v43 = vpop.permute.xlu1 %2807 }
 0x41b   : > { %6316 = vst [vmem:[#allocation63_spill] sm:$0xff] %v5062_v43  ;;  %v5084_v43 = vpop.permute.xlu0 %2869 }
 0x41c   : > { %6325 = vst [vmem:[#allocation72_spill] sm:$0xff] %v5084_v43  ;;  %v5098_v43 = vsel %vm807_vm10, %v4996_v21, %v2544_v16 }
 0x41d   : > { %6328 = vst [vmem:[#allocation75_spill] sm:$0xff] %v5098_v43 }
 0x41e   : > { %v5066_v13 = vpop.permute.xlu1 %2469 }
 0x422   : > { %v5070_v60 = vpop.permute.xlu1 %2840 }
 0x423   : > { %6319 = vst [vmem:[#allocation66_spill] sm:$0xff] %v5070_v60 }
 0x426   : > { %v5074_v38 = vpop.permute.xlu1 %2502 }
 0x427   : > { %6320 = vst [vmem:[#allocation67_spill] sm:$0xff] %v5074_v38 }
 0x42a   : > { %v5080_v46 = vpop.permute.xlu1 %2559 }
 0x42b   : > { %6323 = vst [vmem:[#allocation70_spill] sm:$0xff] %v5080_v46 }
 0x42e   : > { %v5082_v29 = vpop.permute.xlu1 %2531 }
 0x42f   : > { %6324 = vst [vmem:[#allocation71_spill] sm:$0xff] %v5082_v29 }
 0x46a   : > { %v1655_v10 = vpop.permute.xlu1 %1654 }
 0x46b   : > { %1663 = vst.msk [vmem:[#allocation2] sm:$0xf] %vm1662_vm14, %v1655_v10  ;;  %v1657_v15 = vpop.permute.xlu0 %1656  ;;  %vm6343_vm14 = vcmask 408576  }
 0x46c   : > { %v1658_v60 = vsel %vm538_vm4, %v1655_v10, %v1657_v15  ;;  %1666 = vst.msk [vmem:[#allocation2 + $0x10] sm:$0xf] %vm1665_vm2, %v1657_v15  ;;  %vm6339_vm2 = vcmask 400384  }
 0x46d   : > { %1664 = vst [vmem:[#allocation2 + $0x8] sm:$0xf] %v1658_v60 }
 0x472   : > { %v5087_v38 = vld [vmem:[#allocation2] sm:$0xf] }
 0x473   : > { %6326 = vst [vmem:[#allocation73_spill] sm:$0xff] %v5087_v38  ;;  %v5089_v45 = vld [vmem:[#allocation2] sm:$0xf]  ;;  %v5092_v46 = vld [vmem:[#allocation2 + $0x10] sm:$0xf] }
 0x474   : > { %6327 = vst [vmem:[#allocation74_spill] sm:$0xff] %v5089_v45  ;;  %2536 = vst [vmem:[#allocation2] sm:$0xff] %v4869_v49  ;;  %v1701_v29 = vmul.f32 %v4908_v12, %v5089_v45  ;;  %v5101_v10 = vld [vmem:[#allocation2 + $0x8] sm:$0xf]  ;;  %v1744_v38 = vmul.f32 %v4804_v42, %v5089_v45 }
 0x475   : > { %2550 = vst.msk [vmem:[#allocation2] sm:$0xff] %vm2549_vm0, %v4996_v21  ;;  %6329 = vst [vmem:[#allocation76_spill] sm:$0xff] %v5101_v10  ;;  %v5103_v15 = vld [vmem:[#allocation2 + $0x8] sm:$0xf]  ;;  %v1717_v21 = vsel %vm599_vm5, %v4749_v20, %v4785_v3  ;;  %vm6337_vm0 = vcmask 392192  }
 0x476   : > { %2538 = vst.msk [vmem:[#allocation2 + $0x10] sm:$0xff] %vm530_vm1, %v4869_v49  ;;  %2551 = vst [vmem:[#allocation2 + $0x8] sm:$0xff] %v5098_v43  ;;  %v1721_v60 = vmul.f32 %v4749_v20, %v1701_v29  ;;  %v1702_v6 = vmul.f32 %v4908_v12, %v5103_v15  ;;  %v1745_v49 = vmul.f32 %v4804_v42, %v5103_v15 }
 0x477   : > { %2552 = vst.msk [vmem:[#allocation2 + $0x10] sm:$0xff] %vm807_vm10, %v2544_v16  ;;  %v1764_v29 = vmul.f32 %v4912_v44, %v1744_v38  ;;  %v1787_v16 = vmul.f32 %v4823_v39, %v5089_v45  ;;  %v1760_v43 = vsel %vm645_vm6, %v4912_v44, %v4814_v27  ;;  %v1830_v38 = vmul.f32 %v4849_v61, %v5089_v45 }
 0x478   : > { %1727 = vrot.lane.b32.xlu0 %v1721_v60, %s6330_s12  ;;  %v1722_v10 = vmul.f32 %v1717_v21, %v1702_v6  ;;  %v1765_v20 = vmul.f32 %v1760_v43, %v1745_v49  ;;  %v1788_v6 = vmul.f32 %v4823_v39, %v5103_v15  ;;  %v1831_v43 = vmul.f32 %v4849_v61, %v5103_v15 }
 0x479   : > { %v1807_v60 = vmul.f32 %v4916_v5, %v1787_v16  ;;  %v1850_v21 = vmul.f32 %v4920_v26, %v1830_v38  ;;  %v1872_v49 = vmul.f32 %v4863_v36, %v5089_v45  ;;  %v1873_v16 = vmul.f32 %v4863_v36, %v5103_v15 }
 0x47a   : > { %1729 = vrot.lane.b32.xlu1 %v1722_v10, %s6330_s12  ;;  %v1803_v10 = vsel %vm691_vm7, %v4916_v5, %v4834_v8  ;;  %v1906_v38 = vmul.f32 %v4885_v50, %v5103_v15  ;;  %vm6332_vm7 = vcmask 261120  }
 0x47b   : > { %v1808_v44 = vmul.f32 %v1803_v10, %v1788_v6  ;;  %v1905_v6 = vmul.f32 %v4885_v50, %v5089_v45 }
 0x47c   : > { %1770 = vrot.lane.b32.xlu0 %v1764_v29, %s6331_s14  ;;  %v1846_v29 = vsel %vm737_vm8, %v4920_v26, %v4855_v63  ;;  %vm6333_vm8 = vcmask 269312  }
 0x47d   : > { %v1851_v5 = vmul.f32 %v1846_v29, %v1831_v43  ;;  %v1916_v10 = vmul.f32 %v4928_v52, %v1905_v6  ;;  %v1912_v43 = vsel %vm807_vm10, %v4928_v52, %v4890_v59  ;;  %v1971_v29 = vmul.f32 %v4906_v31, %v5089_v45 }
 0x47e   : > { %1772 = vrot.lane.b32.xlu1 %v1765_v20, %s6331_s14  ;;  %v1883_v20 = vmul.f32 %v4924_v40, %v1872_v49  ;;  %v2004_v6 = vmul.f32 %v4914_v4, %v5089_v45 }
 0x480   : > { %1813 = vrot.lane.b32.xlu0 %v1807_v60, %s6150_s23  ;;  %v1879_v60 = vsel %vm772_vm9, %v4924_v40, %v4878_v54  ;;  %v1917_v40 = vmul.f32 %v1912_v43, %v1906_v38  ;;  %v2015_v38 = vmul.f32 %v4940_v32, %v2004_v6  ;;  %v2038_v43 = vmul.f32 %v4922_v57, %v5103_v15 }
 0x481   : > { %v1884_v26 = vmul.f32 %v1879_v60, %v1873_v16  ;;  %v1972_v16 = vmul.f32 %v4906_v31, %v5103_v15  ;;  %v1978_v60 = vsel %vm877_vm12, %v4936_v25, %v4910_v9  ;;  %vm6334_vm12 = vcmask 285696  }
 0x482   : > { %1815 = vrot.lane.b32.xlu1 %v1808_v44, %s6150_s23  ;;  %v1938_v44 = vmul.f32 %v4894_v62, %v5089_v45 }
 0x484   : > { %1856 = vrot.lane.b32.xlu0 %v1850_v21, %s6152_s19  ;;  %v1939_v21 = vmul.f32 %v4894_v62, %v5103_v15  ;;  %v1949_v49 = vmul.f32 %v4932_v58, %v1938_v44  ;;  %v2011_v44 = vsel %vm912_vm13, %v4940_v32, %v4918_v11  ;;  %vm6335_vm13 = vcmask 293888  }
 0x486   : > { %1858 = vrot.lane.b32.xlu1 %v1851_v5, %s6152_s19  ;;  %v1945_v5 = vsel %vm842_vm11, %v4932_v58, %v4900_v53  ;;  %v1983_v58 = vmul.f32 %v1978_v60, %v1972_v16  ;;  %v2077_v16 = vsel %vm6333_vm8, %v4948_v18, %v4934_v55  ;;  %v2136_v60 = vmul.f32 %v4946_v17, %v5089_v45 }
 0x487   : > { %v1950_v52 = vmul.f32 %v1945_v5, %v1939_v21  ;;  %v2070_v21 = vmul.f32 %v4930_v23, %v5089_v45  ;;  %vm6353_vm8 = vcmask 424960  }
 0x488   : > { %1889 = vrot.lane.b32.xlu0 %v1883_v20, %s6155_s26  ;;  %v1982_v20 = vmul.f32 %v4936_v25, %v1971_v29  ;;  %v2071_v29 = vmul.f32 %v4930_v23, %v5103_v15 }
 0x489   : > { %v2081_v5 = vmul.f32 %v4948_v18, %v2070_v21  ;;  %v2176_v21 = vsel %vm6335_vm13, %v4960_v56, %v4958_v0  ;;  %vm6366_vm13 = vcmask 539648  }
 0x48a   : > { %1891 = vrot.lane.b32.xlu1 %v1884_v26, %s6155_s26  ;;  %v2005_v26 = vmul.f32 %v4914_v4, %v5103_v15 }
 0x48c   : > { %1922 = vrot.lane.b32.xlu0 %v1916_v10, %s6158_s28  ;;  %v2037_v10 = vmul.f32 %v4922_v57, %v5089_v45  ;;  %v2016_v25 = vmul.f32 %v2011_v44, %v2005_v26  ;;  %v2137_v26 = vmul.f32 %v4946_v17, %v5103_v15  ;;  %v2143_v44 = vsel %vm6334_vm12, %v4956_v35, %v4950_v24 }
 0x48d   : > { %vm6361_vm12 = vcmask 531456  }
 0x48e   : > { %1924 = vrot.lane.b32.xlu1 %v1917_v40, %s6158_s28  ;;  %v2048_v40 = vmul.f32 %v4944_v48, %v2037_v10  ;;  %v2169_v10 = vmul.f32 %v4954_v47, %v5089_v45 }
 0x490   : > { %1955 = vrot.lane.b32.xlu0 %v1949_v49, %s6160_s29  ;;  %v2044_v49 = vsel %vm6332_vm7, %v4944_v48, %v4926_v33  ;;  %v2082_v48 = vmul.f32 %v2077_v16, %v2071_v29  ;;  %v2235_v29 = vmul.f32 %v4970_v1, %v5089_v45  ;;  %vm6348_vm7 = vcmask 416768  }
 0x491   : > { %v2049_v32 = vmul.f32 %v2044_v49, %v2038_v43  ;;  %v2180_v43 = vmul.f32 %v4960_v56, %v2169_v10  ;;  %v2203_v49 = vmul.f32 %v4962_v41, %v5103_v15 }
 0x492   : > { %1957 = vrot.lane.b32.xlu1 %v1950_v52, %s6160_s29  ;;  %v2103_v52 = vmul.f32 %v4938_v28, %v5089_v45  ;;  %v2246_v16 = vmul.f32 %v4968_v14, %v2235_v29  ;;  %v6351_v29 = vld [vmem:[#allocation36_spill] sm:$0xff] }
 0x494   : > { %1988 = vrot.lane.b32.xlu0 %v1982_v20, %s6165_s2  ;;  %v2104_v20 = vmul.f32 %v4938_v28, %v5103_v15  ;;  %v2114_v6 = vmul.f32 %v4952_v51, %v2103_v52  ;;  %v2236_v52 = vmul.f32 %v4970_v1, %v5103_v15 }
 0x496   : > { %1990 = vrot.lane.b32.xlu1 %v1983_v58, %s6165_s2  ;;  %v2110_v58 = vsel %vm538_vm4, %v4952_v51, %v4942_v37  ;;  %v2148_v51 = vmul.f32 %v2143_v44, %v2137_v26  ;;  %v6342_v26 = vld [vmem:[#allocation22_spill] sm:$0xff]  ;;  %v6345_v44 = vld [vmem:[#allocation44_spill] sm:$0xff] }
 0x497   : > { %v2115_v18 = vmul.f32 %v2110_v58, %v2104_v20  ;;  %v2242_v20 = vsel %vm6339_vm2, %v4968_v14, %v4974_v7  ;;  %v6341_v58 = vld [vmem:[#allocation38_spill] sm:$0xff]  ;;  %vm6402_vm2 = vcmask 1014784  }
 0x498   : > { %2021 = vrot.lane.b32.xlu0 %v2015_v38, %s6167_s30  ;;  %v2147_v38 = vmul.f32 %v4956_v35, %v2136_v60  ;;  %v2302_v10 = vmul.f32 %v6341_v58, %v5103_v15 }
 0x49a   : > { %2023 = vrot.lane.b32.xlu1 %v2016_v25, %s6167_s30  ;;  %v2170_v25 = vmul.f32 %v4954_v47, %v5103_v15 }
 0x49c   : > { %2054 = vrot.lane.b32.xlu0 %v2048_v40, %s6169_s3  ;;  %v2202_v40 = vmul.f32 %v4962_v41, %v5089_v45  ;;  %v2181_v35 = vmul.f32 %v2176_v21, %v2170_v25  ;;  %v6346_v25 = vld [vmem:[#allocation39_spill] sm:$0xff] }
 0x49e   : > { %2056 = vrot.lane.b32.xlu1 %v2049_v32, %s6169_s3  ;;  %v2213_v32 = vmul.f32 %v4964_v2, %v2202_v40  ;;  %v6347_v40 = vld [vmem:[#allocation28_spill] sm:$0xff] }
 0x49f   : > { %v2308_v21 = vsel %vm6348_vm7, %v6345_v44, %v6347_v40  ;;  %vm6406_vm7 = vcmask 908288  }
 0x4a0   : > { %2087 = vrot.lane.b32.xlu0 %v2081_v5, %s6173_s5  ;;  %v2209_v5 = vsel %vm6337_vm0, %v4964_v2, %v4966_v30  ;;  %v2247_v2 = vmul.f32 %v2242_v20, %v2236_v52  ;;  %v6355_v20 = vld [vmem:[#allocation37_spill] sm:$0xff]  ;;  %vm6368_vm0 = vcmask 547840  }
 0x4a1   : > { %v2214_v56 = vmul.f32 %v2209_v5, %v2203_v49  ;;  %v6350_v49 = vld [vmem:[#allocation21_spill] sm:$0xff]  ;;  %v2367_v5 = vmul.f32 %v6351_v29, %v5089_v45 }
 0x4a2   : > { %2089 = vrot.lane.b32.xlu1 %v2082_v48, %s6173_s5  ;;  %v2268_v48 = vmul.f32 %v4978_v22, %v5089_v45 }
 0x4a4   : > { %2120 = vrot.lane.b32.xlu0 %v2114_v6, %s6175_s4  ;;  %v2269_v6 = vmul.f32 %v4978_v22, %v5103_v15  ;;  %v2279_v60 = vmul.f32 %v4972_v34, %v2268_v48  ;;  %v2368_v48 = vmul.f32 %v6351_v29, %v5103_v15 }
 0x4a6   : > { %2122 = vrot.lane.b32.xlu1 %v2115_v18, %s6175_s4  ;;  %v2301_v18 = vmul.f32 %v6341_v58, %v5089_v45 }
 0x4a8   : > { %2153 = vrot.lane.b32.xlu0 %v2147_v38, %s6178_s22  ;;  %v2275_v38 = vsel %vm6343_vm14, %v4972_v34, %v6342_v26  ;;  %v2313_v34 = vmul.f32 %v2308_v21, %v2302_v10  ;;  %vm6405_vm14 = vcmask 916480  }
 0x4a9   : > { %v2280_v14 = vmul.f32 %v2275_v38, %v2269_v6  ;;  %v6356_v6 = vld [vmem:[#allocation27_spill] sm:$0xff] }
 0x4aa   : > { %2155 = vrot.lane.b32.xlu1 %v2148_v51, %s6178_s22  ;;  %v2312_v51 = vmul.f32 %v6345_v44, %v2301_v18  ;;  %v6357_v18 = vld [vmem:[#allocation19_spill] sm:$0xff]  ;;  %v2401_v10 = vmul.f32 %v6356_v6, %v5103_v15 }
 0x4ab   : > { %v2374_v38 = vsel %vm1296_vm3, %v6355_v20, %v6357_v18  ;;  %v6358_v44 = vld [vmem:[#allocation35_spill] sm:$0xff] }
 0x4ac   : > { %2186 = vrot.lane.b32.xlu0 %v2180_v43, %s6336_s24  ;;  %v2334_v43 = vmul.f32 %v6346_v25, %v5089_v45 }
 0x4ae   : > { %2188 = vrot.lane.b32.xlu1 %v2181_v35, %s6336_s24  ;;  %v2335_v35 = vmul.f32 %v6346_v25, %v5103_v15 }
 0x4b0   : > { %2219 = vrot.lane.b32.xlu0 %v2213_v32, %s6338_s17  ;;  %v2345_v32 = vmul.f32 %v6350_v49, %v2334_v43  ;;  %v6359_v43 = vld [vmem:[#allocation26_spill] sm:$0xff] }
 0x4b1   : > { %v2433_v21 = vmul.f32 %v6359_v43, %v5089_v45 }
 0x4b2   : > { %2221 = vrot.lane.b32.xlu1 %v2214_v56, %s6338_s17  ;;  %v6352_v56 = vld [vmem:[#allocation20_spill] sm:$0xff] }
 0x4b3   : > { %v2341_v52 = vsel %vm6353_vm8, %v6350_v49, %v6352_v56  ;;  %vm6409_vm8 = vcmask 891904  }
 0x4b4   : > { %2252 = vrot.lane.b32.xlu0 %v2246_v16, %s6340_s27  ;;  %v2346_v16 = vmul.f32 %v2341_v52, %v2335_v35 }
 0x4b6   : > { %2254 = vrot.lane.b32.xlu1 %v2247_v2, %s6340_s27  ;;  %v2378_v2 = vmul.f32 %v6355_v20, %v2367_v5  ;;  %v6363_v5 = vld [vmem:[#allocation41_spill] sm:$0xff] }
 0x4b7   : > { %v2444_v52 = vmul.f32 %v6363_v5, %v2433_v21  ;;  %v6365_v20 = vld [vmem:[#allocation29_spill] sm:$0xff] }
 0x4b8   : > { %2285 = vrot.lane.b32.xlu0 %v2279_v60, %s6344_s20  ;;  %v2400_v60 = vmul.f32 %v6356_v6, %v5089_v45 }
 0x4ba   : > { %2287 = vrot.lane.b32.xlu1 %v2280_v14, %s6344_s20  ;;  %v2379_v14 = vmul.f32 %v2374_v38, %v2368_v48 }
 0x4bc   : > { %2318 = vrot.lane.b32.xlu0 %v2312_v51, %s6349_s6  ;;  %v2411_v51 = vmul.f32 %v6358_v44, %v2400_v60 }
 0x4be   : > { %2320 = vrot.lane.b32.xlu1 %v2313_v34, %s6349_s6  ;;  %v6360_v34 = vld [vmem:[#allocation31_spill] sm:$0xff] }
 0x4bf   : > { %v2407_v35 = vsel %vm6361_vm12, %v6358_v44, %v6360_v34  ;;  %v1703_v44 = vmul.f32 %v4908_v12, %v5092_v46  ;;  %v6371_v12 = vld [vmem:[#allocation33_spill] sm:$0xff]  ;;  %vm6410_vm12 = vcmask 883712  }
 0x4c0   : > { %2351 = vrot.lane.b32.xlu0 %v2345_v32, %s6354_s0  ;;  %v2412_v49 = vmul.f32 %v2407_v35, %v2401_v10  ;;  %v2434_v32 = vmul.f32 %v6359_v43, %v5103_v15  ;;  %v6370_v35 = vld [vmem:[#allocation50_spill] sm:$0xff] }
 0x4c2   : > { %2353 = vrot.lane.b32.xlu1 %v2346_v16, %s6354_s0  ;;  %v6364_v16 = vld [vmem:[#allocation49_spill] sm:$0xff] }
 0x4c3   : > { %v2466_v48 = vmul.f32 %v6364_v16, %v5089_v45  ;;  %v2467_v38 = vmul.f32 %v6364_v16, %v5103_v15  ;;  %v6393_v45 = vld [vmem:[#allocation53_spill] sm:$0xff] }
 0x4c4   : > { %2384 = vrot.lane.b32.xlu0 %v2378_v2, %s6190_s15  ;;  %v2440_v2 = vsel %vm6366_vm13, %v6363_v5, %v6365_v20  ;;  %v1746_v5 = vmul.f32 %v4804_v42, %v5092_v46  ;;  %v6374_v42 = vld [vmem:[#allocation32_spill] sm:$0xff]  ;;  %vm6411_vm13 = vcmask 785408  }
 0x4c5   : > { %v2445_v60 = vmul.f32 %v2440_v2, %v2434_v32  ;;  %v2477_v10 = vmul.f32 %v5066_v13, %v2466_v48  ;;  %v1723_v32 = vmul.f32 %v4785_v3, %v1703_v44  ;;  %v6372_v48 = vld [vmem:[#allocation51_spill] sm:$0xff]  ;;  %v6373_v3 = vld [vmem:[#allocation57_spill] sm:$0xff] }
 0x4c6   : > { %2386 = vrot.lane.b32.xlu1 %v2379_v14, %s6190_s15  ;;  %v5330_v14 = vld [vmem:[#allocation2] sm:$0xff]  ;;  %v1766_v2 = vmul.f32 %v4814_v27, %v1746_v5  ;;  %v6375_v27 = vld [vmem:[#allocation61_spill] sm:$0xff]  ;;  %v1874_v5 = vmul.f32 %v4863_v36, %v5092_v46 }
 0x4c8   : > { %2417 = vrot.lane.b32.xlu0 %v2411_v51, %s6362_s13  ;;  %v2473_v51 = vsel %vm6368_vm0, %v5066_v13, %v5072_v19  ;;  %v2705_v13 = vmul.f32 %v6372_v48, %v5330_v14  ;;  %vm6412_vm0 = vcmask 777216  }
 0x4c9   : > { %v2478_v21 = vmul.f32 %v2473_v51, %v2467_v38  ;;  %v1832_v51 = vmul.f32 %v4849_v61, %v5092_v46  ;;  %v6378_v61 = vld [vmem:[#allocation25_spill] sm:$0xff] }
 0x4ca   : > { %2419 = vrot.lane.b32.xlu1 %v2412_v49, %s6362_s13  ;;  %v2630_v49 = vmul.f32 %v6370_v35, %v5330_v14  ;;  %v2716_v38 = vmul.f32 %v6373_v3, %v2705_v13  ;;  %v2837_v13 = vmul.f32 %v6378_v61, %v5330_v14 }
 0x4cc   : > { %2450 = vrot.lane.b32.xlu0 %v2444_v52, %s6367_s16  ;;  %v2650_v52 = vmul.f32 %v6371_v12, %v2630_v49 }
 0x4ce   : > { %2452 = vrot.lane.b32.xlu1 %v2445_v60, %s6367_s16  ;;  %v1789_v60 = vmul.f32 %v4823_v39, %v5092_v46  ;;  %v6376_v39 = vld [vmem:[#allocation46_spill] sm:$0xff] }
 0x4cf   : > { %v2804_v49 = vmul.f32 %v6376_v39, %v5330_v14 }
 0x4d0   : > { %2483 = vrot.lane.b32.xlu0 %v2477_v10, %s6369_s25  ;;  %v2771_v10 = vmul.f32 %v6374_v42, %v5330_v14  ;;  %v1809_v44 = vmul.f32 %v4834_v8, %v1789_v60  ;;  %v6377_v8 = vld [vmem:[#allocation63_spill] sm:$0xff]  ;;  %v1885_v60 = vmul.f32 %v4878_v54, %v1874_v5  ;;  %v6380_v54 = vld [vmem:[#allocation54_spill] sm:$0xff]  ;;  %v1973_v5 = vmul.f32 %v4906_v31, %v5092_v46 }
 0x4d2   : > { %2485 = vrot.lane.b32.xlu1 %v2478_v21, %s6369_s25  ;;  %v2782_v21 = vmul.f32 %v6375_v27, %v2771_v10  ;;  %v6390_v27 = vld [vmem:[#allocation55_spill] sm:$0xff] }
 0x4d4   : > { %1731 = vrot.lane.b32.xlu0 %v1723_v32, %s6330_s12  ;;  %v1852_v32 = vmul.f32 %v4855_v63, %v1832_v51  ;;  %v6379_v63 = vld [vmem:[#allocation66_spill] sm:$0xff]  ;;  %v1940_v51 = vmul.f32 %v4894_v62, %v5092_v46 }
 0x4d5   : > { %v2848_v36 = vmul.f32 %v6379_v63, %v2837_v13  ;;  %v6381_v62 = vld [vmem:[#allocation58_spill] sm:$0xff]  ;;  %v6386_v63 = vld [vmem:[#allocation75_spill] sm:$0xff] }
 0x4d6   : > { %2656 = vrot.lane.b32.xlu1 %v2650_v52, %s6331_s14  ;;  %v2815_v52 = vmul.f32 %v6377_v8, %v2804_v49  ;;  %v6388_v8 = vld [vmem:[#allocation24_spill] sm:$0xff]  ;;  %v2739_v3 = vmul.f32 %v6393_v45, %v6386_v63 }
 0x4d8   : > { %1774 = vrot.lane.b32.xlu0 %v1766_v2, %s6331_s14  ;;  %v5374_v2 = vld [vmem:[#allocation2 + $0x10] sm:$0xff] }
 0x4d9   : > { %v2632_v10 = vmul.f32 %v6370_v35, %v5374_v2  ;;  %v2773_v13 = vmul.f32 %v6374_v42, %v5374_v2 }
 0x4da   : > { %2722 = vrot.lane.b32.xlu1 %v2716_v38, %s6158_s28  ;;  %v1907_v38 = vmul.f32 %v4885_v50, %v5092_v46  ;;  %v2707_v50 = vmul.f32 %v6372_v48, %v5374_v2  ;;  %v6395_v48 = vld [vmem:[#allocation60_spill] sm:$0xff] }
 0x4dc   : > { %1817 = vrot.lane.b32.xlu0 %v1809_v44, %s6150_s23  ;;  %v1918_v44 = vmul.f32 %v4890_v59, %v1907_v38  ;;  %v1984_v38 = vmul.f32 %v4910_v9, %v1973_v5  ;;  %v2039_v9 = vmul.f32 %v4922_v57, %v5092_v46  ;;  %v6384_v5 = vld [vmem:[#allocation42_spill] sm:$0xff]  ;;  %v2072_v57 = vmul.f32 %v4930_v23, %v5092_v46 }
 0x4dd   : > { %v2105_v23 = vmul.f32 %v4938_v28, %v5092_v46 }
 0x4de   : > { %2788 = vrot.lane.b32.xlu1 %v2782_v21, %s6169_s3  ;;  %v2652_v21 = vmul.f32 %v6380_v54, %v2632_v10  ;;  %v2839_v54 = vmul.f32 %v6378_v61, %v5374_v2 }
 0x4df   : > { %v2116_v28 = vmul.f32 %v4942_v37, %v2105_v23 }
 0x4e0   : > { %1860 = vrot.lane.b32.xlu0 %v1852_v32, %s6152_s19  ;;  %v1951_v32 = vmul.f32 %v4900_v53, %v1940_v51  ;;  %v2006_v53 = vmul.f32 %v4914_v4, %v5092_v46 }
 0x4e2   : > { %2821 = vrot.lane.b32.xlu1 %v2815_v52, %s6173_s5  ;;  %v2718_v52 = vmul.f32 %v6381_v62, %v2707_v50  ;;  %v6383_v50 = vld [vmem:[#allocation65_spill] sm:$0xff]  ;;  %v6394_v62 = vld [vmem:[#allocation62_spill] sm:$0xff] }
 0x4e4   : > { %1893 = vrot.lane.b32.xlu0 %v1885_v60, %s6155_s26 }
 0x4e6   : > { %2854 = vrot.lane.b32.xlu1 %v2848_v36, %s6175_s4  ;;  %v6382_v36 = vld [vmem:[#allocation64_spill] sm:$0xff] }
 0x4e7   : > { %v2784_v10 = vmul.f32 %v6382_v36, %v2773_v13  ;;  %v6391_v36 = vld [vmem:[#allocation73_spill] sm:$0xff] }
 0x4e8   : > { %1926 = vrot.lane.b32.xlu0 %v1918_v44, %s6158_s28  ;;  %v2806_v44 = vmul.f32 %v6376_v39, %v5374_v2  ;;  %v6389_v39 = vld [vmem:[#allocation56_spill] sm:$0xff] }
 0x4ea   : > { %2660 = vrot.lane.b32.xlu1 %v2652_v21, %s6331_s14  ;;  %v1728_v49 = vpop.permute.xlu0 %1727  ;;  %v2017_v21 = vmul.f32 %v4918_v11, %v2006_v53  ;;  %v6387_v11 = vld [vmem:[#allocation34_spill] sm:$0xff] }
 0x4eb   : > { %v2588_v53 = vmul.f32 %v6387_v11, %v6386_v63 }
 0x4ec   : > { %1959 = vrot.lane.b32.xlu0 %v1951_v32, %s6160_s29  ;;  %v5397_v59 = vpop.permute.xlu1 %1729  ;;  %v2817_v32 = vmul.f32 %v6383_v50, %v2806_v44  ;;  %v2673_v50 = vmul.f32 %v6388_v8, %v6386_v63 }
 0x4ee   : > { %2726 = vrot.lane.b32.xlu1 %v2718_v52, %s6158_s28  ;;  %v1771_v60 = vpop.permute.xlu0 %1770  ;;  %v6385_v52 = vld [vmem:[#allocation52_spill] sm:$0xff] }
 0x4ef   : > { %v2603_v13 = vsel %vm599_vm5, %v6385_v52, %v6384_v5  ;;  %vm6396_vm5 = vcmask 1039360  }
 0x4f0   : > { %1992 = vrot.lane.b32.xlu0 %v1984_v38, %s6165_s2  ;;  %v5407_v31 = vpop.permute.xlu1 %1772  ;;  %v2608_v44 = vmul.f32 %v2603_v13, %v2588_v53  ;;  %s6490_s2 = sld [smem:[#allocation84_spill]] }
 0x4f2   : > { %2792 = vrot.lane.b32.xlu1 %v2784_v10, %s6169_s3  ;;  %v1814_v51 = vpop.permute.xlu0 %1813  ;;  %v2050_v10 = vmul.f32 %v4926_v33, %v2039_v9  ;;  %v2083_v9 = vmul.f32 %v4934_v55, %v2072_v57  ;;  %v1733_v57 = vsel %vm6396_vm5, %v1728_v49, %v5397_v59  ;;  %vm6413_vm5 = vcmask 769024  }
 0x4f4   : > { %2025 = vrot.lane.b32.xlu0 %v2017_v21, %s6167_s30  ;;  %v5417_v4 = vpop.permute.xlu1 %1815 }
 0x4f6   : > { %2825 = vrot.lane.b32.xlu1 %v2817_v32, %s6173_s5  ;;  %v1857_v38 = vpop.permute.xlu0 %1856  ;;  %v2679_v32 = vsel %vm772_vm9, %v6390_v27, %v6389_v39  ;;  %vm6398_vm9 = vcmask 1031168  }
 0x4f7   : > { %v2684_v53 = vmul.f32 %v2679_v32, %v2673_v50 }
 0x4f8   : > { %2058 = vrot.lane.b32.xlu0 %v2050_v10, %s6169_s3  ;;  %v5430_v21 = vpop.permute.xlu1 %1858  ;;  %v6392_v10 = vld [vmem:[#allocation45_spill] sm:$0xff] }
 0x4f9   : > { %v1676_v42 = vmul.f32 %v6392_v10, %v6391_v36  ;;  %v2138_v36 = vmul.f32 %v4946_v17, %v5092_v46 }
 0x4fa   : > { %2615 = vrot.lane.b32.xlu1 %v2608_v44, %s6330_s12  ;;  %v1890_v33 = vpop.permute.xlu0 %1889  ;;  %v2745_v44 = vsel %vm842_vm11, %v6395_v48, %v6394_v62  ;;  %vm6399_vm11 = vcmask 1022976  }
 0x4fb   : > { %v2750_v12 = vmul.f32 %v2745_v44, %v2739_v3  ;;  %v2149_v23 = vmul.f32 %v4950_v24, %v2138_v36  ;;  %v1819_v49 = vsel %vm6399_vm11, %v1814_v51, %v5417_v4  ;;  %v6400_v44 = vld [vmem:[#allocation68_spill] sm:$0xff]  ;;  %v2204_v51 = vmul.f32 %v4962_v41, %v5092_v46 }
 0x4fc   : > { %2091 = vrot.lane.b32.xlu0 %v2083_v9, %s6173_s5  ;;  %v5444_v13 = vpop.permute.xlu1 %1891  ;;  %v6397_v9 = vld [vmem:[#allocation40_spill] sm:$0xff]  ;;  %vm6415_vm11 = vcmask 752640  }
 0x4fd   : > { %v1689_v50 = vmul.f32 %v6397_v9, %v1676_v42  ;;  %v2171_v42 = vmul.f32 %v4954_v47, %v5092_v46  ;;  %v2850_v9 = vmul.f32 %v6400_v44, %v2839_v54  ;;  %v1895_v54 = vsel %vm6405_vm14, %v1890_v33, %v5444_v13 }
 0x4fe   : > { %2691 = vrot.lane.b32.xlu1 %v2684_v53, %s6155_s26  ;;  %v1923_v55 = vpop.permute.xlu0 %1922  ;;  %v1776_v53 = vsel %vm6398_vm9, %v1771_v60, %v5407_v31  ;;  %v6401_v60 = vld [vmem:[#allocation59_spill] sm:$0xff]  ;;  %vm6414_vm9 = vcmask 760832   ;;  %vm6417_vm14 = vcmask 646144  }
 0x4ff   : > { %v1737_v37 = vadd.f32 %v1733_v57, %v1689_v50  ;;  %v2500_v57 = vmul.f32 %v6401_v60, %v5103_v15  ;;  %v2182_v36 = vmul.f32 %v4958_v0, %v2171_v42  ;;  %v6403_v50 = vld [vmem:[#allocation69_spill] sm:$0xff]  ;;  %v2215_v42 = vmul.f32 %v4966_v30, %v2204_v51 }
 0x500   : > { %2124 = vrot.lane.b32.xlu0 %v2116_v28, %s6175_s4  ;;  %v5459_v32 = vpop.permute.xlu1 %1924  ;;  %v2270_v30 = vmul.f32 %v4978_v22, %v5092_v46 }
 0x501   : > { %v1780_v28 = vadd.f32 %v1776_v53, %v1737_v37  ;;  %v6404_v53 = vld [vmem:[#allocation67_spill] sm:$0xff] }
 0x502   : > { %2757 = vrot.lane.b32.xlu1 %v2750_v12, %s6160_s29  ;;  %v1956_v17 = vpop.permute.xlu0 %1955  ;;  %v1862_v12 = vsel %vm6402_vm2, %v1857_v38, %v5430_v21  ;;  %v2506_v37 = vsel %vm530_vm1, %v6404_v53, %v6403_v50  ;;  %vm6408_vm1 = vcmask 900096   ;;  %vm6416_vm2 = vcmask 654336  }
 0x503   : > { %v1823_v24 = vadd.f32 %v1819_v49, %v1780_v28  ;;  %v1928_v49 = vsel %vm6406_vm7, %v1923_v55, %v5459_v32  ;;  %v2237_v28 = vmul.f32 %v4970_v1, %v5092_v46  ;;  %vm6418_vm7 = vcmask 637952  }
 0x504   : > { %2157 = vrot.lane.b32.xlu0 %v2149_v23, %s6178_s22  ;;  %v5472_v3 = vpop.permute.xlu1 %1957  ;;  %v2511_v23 = vmul.f32 %v2506_v37, %v2500_v57  ;;  %s6407_s22 = smov 60  }
 0x505   : > { %v1866_v15 = vadd.f32 %v1862_v12, %v1823_v24  ;;  %v1961_v33 = vsel %vm6408_vm1, %v1956_v17, %v5472_v3  ;;  %vm6419_vm1 = vcmask 629760  }
 0x506   : > { %2858 = vrot.lane.b32.xlu1 %v2850_v9, %s6175_s4  ;;  %v1989_v47 = vpop.permute.xlu0 %1988 }
 0x507   : > { %v1899_v0 = vadd.f32 %v1895_v54, %v1866_v15  ;;  %v2281_v15 = vmul.f32 %v6342_v26, %v2270_v30 }
 0x508   : > { %2190 = vrot.lane.b32.xlu0 %v2182_v36, %s6336_s24  ;;  %v5489_v38 = vpop.permute.xlu1 %1990  ;;  %v2248_v36 = vmul.f32 %v4974_v7, %v2237_v28  ;;  %v2303_v7 = vmul.f32 %v6341_v58, %v5092_v46  ;;  %v2336_v28 = vmul.f32 %v6346_v25, %v5092_v46 }
 0x509   : > { %v1932_v9 = vadd.f32 %v1928_v49, %v1899_v0  ;;  %v1994_v55 = vsel %vm6409_vm8, %v1989_v47, %v5489_v38  ;;  %vm6420_vm8 = vcmask 621568  }
 0x50a   : > { %2518 = vrot.lane.b32.xlu1 %v2511_v23, %s6407_s22  ;;  %v2022_v41 = vpop.permute.xlu0 %2021 }
 0x50b   : > { %v1965_v57 = vadd.f32 %v1961_v33, %v1932_v9 }
 0x50c   : > { %2223 = vrot.lane.b32.xlu0 %v2215_v42, %s6338_s17  ;;  %v5500_v12 = vpop.permute.xlu1 %2023  ;;  %v2314_v42 = vmul.f32 %v6347_v40, %v2303_v7 }
 0x50d   : > { %v2027_v1 = vsel %vm6410_vm12, %v2022_v41, %v5500_v12  ;;  %v1998_v51 = vadd.f32 %v1994_v55, %v1965_v57  ;;  %v2347_v55 = vmul.f32 %v6352_v56, %v2336_v28  ;;  %v2369_v57 = vmul.f32 %v6351_v29, %v5092_v46 }
 0x50e   : > { %v2055_v24 = vpop.permute.xlu0 %2054  ;;  %v2587_v28 = vmul.f32 %v6387_v11, %v5330_v14  ;;  %vm6421_vm12 = vcmask 506880  }
 0x50f   : > { %v2031_v54 = vadd.f32 %v2027_v1, %v1998_v51  ;;  %v2380_v30 = vmul.f32 %v6357_v18, %v2369_v57  ;;  %v2402_v1 = vmul.f32 %v6356_v6, %v5092_v46 }
 0x510   : > { %2256 = vrot.lane.b32.xlu0 %v2248_v36, %s6340_s27  ;;  %v5510_v17 = vpop.permute.xlu1 %2056 }
 0x511   : > { %v2060_v37 = vsel %vm6411_vm13, %v2055_v24, %v5510_v17  ;;  %vm6425_vm13 = vcmask 498688  }
 0x512   : > { %v2088_v47 = vpop.permute.xlu0 %2087  ;;  %v2064_v23 = vadd.f32 %v2060_v37, %v2031_v54  ;;  %v2413_v54 = vmul.f32 %v6360_v34, %v2402_v1 }
 0x514   : > { %2289 = vrot.lane.b32.xlu0 %v2281_v15, %s6344_s20  ;;  %v5518_v22 = vpop.permute.xlu1 %2089 }
 0x515   : > { %v2093_v49 = vsel %vm6412_vm0, %v2088_v47, %v5518_v22  ;;  %v2435_v47 = vmul.f32 %v6359_v43, %v5092_v46  ;;  %vm6432_vm0 = vcmask 1031168  }
 0x516   : > { %v2097_v0 = vadd.f32 %v2093_v49, %v2064_v23  ;;  %v2121_v41 = vpop.permute.xlu0 %2120  ;;  %v2468_v49 = vmul.f32 %v6364_v16, %v5092_v46 }
 0x517   : > { %v2446_v23 = vmul.f32 %v6365_v20, %v2435_v47 }
 0x518   : > { %2322 = vrot.lane.b32.xlu0 %v2314_v42, %s6349_s6  ;;  %v5526_v26 = vpop.permute.xlu1 %2122  ;;  %v2479_v42 = vmul.f32 %v5072_v19, %v2468_v49 }
 0x519   : > { %v2126_v58 = vsel %vm6413_vm5, %v2121_v41, %v5526_v26  ;;  %vm6437_vm5 = vcmask 1022976  }
 0x51a   : > { %v2130_v33 = vadd.f32 %v2126_v58, %v2097_v0  ;;  %v2154_v9 = vpop.permute.xlu0 %2153 }
 0x51c   : > { %2355 = vrot.lane.b32.xlu0 %v2347_v55, %s6354_s0  ;;  %v5534_v40 = vpop.permute.xlu1 %2155  ;;  %v2672_v55 = vmul.f32 %v6388_v8, %v5330_v14 }
 0x51d   : > { %v2159_v25 = vsel %vm6414_vm9, %v2154_v9, %v5534_v40  ;;  %v2607_v9 = vmul.f32 %v6385_v52, %v2587_v28  ;;  %vm6441_vm9 = vcmask 269312  }
 0x51e   : > { %v2163_v24 = vadd.f32 %v2159_v25, %v2130_v33  ;;  %v2187_v36 = vpop.permute.xlu0 %2186 }
 0x520   : > { %2388 = vrot.lane.b32.xlu0 %v2380_v30, %s6190_s15  ;;  %v5542_v56 = vpop.permute.xlu1 %2188  ;;  %v2738_v30 = vmul.f32 %v6393_v45, %v5330_v14 }
 0x521   : > { %v2192_v29 = vsel %vm6415_vm11, %v2187_v36, %v5542_v56  ;;  %v2683_v36 = vmul.f32 %v6390_v27, %v2672_v55  ;;  %v6424_v55 = vld [vmem:[#allocation33_spill] sm:$0xff]  ;;  %vm6442_vm11 = vcmask 1014784  }
 0x522   : > { %v2196_v51 = vadd.f32 %v2192_v29, %v2163_v24  ;;  %v2220_v37 = vpop.permute.xlu0 %2219 }
 0x524   : > { %2421 = vrot.lane.b32.xlu0 %v2413_v54, %s6362_s13  ;;  %v5550_v18 = vpop.permute.xlu1 %2221  ;;  %v2589_v54 = vmul.f32 %v6387_v11, %v5374_v2 }
 0x525   : > { %v2225_v6 = vsel %vm6416_vm2, %v2220_v37, %v5550_v18  ;;  %v2749_v37 = vmul.f32 %v6395_v48, %v2738_v30  ;;  %v6427_v30 = vld [vmem:[#allocation51_spill] sm:$0xff]  ;;  %vm6444_vm2 = vcmask 916480  }
 0x526   : > { %v2229_v15 = vadd.f32 %v2225_v6, %v2196_v51  ;;  %v2253_v7 = vpop.permute.xlu0 %2252 }
 0x528   : > { %2454 = vrot.lane.b32.xlu0 %v2446_v23, %s6367_s16  ;;  %v5558_v34 = vpop.permute.xlu1 %2254  ;;  %v2674_v23 = vmul.f32 %v6388_v8, %v5374_v2 }
 0x529   : > { %v2258_v43 = vsel %vm6417_vm14, %v2253_v7, %v5558_v34  ;;  %v2609_v7 = vmul.f32 %v6384_v5, %v2589_v54  ;;  %vm6445_vm14 = vcmask 908288  }
 0x52a   : > { %v2262_v0 = vadd.f32 %v2258_v43, %v2229_v15  ;;  %v2286_v41 = vpop.permute.xlu0 %2285 }
 0x52c   : > { %2487 = vrot.lane.b32.xlu0 %v2479_v42, %s6369_s25  ;;  %v5566_v20 = vpop.permute.xlu1 %2287 }
 0x52d   : > { %v2291_v16 = vsel %vm6418_vm7, %v2286_v41, %v5566_v20  ;;  %v2740_v41 = vmul.f32 %v6393_v45, %v5374_v2  ;;  %vm6447_vm7 = vcmask 891904  }
 0x52e   : > { %v2295_v58 = vadd.f32 %v2291_v16, %v2262_v0  ;;  %v2319_v33 = vpop.permute.xlu0 %2318  ;;  %v2685_v0 = vmul.f32 %v6389_v39, %v2674_v23  ;;  %v2631_v39 = vmul.f32 %v6370_v35, %v6386_v63  ;;  %v2706_v35 = vmul.f32 %v6427_v30, %v6386_v63 }
 0x52f   : > { %v2751_v16 = vmul.f32 %v6394_v62, %v2740_v41  ;;  %v6426_v62 = vld [vmem:[#allocation30_spill] sm:$0xff]  ;;  %v6434_v41 = vld [vmem:[#allocation64_spill] sm:$0xff] }
 0x530   : > { %2613 = vrot.lane.b32.xlu0 %v2607_v9, %s6330_s12  ;;  %v5574_v19 = vpop.permute.xlu1 %2320  ;;  %v6423_v9 = vld [vmem:[#allocation54_spill] sm:$0xff] }
 0x531   : > { %v2324_v57 = vsel %vm6419_vm1, %v2319_v33, %v5574_v19  ;;  %v2646_v45 = vsel %vm645_vm6, %v6424_v55, %v6423_v9  ;;  %vm6430_vm6 = vcmask 1039360   ;;  %v6439_v9 = vld [vmem:[#allocation65_spill] sm:$0xff]  ;;  %vm6448_vm1 = vcmask 883712  }
 0x532   : > { %v2328_v25 = vadd.f32 %v2324_v57, %v2295_v58  ;;  %v2352_v24 = vpop.permute.xlu0 %2351  ;;  %v6422_v58 = vld [vmem:[#allocation76_spill] sm:$0xff] }
 0x533   : > { %v1677_v33 = vmul.f32 %v6392_v10, %v6422_v58  ;;  %v2651_v10 = vmul.f32 %v2646_v45, %v2631_v39 }
 0x534   : > { %2689 = vrot.lane.b32.xlu0 %v2683_v36, %s6155_s26  ;;  %v5582_v52 = vpop.permute.xlu1 %2353 }
 0x535   : > { %v2357_v1 = vsel %vm6420_vm8, %v2352_v24, %v5582_v52  ;;  %v1690_v24 = vmul.f32 %v6426_v62, %v1677_v33  ;;  %v6438_v33 = vld [vmem:[#allocation46_spill] sm:$0xff]  ;;  %vm6449_vm8 = vcmask 785408  }
 0x536   : > { %v2361_v29 = vadd.f32 %v2357_v1, %v2328_v25  ;;  %v2385_v51 = vpop.permute.xlu0 %2384  ;;  %v6428_v1 = vld [vmem:[#allocation58_spill] sm:$0xff]  ;;  %v2805_v39 = vmul.f32 %v6438_v33, %v6386_v63 }
 0x538   : > { %2755 = vrot.lane.b32.xlu0 %v2749_v37, %s6160_s29  ;;  %v5590_v27 = vpop.permute.xlu1 %2386 }
 0x539   : > { %v2390_v47 = vsel %vm1296_vm3, %v2385_v51, %v5590_v27 }
 0x53a   : > { %v2394_v6 = vadd.f32 %v2390_v47, %v2361_v29  ;;  %v2418_v15 = vpop.permute.xlu0 %2417  ;;  %v6429_v29 = vld [vmem:[#allocation57_spill] sm:$0xff] }
 0x53b   : > { %v2712_v51 = vsel %vm807_vm10, %v6429_v29, %v6428_v1  ;;  %vm6436_vm10 = vcmask 261120   ;;  %v2501_v29 = vmul.f32 %v6401_v60, %v5092_v46 }
 0x53c   : > { %v5597_v49 = vpop.permute.xlu1 %2419  ;;  %2617 = vrot.lane.b32.xlu0 %v2609_v7, %s6330_s12  ;;  %s3247_s12 = sshll.u32 %s3385_s18, 4  ;;  %s3248_s12 = int_to_ptr.vmem [resolvable:$false] %s3247_s12 }
 0x53d   : > { %v2423_v48 = vsel %vm1347_vm15, %v2418_v15, %v5597_v49  ;;  %v6431_v15 = vld [vmem:[#allocation74_spill] sm:$0xff] }
 0x53e   : > { %v2427_v11 = vadd.f32 %v2423_v48, %v2394_v6  ;;  %v2451_v43 = vpop.permute.xlu0 %2450  ;;  %v2717_v6 = vmul.f32 %v2712_v51, %v2706_v35  ;;  %v2499_v7 = vmul.f32 %v6401_v60, %v6431_v15 }
 0x540   : > { %v5605_v42 = vpop.permute.xlu1 %2452  ;;  %2693 = vrot.lane.b32.xlu0 %v2685_v0, %s6155_s26  ;;  %v6433_v0 = vld [vmem:[#allocation32_spill] sm:$0xff]  ;;  %s6489_s26 = sld [smem:[#allocation16_spill]] }
 0x541   : > { %v2456_v8 = vsel %vm6421_vm12, %v2451_v43, %v5605_v42  ;;  %v2510_v43 = vmul.f32 %v6404_v53, %v2499_v7  ;;  %v6440_v53 = vld [vmem:[#allocation63_spill] sm:$0xff]  ;;  %vm6450_vm12 = vcmask 777216  }
 0x542   : > { %v2460_v5 = vadd.f32 %v2456_v8, %v2427_v11  ;;  %v2484_v28 = vpop.permute.xlu0 %2483  ;;  %v6435_v8 = vld [vmem:[#allocation61_spill] sm:$0xff]  ;;  %v2811_v55 = vsel %vm6441_vm9, %v6440_v53, %v6439_v9  ;;  %vm6456_vm9 = vcmask 637952  }
 0x544   : > { %v5618_v2 = vpop.permute.xlu1 %2485  ;;  %2759 = vrot.lane.b32.xlu0 %v2751_v16, %s6160_s29 }
 0x545   : > { %v2489_v57 = vsel %vm6425_vm13, %v2484_v28, %v5618_v2  ;;  %vm6451_vm13 = vcmask 769024  }
 0x546   : > { %v5623_v25 = vadd.f32 %v2489_v57, %v2460_v5  ;;  %v1732_v36 = vpop.permute.xlu0 %1731  ;;  %v2778_v5 = vsel %vm6436_vm10, %v6435_v8, %v6434_v41  ;;  %vm6454_vm10 = vcmask 654336   ;;  %p6491_p11 = scmp.ne.s32.totalorder %s6489_s26, 0 }
 0x547   : > { %v1734_v37 = vsel %vm6430_vm6, %v5397_v59, %v1732_v36  ;;  %v2772_v59 = vmul.f32 %v6433_v0, %v6386_v63  ;;  %v6443_v36 = vld [vmem:[#allocation66_spill] sm:$0xff]  ;;  %vm6452_vm6 = vcmask 760832  }
 0x548   : > { %v1738_v54 = vadd.f32 %v1734_v37, %v1690_v24  ;;  %2658 = vrot.lane.b32.xlu0 %v2651_v10, %s6331_s14  ;;  %v2838_v24 = vmul.f32 %v6378_v61, %v6386_v63  ;;  %v2844_v10 = vsel %vm538_vm4, %v6443_v36, %v6400_v44  ;;  %v2512_v44 = vmul.f32 %v6403_v50, %v2501_v29  ;;  %s3249_s14 = scalar_lea.vmem %s3248_s12, 512 }
 0x549   : > { %v2783_v58 = vmul.f32 %v2778_v5, %v2772_v59  ;;  %vm6446_vm4 = vcmask 900096  }
 0x54a   : > { %v1775_v47 = vpop.permute.xlu0 %1774 }
 0x54b   : > { %v1777_v23 = vsel %vm6432_vm0, %v5407_v31, %v1775_v47  ;;  %vm6453_vm0 = vcmask 752640  }
 0x54c   : > { %v1781_v48 = vadd.f32 %v1777_v23, %v1738_v54  ;;  %2724 = vrot.lane.b32.xlu0 %v2717_v6, %s6158_s28 }
 0x54e   : > { %v1818_v11 = vpop.permute.xlu0 %1817 }
 0x54f   : > { %v1820_v28 = vsel %vm6437_vm5, %v5417_v4, %v1818_v11  ;;  %v2816_v4 = vmul.f32 %v2811_v55, %v2805_v39  ;;  %vm6455_vm5 = vcmask 646144  }
 0x550   : > { %v1824_v16 = vadd.f32 %v1820_v28, %v1781_v48  ;;  %2516 = vrot.lane.b32.xlu0 %v2510_v43, %s6407_s22  ;;  %v2657_v28 = vpop.permute.xlu1 %2656 }
 0x552   : > { %v1861_v31 = vpop.permute.xlu0 %1860 }
 0x553   : > { %v1863_v45 = vsel %vm6442_vm11, %v5430_v21, %v1861_v31  ;;  %v2849_v21 = vmul.f32 %v2844_v10, %v2838_v24  ;;  %vm6457_vm11 = vcmask 629760  }
 0x554   : > { %v1867_v57 = vadd.f32 %v1863_v45, %v1824_v16  ;;  %2790 = vrot.lane.b32.xlu0 %v2783_v58, %s6169_s3  ;;  %v2723_v33 = vpop.permute.xlu1 %2722  ;;  %s6481_s3 = sld [smem:[#allocation18_spill]] }
 0x556   : > { %v1894_v62 = vpop.permute.xlu0 %1893 }
 0x557   : > { %v1896_v30 = vsel %vm6444_vm2, %v5444_v13, %v1894_v62  ;;  %vm6458_vm2 = vcmask 621568  }
 0x558   : > { %v1900_v35 = vadd.f32 %v1896_v30, %v1867_v57  ;;  %2823 = vrot.lane.b32.xlu0 %v2816_v4, %s6173_s5  ;;  %v2789_v53 = vpop.permute.xlu1 %2788  ;;  %s6483_s5 = sld [smem:[#allocation13_spill]] }
 0x55a   : > { %v1927_v1 = vpop.permute.xlu0 %1926  ;;  %s6488_s15 = sshll.u32 %s6481_s3, 4  ;;  %s2895_s8 = scalar_lea.sflag [#allocation5], %s6481_s3 }
 0x55b   : > { %v1929_v51 = vsel %vm6445_vm14, %v5459_v32, %v1927_v1  ;;  %vm6460_vm14 = vcmask 1039360   ;;  %s429_s23 = scalar_lea.vmem [#allocation6], %s6488_s15 }
 0x55c   : > { %v1933_v37 = vadd.f32 %v1929_v51, %v1900_v35  ;;  %2856 = vrot.lane.b32.xlu0 %v2849_v21, %s6175_s4  ;;  %v2822_v4 = vpop.permute.xlu1 %2821  ;;  %s2909_s19 = sshll.u32 %s429_s23, 4  ;;  %s5747_s19 = int_to_ptr.vmem [resolvable:$true] %s2909_s19 }
 0x55d   : > { %s3243_s21 = scalar_lea.vmem %s5747_s19, 256  ;;  %p3250_p7 = scmp.lt.s32.totalorder %s5747_s19, %s3248_s12 }
 0x55e   : > { %v1960_v61 = vpop.permute.xlu0 %1959  ;;  %s3012_s30 = sshll.u32 %s6483_s5, 8  ;;  %p3244_p6 = scmp.ne.s32.totalorder %s5747_s19, %s3243_s21 }
 0x55f   : > { %v1962_v13 = vsel %vm6446_vm4, %v5472_v3, %v1960_v61  ;;  %vm6461_vm4 = vmmov %vm6460_vm14  ;;  %s5745_s4 = scalar_lea.hbm %s6490_s2, %s3012_s30  ;;  %p3251_p10 = scmp.lt.s32.totalorder %s3249_s14, %s3243_s21 }
 0x560   : > { %v1966_v54 = vadd.f32 %v1962_v13, %v1933_v37  ;;  %2520 = vrot.lane.b32.xlu0 %v2512_v44, %s6407_s22  ;;  %v5697_v36 = vpop.permute.xlu1 %2854  ;;  %p3245_p12 = pnand %p3244_p6, %p6491_p11 }
 0x561   : > { %p3252_p2 = por %p3251_p10, %p3250_p7 }
 0x562   : > { %v1993_v47 = vpop.permute.xlu0 %1992  ;;  %p3246_p13 = pneg %p3245_p12 }
 0x563   : > { %v1995_v6 = vsel %vm6447_vm7, %v5489_v38, %v1993_v47  ;;  %vm6464_vm7 = vcmask 1031168  }
 0x564   : > { %v1999_v46 = vadd.f32 %v1995_v6, %v1966_v54  ;;  %v2661_v35 = vpop.permute.xlu1 %2660  ;;  %v6459_v54 = vld [vmem:[#allocation70_spill] sm:$0xff]  ;;  %p3253_p4 = pnand %p3252_p2, %p3246_p13 }
 0x565   : > { %v2563_v47 = vmul.f32 %v6459_v54, %v6386_v63 }
 0x566   : > { %v2026_v60 = vpop.permute.xlu0 %2025 }
 0x567   : > { %v2028_v32 = vsel %vm6448_vm1, %v5500_v12, %v2026_v60  ;;  %vm6465_vm1 = vmmov %vm6464_vm7 }
 0x568   : > { %v2032_v15 = vadd.f32 %v2028_v32, %v1999_v46  ;;  %v2727_v1 = vpop.permute.xlu1 %2726 }
 0x56a   : > { %v2059_v7 = vpop.permute.xlu0 %2058 }
 0x56b   : > { %v2061_v50 = vsel %vm6449_vm8, %v5510_v17, %v2059_v7  ;;  %vm6466_vm8 = vcmask 916480  }
 0x56c   : > { %v2065_v23 = vadd.f32 %v2061_v50, %v2032_v15  ;;  %v2793_v51 = vpop.permute.xlu1 %2792  ;;  %v6462_v15 = vld [vmem:[#allocation43_spill] sm:$0xff] }
 0x56d   : > { %v6463_v50 = vld [vmem:[#allocation23_spill] sm:$0xff] }
 0x56e   : > { %v2092_v48 = vpop.permute.xlu0 %2091 }
 0x56f   : > { %v2094_v3 = vsel %vm6450_vm12, %v5518_v22, %v2092_v48  ;;  %vm6467_vm12 = vmmov %vm6466_vm8 }
 0x570   : > { %v2098_v11 = vadd.f32 %v2094_v3, %v2065_v23  ;;  %v2576_v23 = vmul.f32 %v6463_v50, %v2563_v47 }
 0x572   : > { %v2125_v43 = vpop.permute.xlu0 %2124 }
 0x573   : > { %v2127_v38 = vsel %vm6451_vm13, %v5526_v26, %v2125_v43  ;;  %vm6468_vm13 = vcmask 908288  }
 0x574   : > { %v2131_v0 = vadd.f32 %v2127_v38, %v2098_v11 }
 0x576   : > { %v2158_v59 = vpop.permute.xlu0 %2157 }
 0x577   : > { %v2160_v12 = vsel %vm6452_vm6, %v5534_v40, %v2158_v59  ;;  %vm6469_vm6 = vmmov %vm6468_vm13 }
 0x578   : > { %v2164_v41 = vadd.f32 %v2160_v12, %v2131_v0 }
 0x57a   : > { %v2191_v8 = vpop.permute.xlu0 %2190 }
 0x57b   : > { %v2193_v17 = vsel %vm6453_vm0, %v5542_v56, %v2191_v8  ;;  %vm6470_vm0 = vcmask 900096  }
 0x57c   : > { %v2197_v5 = vadd.f32 %v2193_v17, %v2164_v41 }
 0x57e   : > { %v2224_v16 = vpop.permute.xlu0 %2223 }
 0x57f   : > { %v2226_v22 = vsel %vm6454_vm10, %v5550_v18, %v2224_v16  ;;  %vm6471_vm10 = vmmov %vm6470_vm0 }
 0x580   : > { %v2230_v31 = vadd.f32 %v2226_v22, %v2197_v5 }
 0x582   : > { %v2257_v58 = vpop.permute.xlu0 %2256 }
 0x583   : > { %v2259_v26 = vsel %vm6455_vm5, %v5558_v34, %v2257_v58  ;;  %vm6472_vm5 = vcmask 785408  }
 0x584   : > { %v2263_v39 = vadd.f32 %v2259_v26, %v2230_v31 }
 0x586   : > { %v2290_v9 = vpop.permute.xlu0 %2289 }
 0x587   : > { %v2292_v40 = vsel %vm6456_vm9, %v5566_v20, %v2290_v9  ;;  %vm6473_vm9 = vmmov %vm6472_vm5 }
 0x588   : > { %v2296_v55 = vadd.f32 %v2292_v40, %v2263_v39 }
 0x58a   : > { %v2323_v56 = vpop.permute.xlu0 %2322 }
 0x58b   : > { %v2325_v45 = vsel %vm6457_vm11, %v5574_v19, %v2323_v56  ;;  %v2826_v19 = vpop.permute.xlu1 %2825  ;;  %vm6474_vm11 = vcmask 777216  }
 0x58c   : > { %v2329_v57 = vadd.f32 %v2325_v45, %v2296_v55 }
 0x58e   : > { %v2356_v62 = vpop.permute.xlu0 %2355 }
 0x58f   : > { %v2358_v18 = vsel %vm6458_vm2, %v5582_v52, %v2356_v62  ;;  %v2616_v13 = vpop.permute.xlu1 %2615  ;;  %v2562_v52 = vmul.f32 %v5330_v14, %v6459_v54  ;;  %vm6475_vm2 = vmmov %vm6474_vm11 }
 0x590   : > { %v2362_v24 = vadd.f32 %v2358_v18, %v2329_v57 }
 0x591   : > { %v2575_v7 = vmul.f32 %v6462_v15, %v2562_v52  ;;  %v6482_v52 = vld [vmem:[#allocation72_spill] sm:$0xff] }
 0x592   : > { %v2389_v34 = vpop.permute.xlu0 %2388 }
 0x593   : > { %v2692_v32 = vpop.permute.xlu1 %2691  ;;  %v2391_v56 = vsel %vm1296_vm3, %v5590_v27, %v2389_v34  ;;  %vm6478_vm3 = vcmask 769024  }
 0x596   : > { %v2422_v10 = vpop.permute.xlu0 %2421 }
 0x597   : > { %v2758_v59 = vpop.permute.xlu1 %2757 }
 0x59a   : > { %v2455_v30 = vpop.permute.xlu0 %2454 }
 0x59e   : > { %v2488_v20 = vpop.permute.xlu0 %2487 }
 0x5a2   : > { %v2614_v21 = vpop.permute.xlu0 %2613 }
 0x5a3   : > { %v2619_v46 = vsel %vm6460_vm14, %v2614_v21, %v2616_v13  ;;  %vm6476_vm14 = vcmask 490496  }
 0x5a4   : > { %v2623_v43 = vadd.f32 %v2619_v46, %v2575_v7  ;;  %v6485_v46 = vld [vmem:[#allocation71_spill] sm:$0xff]  ;;  %v6487_v7 = vld [vmem:[#allocation48_spill] sm:$0xff] }
 0x5a6   : > { %v2690_v29 = vpop.permute.xlu0 %2689 }
 0x5a7   : > { %v2695_v12 = vsel %vm6466_vm8, %v2690_v29, %v2692_v32 }
 0x5aa   : > { %v2756_v37 = vpop.permute.xlu0 %2755 }
 0x5ab   : > { %v2761_v39 = vsel %vm6470_vm0, %v2756_v37, %v2758_v59  ;;  %v2395_v37 = vadd.f32 %v2391_v56, %v2362_v24 }
 0x5ae   : > { %v2618_v61 = vpop.permute.xlu0 %2617 }
 0x5af   : > { %v2620_v60 = vsel %vm6461_vm4, %v2616_v13, %v2618_v61  ;;  %vm6477_vm4 = vcmask 506880  }
 0x5b0   : > { %v2624_v14 = vadd.f32 %v2620_v60, %v2576_v23 }
 0x5b2   : > { %v2694_v44 = vpop.permute.xlu0 %2693 }
 0x5b3   : > { %v2696_v41 = vsel %vm6467_vm12, %v2692_v32, %v2694_v44  ;;  %v6486_v32 = vld [vmem:[#allocation47_spill] sm:$0xff] }
 0x5b6   : > { %v2760_v6 = vpop.permute.xlu0 %2759 }
 0x5b7   : > { %v2762_v9 = vsel %vm6471_vm10, %v2758_v59, %v2760_v6 }
 0x5ba   : > { %v2659_v48 = vpop.permute.xlu0 %2658 }
 0x5bb   : > { %v2662_v3 = vsel %vm6464_vm7, %v2657_v28, %v2659_v48  ;;  %v2663_v11 = vsel %vm6465_vm1, %v2659_v48, %v2661_v35  ;;  %v2859_v28 = vpop.permute.xlu1 %2858  ;;  %vm6479_vm7 = vmmov %vm6478_vm3  ;;  %vm6480_vm1 = vcmask 498688  }
 0x5bc   : > { %v2666_v38 = vadd.f32 %v2662_v3, %v2623_v43  ;;  %v2667_v0 = vadd.f32 %v2663_v11, %v2624_v14 }
 0x5be   : > { %v2725_v63 = vpop.permute.xlu0 %2724  ;;  %v2699_v8 = vadd.f32 %v2695_v12, %v2666_v38  ;;  %v2700_v17 = vadd.f32 %v2696_v41, %v2667_v0 }
 0x5bf   : > { %v2728_v16 = vsel %vm6468_vm13, %v2723_v33, %v2725_v63  ;;  %v2729_v22 = vsel %vm6469_vm6, %v2725_v63, %v2727_v1  ;;  %v2519_v35 = vpop.permute.xlu1 %2518  ;;  %v2424_v1 = vsel %vm1347_vm15, %v5597_v49, %v2422_v10  ;;  %v2490_v49 = vsel %vm6480_vm1, %v5618_v2, %v2488_v20  ;;  %vm6484_vm15 = vmmov %vm6476_vm14 }
 0x5c0   : > { %v2732_v31 = vadd.f32 %v2728_v16, %v2699_v8  ;;  %v2733_v58 = vadd.f32 %v2729_v22, %v2700_v17  ;;  %v2428_v44 = vadd.f32 %v2424_v1, %v2395_v37 }
 0x5c2   : > { %v2517_v5 = vpop.permute.xlu0 %2516  ;;  %v2765_v45 = vadd.f32 %v2761_v39, %v2732_v31  ;;  %v2766_v57 = vadd.f32 %v2762_v9, %v2733_v58 }
 0x5c6   : > { %v2791_v26 = vpop.permute.xlu0 %2790 }
 0x5c7   : > { %v2794_v40 = vsel %vm6472_vm5, %v2789_v53, %v2791_v26  ;;  %v2795_v55 = vsel %vm6473_vm9, %v2791_v26, %v2793_v51  ;;  %v2522_v53 = vsel %vm6476_vm14, %v2517_v5, %v2519_v35  ;;  %v2457_v51 = vsel %vm6477_vm4, %v5605_v42, %v2455_v30 }
 0x5c8   : > { %v2798_v21 = vadd.f32 %v2794_v40, %v2765_v45  ;;  %v2799_v29 = vadd.f32 %v2795_v55, %v2766_v57  ;;  %v2526_v24 = vadd.f32 %v2522_v53, %v5623_v25  ;;  %v2461_v54 = vadd.f32 %v2457_v51, %v2428_v44 }
 0x5ca   : > { %v2824_v33 = vpop.permute.xlu0 %2823  ;;  %v2494_v6 = vadd.f32 %v2490_v49, %v2461_v54  ;;  %v2534_v60 = vadd.f32 %v6485_v46, %v2526_v24 }
 0x5cb   : > { %v2827_v62 = vsel %vm6474_vm11, %v2822_v4, %v2824_v33  ;;  %v2828_v18 = vsel %vm6475_vm2, %v2824_v33, %v2826_v19 }
 0x5cc   : > { %v2831_v27 = vadd.f32 %v2827_v62, %v2798_v21  ;;  %v2832_v34 = vadd.f32 %v2828_v18, %v2799_v29 }
 0x5ce   : > { %v2857_v61 = vpop.permute.xlu0 %2856 }
 0x5cf   : > { %v2860_v4 = vsel %vm6478_vm3, %v5697_v36, %v2857_v61  ;;  %v2861_v19 = vsel %vm6479_vm7, %v2857_v61, %v2859_v28 }
 0x5d0   : > { %v2864_v10 = vadd.f32 %v2860_v4, %v2831_v27  ;;  %v2865_v13 = vadd.f32 %v2861_v19, %v2832_v34 }
 0x5d2   : > { %v2872_v42 = vadd.f32 %v6482_v52, %v2864_v10  ;;  %v2873_v30 = vadd.f32 %v6482_v52, %v2865_v13  ;;  %v2521_v47 = vpop.permute.xlu0 %2520 }
 0x5d3   : > { %v2523_v36 = vsel %vm6484_vm15, %v2519_v35, %v2521_v47 }
 0x5d4   : > { %v2874_v15 = vadd.f32 %v2872_v42, %v6486_v32  ;;  %v2875_v2 = vadd.f32 %v2873_v30, %v6487_v7  ;;  %v2880_v20 = vrot.slane %v2872_v42, 4  ;;  %v2527_v25 = vadd.f32 %v2523_v36, %v2494_v6 }
 0x5d5   : > { %v2881_v23 = vrot.slane %v2873_v30, 4 }
 0x5d6   : > { %2876 = vst [vmem:[%s429_s23] sm:$0xf] %v2874_v15  ;;  %2877 = vst [vmem:[%s429_s23 + $0x8] sm:$0xf] %v2875_v2  ;;  %v2884_v50 = vadd.f32 %v2880_v20, %v2534_v60  ;;  %v2535_v48 = vadd.f32 %v6485_v46, %v2527_v25 }
 0x5d8   : > { %v2888_v3 = vrot.slane %v2884_v50, 4  ;;  %v2885_v11 = vadd.f32 %v2881_v23, %v2535_v48 }
 0x5da   : > { %2892 = vst [vmem:[%s429_s23] sm:$0xf0] %v2888_v3  ;;  %v2889_v43 = vrot.slane %v2885_v11, 4 }
 0x5dc   : > { %2893 = vst [vmem:[%s429_s23 + $0x8] sm:$0xf0] %v2889_v43 }
 0x5dd   : > { %3256 = shalt.err (!%p3253_p4)
}
 0x5de   : > { %s3257_s24 = scalar_lea.hbm %s5745_s4, 256  ;;  %s3261_s20 = scalar_lea.hbm %s6490_s2, 512 }
 0x5df   : > { %p3258_p5 = scmp.ne.s32.totalorder %s5745_s4, %s3257_s24  ;;  %p3262_p0 = scmp.lt.u32.totalorder %s5745_s4, %s6490_s2 }
 0x5e0   : > { %p3263_p1 = scmp.lt.u32.totalorder %s3261_s20, %s3257_s24  ;;  %p3265_p6 = scmp.lt.u32.totalorder %s3257_s24, %s5745_s4 }
 0x5e1   : > { %p3259_p8 = pnand %p3258_p5, %p6491_p11 }
 0x5e2   : > { %p3264_p3 = por %p3263_p1, %p3262_p0 }
 0x5e3   : > { %p3260_p9 = pneg %p3259_p8 }
 0x5e4   : > { %p3266_p12 = por %p3265_p6, %p3264_p3 }
 0x5e6   : > { %p3267_p13 = pnand %p3266_p12, %p3260_p9 }
 0x5e8   : > { %3270 = shalt.err (!%p3267_p13)
}
 0x5e9   : > { %3017 = dma.vmem_to_hbm [thread:$0]  (%p6491_p11), %s5747_s19, 256, %s5745_s4, %s2895_s8  }
 0x5ea PF: > { %s6492_s13 = sld [smem:[#allocation9_spill]]  ;;  %s6493_s16 = sld [smem:[#allocation17_spill]] }
 0x5eb   : > { %s6494_s25 = sld [smem:[#allocation12_spill]] }
 0x5f0   : > { %s2921_s22 = sand.u32 1, %s6492_s13   ;;  %p6495_p7 = scmp.ne.s32.totalorder %s6493_s16, 0 }
 0x5f1   : > { %p6496_p10 = scmp.ge.s32.totalorder %s6494_s25, 2  ;;  %s2922_s3 = scalar_lea.sflag [#allocation5], %s2921_s22 }
 0x5f3   : > { %p3024_p2 = pnand %p6496_p10, %p6495_p7 }
 0x5f5   : > { %3292 = dma.done.wait (!%p3024_p2), %s2922_s3, 256  }
 0x5f6   : > { %3294 = vsyncadd (!%p3024_p2), %s2922_s3, 4294967040  ;;  %s6497_s24 = sld [smem:[#allocation14_spill]]  ;;  %s6498_s21 = sld [smem:[#allocation10_spill]] }
 0x5f7   : > { %s6499_s22 = sld [smem:[#allocation11_spill]]  ;;  %s6500_s23 = sld [smem:[#allocation15_spill]] }
 0x5fc   : > { %p25_p4 = scmp.ge.s32.totalorder %s6497_s24, 4  }
 0x5fe   :  { %27 = sbr.rel (!%p25_p4) target bundleno = 14 (0xe), region = 117 }
 0x605   :  { %2927 = vsyncpa [#allocation4], 1 }
 0x606   :  { %2929 = vsyncpa [#allocation4 + $0x1], 1 }
 0x607   :  { %2930 = vsyncpa [#allocation5], 1 }
 0x608   :  { %2932 = vsyncpa [#allocation5 + $0x1], 1 }

</bundles_post_ra>
